<compile_context>
chip_gen: v5e
topology: v5e:2x2
jax: 0.10.0
libtpu: 0.0.40
codegen_flags: <defaults>
</compile_context>

<pallas_src>
import functools

import numpy as np
import jax
import jax.numpy as jnp
from jax.experimental import pallas as pl
from jax.experimental.pallas import tpu as pltpu

C = 32        # channels (fixed by LightEAM.__init__)
CR = C // 4   # attention bottleneck channels


# --------------------------------------------------------------------------- #
# Pallas kernel (built per (H, W) so static shapes/offsets are closed over)
# --------------------------------------------------------------------------- #
def _make_kernel(H, W):
    HW = H * W
    # Left/right halo of the flat padded scratch: must cover the largest shift
    # magnitude (2*W + 2 for dilation 2) and is rounded up to a full lane tile
    # so the interior store stays lane-aligned.
    P = ((2 * W + 2 + 127) // 128) * 128
    L = P + HW + P

    def conv3x3(x_f32, wmat_ref, b_ref, d, *, pad_ref, col_ref, wcoord):
        """3x3 'same' conv (dilation=d, padding=d) + bias. Returns (C, HW) f32."""
        # Place the (bf16) input in the interior of the flat padded scratch.
        # The halo regions are zero (zeroed once per kernel invocation) and are
        # never written here, so they stay valid for the dilated conv too.
        pad_ref[:, P:P + HW] = x_f32.astype(jnp.bfloat16)

        # Valid-column masks for the W-edge wrap: in the flat layout a lane
        # shift past a row end would read the neighbouring row, so mask it.
        m_neg = wcoord >= d            # source column w - d >= 0
        m_pos = wcoord < (W - d)       # source column w + d <  W

        for ky in range(3):
            dy = (ky - 1) * d
            for kx in range(3):
                dx = (kx - 1) * d
                off = dy * W + dx                          # static lane offset
                s = pad_ref[:, P + off:P + off + HW]       # (C, HW) bf16
                if dx < 0:
                    s = jnp.where(m_neg, s, 0.0)
                elif dx > 0:
                    s = jnp.where(m_pos, s, 0.0)
                k = ky * 3 + kx
                col_ref[k * C:(k + 1) * C, :] = s          # build im2col slab

        y = jnp.dot(wmat_ref[...], col_ref[...],
                    preferred_element_type=jnp.float32)    # one MXU matmul, K=288
        return y + b_ref[...]                              # (C,1) bias -> broadcast over lanes

    def kernel(x_ref, wc_ref,
               w1_ref, b1_ref, w2_ref, b2_ref,
               w5_ref, b5_ref, w6_ref, b6_ref,
               wa1_ref, ba1_ref, wa2_ref, ba2_ref,
               o_ref,
               pad_ref, col_ref):
        relu = lambda t: jnp.maximum(t, 0.0)
        x = x_ref[0].astype(jnp.float32)                   # (C, HW)
        wcoord = wc_ref[...]                               # (1, HW) int32: w coord of each lane

        # Zero the padded scratch once; conv interiors only rewrite [P, P+HW),
        # so the halo remains zero between the dil=1 and dil=2 convs.
        pad_ref[...] = jnp.zeros(pad_ref.shape, pad_ref.dtype)

        conv = functools.partial(conv3x3, pad_ref=pad_ref, col_ref=col_ref,
                                 wcoord=wcoord)
        c1 = relu(conv(x, w1_ref, b1_ref, 1))              # conv1
        c1 = relu(conv(c1, w2_ref, b2_ref, 2))             # conv2 (dilated)
        c3 = relu(conv(c1, w5_ref, b5_ref, 1))             # conv5
        add1 = x + c3
        c4 = relu(conv(add1, w6_ref, b6_ref, 1))           # conv6
        add2 = relu(add1 + c4)

        # --- squeeze-excitation tail, entirely VPU/XLU (no tiny MXU dots) ---
        gap = jnp.sum(add2, axis=1, keepdims=True) * (1.0 / HW)                 # (C, 1)
        a1 = relu(jnp.sum(wa1_ref[...] * gap, axis=0, keepdims=True)
                  + ba1_ref[...])                                               # (1, CR)
        z = jnp.sum(wa2_ref[...] * a1, axis=1, keepdims=True) + ba2_ref[...]    # (C, 1)
        att = 1.0 / (1.0 + jnp.exp(-z))                                         # sigmoid
        o_ref[0] = (x + att * add2).astype(o_ref.dtype)

    return kernel, L


# --------------------------------------------------------------------------- #
# Wrapper: NCHW <-> (N, C, H*W) plumbing, weight re-layout, pallas_call
# --------------------------------------------------------------------------- #
def _full_spec(shape):
    rank = len(shape)
    return pl.BlockSpec(shape, lambda n, _r=rank: (0,) * _r)


def light_eam_forward(x_nchw, p):
    N, Cin, H, W = x_nchw.shape
    assert Cin == C
    HW = H * W
    x = x_nchw.reshape(N, C, HW)                        # free contiguous reshape

    kernel, L = _make_kernel(H, W)

    # conv weights: torch (Cout, Cin, 3, 3) -> (Cout, 9*Cin), tap-major (k=ky*3+kx),
    # cast to bf16 for the MXU (accumulation stays f32 in-kernel).
    def conv_w(w):
        return jnp.transpose(w, (0, 2, 3, 1)).reshape(C, 9 * C).astype(jnp.bfloat16)

    w1, w2, w5, w6 = map(conv_w, (p['w1'], p['w2'], p['w5'], p['w6']))
    b1, b2, b5, b6 = (p['b1'].reshape(C, 1), p['b2'].reshape(C, 1),
                      p['b5'].reshape(C, 1), p['b6'].reshape(C, 1))
    wa1 = jnp.transpose(p['wa1'][:, :, 0, 0], (1, 0))   # (C, CR)
    ba1 = p['ba1'].reshape(1, CR)
    wa2 = p['wa2'][:, :, 0, 0]                          # (C, CR)
    ba2 = p['ba2'].reshape(C, 1)
    wcoord = (jnp.arange(HW, dtype=jnp.int32) % W).reshape(1, HW)

    # Rough per-step VMEM budget check (double-buffered blocks + weights + scratch).
    # TODO(synk): for large images, tile H into row bands with a 2*dilation-row
    #             halo so per-step blocks fit v7x's 64 MiB VMEM.
    vmem_est = (2 * 2 * (C * HW * 4)            # x / out blocks, double-buffered (f32)
                + 2 * 4 * (C * 9 * C * 2)       # conv weights (bf16)
                + (C * L + 9 * C * HW) * 2      # pad + im2col scratch (bf16)
                + (1 << 16))                    # biases / SE params / wcoord / slack
    if vmem_est > 48 * 1024 * 1024:
        raise ValueError("LightEAM Pallas kernel: image too large for whole-frame "
                         "blocks; add row-band spatial tiling")

    in_specs = [
        pl.BlockSpec((1, C, HW), lambda n: (n, 0, 0)),   # x
        _full_spec((1, HW)),                             # wcoord
        _full_spec((C, 9 * C)), _full_spec((C, 1)),      # conv1
        _full_spec((C, 9 * C)), _full_spec((C, 1)),      # conv2
        _full_spec((C, 9 * C)), _full_spec((C, 1)),      # conv5
        _full_spec((C, 9 * C)), _full_spec((C, 1)),      # conv6
        _full_spec((C, CR)), _full_spec((1, CR)),        # attention 1x1 #1
        _full_spec((C, CR)), _full_spec((C, 1)),         # attention 1x1 #2
    ]

    out_flat = pl.pallas_call(
        kernel,
        out_shape=jax.ShapeDtypeStruct((N, C, HW), x.dtype),
        grid_spec=pltpu.PrefetchScalarGridSpec(
            num_scalar_prefetch=0,
            grid=(N,),
            in_specs=in_specs,
            out_specs=pl.BlockSpec((1, C, HW), lambda n: (n, 0, 0)),
            scratch_shapes=[pltpu.VMEM((C, L), jnp.bfloat16),        # flat padded input
                            pltpu.VMEM((9 * C, HW), jnp.bfloat16)],  # im2col slab
        ),
        compiler_params=pltpu.CompilerParams(
            dimension_semantics=("parallel",)),
    )(x, wcoord, w1, b1, w2, b2, w5, b5, w6, b6, wa1, ba1, wa2, ba2)

    return out_flat.reshape(N, C, H, W)                 # free contiguous reshape


# --------------------------------------------------------------------------- #
# Pure-JAX reference (NCHW, lax.conv, f32) for correctness checking
# --------------------------------------------------------------------------- #
def light_eam_reference(x, p):
    def conv(t, w, b, dil, pad):
        y = jax.lax.conv_general_dilated(
            t, w, window_strides=(1, 1),
            padding=((pad, pad), (pad, pad)), rhs_dilation=(dil, dil),
            dimension_numbers=('NCHW', 'OIHW', 'NCHW'),
            precision=jax.lax.Precision.HIGHEST)
        return y + b.reshape(1, -1, 1, 1)

    relu = lambda t: jnp.maximum(t, 0.0)
    c1 = relu(conv(x, p['w1'], p['b1'], 1, 1))
    c1 = relu(conv(c1, p['w2'], p['b2'], 2, 2))
    c3 = relu(conv(c1, p['w5'], p['b5'], 1, 1))
    add1 = x + c3
    c4 = relu(conv(add1, p['w6'], p['b6'], 1, 1))
    add2 = relu(add1 + c4)
    gap = jnp.mean(add2, axis=(2, 3), keepdims=True)
    a1 = relu(conv(gap, p['wa1'], p['ba1'], 1, 0))
    att = jax.nn.sigmoid(conv(a1, p['wa2'], p['ba2'], 1, 0))
    return x + att * add2


# --------------------------------------------------------------------------- #
# Main
# --------------------------------------------------------------------------- #
def _init_params(key):
    ks = jax.random.split(key, 12)

    def w(k, shape, fan_in):
        return (jax.random.normal(k, shape, jnp.float32) / np.sqrt(fan_in)).astype(jnp.float32)

    return {
        'w1': w(ks[0], (C, C, 3, 3), C * 9),  'b1': w(ks[1], (C,), C * 9),
        'w2': w(ks[2], (C, C, 3, 3), C * 9),  'b2': w(ks[3], (C,), C * 9),
        'w5': w(ks[4], (C, C, 3, 3), C * 9),  'b5': w(ks[5], (C,), C * 9),
        'w6': w(ks[6], (C, C, 3, 3), C * 9),  'b6': w(ks[7], (C,), C * 9),
        'wa1': w(ks[8], (CR, C, 1, 1), C),    'ba1': w(ks[9], (CR,), C),
        'wa2': w(ks[10], (C, CR, 1, 1), CR),  'ba2': w(ks[11], (C,), CR),
    }


if __name__ == "__main__":
    key = jax.random.PRNGKey(0)
    kx, kp = jax.random.split(key)

    N, H, W = 2, 16, 16
    x = jax.random.normal(kx, (N, C, H, W), jnp.float32)   # NCHW, channels fixed to 32
    params = _init_params(kp)

    out = jax.block_until_ready(light_eam_forward(x, params))
    ref = jax.block_until_ready(light_eam_reference(x, params))

    # convs run in bf16 on the MXU (f32 accumulation) -> compare with a bf16-level tolerance
    if not np.allclose(np.asarray(out), np.asarray(ref), rtol=2e-2, atol=2e-2):
        raise AssertionError(
            f"mismatch vs reference, max abs err = {np.max(np.abs(np.asarray(out) - np.asarray(ref)))}")

    print("KERNEL_OK")
</pallas_src>

<mosaic_0001>
module attributes {stable_mosaic.version = 11 : i64} {
  func.func @kernel(%arg0: i32, %arg1: memref<1x32x256xf32, #tpu.memory_space<vmem>>, %arg2: memref<1x256xi32, #tpu.memory_space<vmem>>, %arg3: memref<32x288xbf16, #tpu.memory_space<vmem>>, %arg4: memref<32x1xf32, #tpu.memory_space<vmem>>, %arg5: memref<32x288xbf16, #tpu.memory_space<vmem>>, %arg6: memref<32x1xf32, #tpu.memory_space<vmem>>, %arg7: memref<32x288xbf16, #tpu.memory_space<vmem>>, %arg8: memref<32x1xf32, #tpu.memory_space<vmem>>, %arg9: memref<32x288xbf16, #tpu.memory_space<vmem>>, %arg10: memref<32x1xf32, #tpu.memory_space<vmem>>, %arg11: memref<32x8xf32, #tpu.memory_space<vmem>>, %arg12: memref<1x8xf32, #tpu.memory_space<vmem>>, %arg13: memref<32x8xf32, #tpu.memory_space<vmem>>, %arg14: memref<32x1xf32, #tpu.memory_space<vmem>>, %arg15: memref<1x32x256xf32, #tpu.memory_space<vmem>>, %arg16: memref<32x512xbf16, #tpu.memory_space<vmem>>, %arg17: memref<288x256xbf16, #tpu.memory_space<vmem>>) attributes {dimension_semantics = [#tpu.dimension_semantics<parallel>], iteration_bounds = array<i64: 2>, scalar_prefetch = 0 : i64, scratch_operands = 2 : i64, tpu.core_type = #tpu.core_type<tc>, window_params = [{transform_indices = @transform_0, window_bounds = array<i64: 1, 32, 256>}, {pipeline_mode = #tpu.pipeline_mode<synchronous>, transform_indices = @transform_1, window_bounds = array<i64: 1, 256>}, {pipeline_mode = #tpu.pipeline_mode<synchronous>, transform_indices = @transform_2, window_bounds = array<i64: 32, 288>}, {pipeline_mode = #tpu.pipeline_mode<synchronous>, transform_indices = @transform_3, window_bounds = array<i64: 32, 1>}, {pipeline_mode = #tpu.pipeline_mode<synchronous>, transform_indices = @transform_4, window_bounds = array<i64: 32, 288>}, {pipeline_mode = #tpu.pipeline_mode<synchronous>, transform_indices = @transform_5, window_bounds = array<i64: 32, 1>}, {pipeline_mode = #tpu.pipeline_mode<synchronous>, transform_indices = @transform_6, window_bounds = array<i64: 32, 288>}, {pipeline_mode = #tpu.pipeline_mode<synchronous>, transform_indices = @transform_7, window_bounds = array<i64: 32, 1>}, {pipeline_mode = #tpu.pipeline_mode<synchronous>, transform_indices = @transform_8, window_bounds = array<i64: 32, 288>}, {pipeline_mode = #tpu.pipeline_mode<synchronous>, transform_indices = @transform_9, window_bounds = array<i64: 32, 1>}, {pipeline_mode = #tpu.pipeline_mode<synchronous>, transform_indices = @transform_10, window_bounds = array<i64: 32, 8>}, {pipeline_mode = #tpu.pipeline_mode<synchronous>, transform_indices = @transform_11, window_bounds = array<i64: 1, 8>}, {pipeline_mode = #tpu.pipeline_mode<synchronous>, transform_indices = @transform_12, window_bounds = array<i64: 32, 8>}, {pipeline_mode = #tpu.pipeline_mode<synchronous>, transform_indices = @transform_13, window_bounds = array<i64: 32, 1>}, {transform_indices = @transform_14, window_bounds = array<i64: 1, 32, 256>}]} {
    %c0 = arith.constant 0 : index
    %c0_0 = arith.constant 0 : index
    %c0_1 = arith.constant 0 : index
    %0 = vector.load %arg1[%c0, %c0_0, %c0_1] : memref<1x32x256xf32, #tpu.memory_space<vmem>>, vector<1x32x256xf32>
    %1 = vector.shape_cast %0 : vector<1x32x256xf32> to vector<32x256xf32>
    %c0_2 = arith.constant 0 : index
    %c0_3 = arith.constant 0 : index
    %2 = vector.load %arg2[%c0_2, %c0_3] : memref<1x256xi32, #tpu.memory_space<vmem>>, vector<1x256xi32>
    %cst = arith.constant 0.000000e+00 : bf16
    %3 = vector.broadcast %cst : bf16 to vector<32x512xbf16>
    %c0_4 = arith.constant 0 : index
    %c0_5 = arith.constant 0 : index
    %4 = vector.load %arg16[%c0_4, %c0_5] : memref<32x512xbf16, #tpu.memory_space<vmem>>, vector<32x512xbf16>
    tpu.vector_store %arg16[%c0_4, %c0_5], %3 {strides = array<i32>} : memref<32x512xbf16, #tpu.memory_space<vmem>>, vector<32x512xbf16>,
    %5 = arith.truncf %1 : vector<32x256xf32> to vector<32x256xbf16>
    %c0_6 = arith.constant 0 : index
    %c128 = arith.constant 128 : index
    %6 = vector.load %arg16[%c0_6, %c128] : memref<32x512xbf16, #tpu.memory_space<vmem>>, vector<32x256xbf16>
    tpu.vector_store %arg16[%c0_6, %c128], %5 {strides = array<i32>} : memref<32x512xbf16, #tpu.memory_space<vmem>>, vector<32x256xbf16>,
    %c1_i32 = arith.constant 1 : i32
    %7 = vector.broadcast %c1_i32 : i32 to vector<1x256xi32>
    %8 = arith.cmpi sge, %2, %7 : vector<1x256xi32>
    %c15_i32 = arith.constant 15 : i32
    %9 = vector.broadcast %c15_i32 : i32 to vector<1x256xi32>
    %10 = arith.cmpi slt, %2, %9 : vector<1x256xi32>
    %c0_7 = arith.constant 0 : index
    %c111 = arith.constant 111 : index
    %11 = vector.load %arg16[%c0_7, %c111] : memref<32x512xbf16, #tpu.memory_space<vmem>>, vector<32x256xbf16>
    %cst_8 = arith.constant 0.000000e+00 : f32
    %12 = arith.truncf %cst_8 : f32 to bf16
    %13 = vector.shape_cast %8 : vector<1x256xi1> to vector<1x256xi1>
    %14 = vector.broadcast %13 : vector<1x256xi1> to vector<32x256xi1>
    %15 = vector.broadcast %12 : bf16 to vector<32x256xbf16>
    %16 = arith.select %14, %11, %15 : vector<32x256xi1>, vector<32x256xbf16>
    %c0_9 = arith.constant 0 : index
    %c0_10 = arith.constant 0 : index
    %17 = vector.load %arg17[%c0_9, %c0_10] : memref<288x256xbf16, #tpu.memory_space<vmem>>, vector<32x256xbf16>
    tpu.vector_store %arg17[%c0_9, %c0_10], %16 {strides = array<i32>} : memref<288x256xbf16, #tpu.memory_space<vmem>>, vector<32x256xbf16>,
    %c0_11 = arith.constant 0 : index
    %c112 = arith.constant 112 : index
    %18 = vector.load %arg16[%c0_11, %c112] : memref<32x512xbf16, #tpu.memory_space<vmem>>, vector<32x256xbf16>
    %c32 = arith.constant 32 : index
    %c0_12 = arith.constant 0 : index
    %19 = vector.load %arg17[%c32, %c0_12] : memref<288x256xbf16, #tpu.memory_space<vmem>>, vector<32x256xbf16>
    tpu.vector_store %arg17[%c32, %c0_12], %18 {strides = array<i32>} : memref<288x256xbf16, #tpu.memory_space<vmem>>, vector<32x256xbf16>,
    %c0_13 = arith.constant 0 : index
    %c113 = arith.constant 113 : index
    %20 = vector.load %arg16[%c0_13, %c113] : memref<32x512xbf16, #tpu.memory_space<vmem>>, vector<32x256xbf16>
    %cst_14 = arith.constant 0.000000e+00 : f32
    %21 = arith.truncf %cst_14 : f32 to bf16
    %22 = vector.shape_cast %10 : vector<1x256xi1> to vector<1x256xi1>
    %23 = vector.broadcast %22 : vector<1x256xi1> to vector<32x256xi1>
    %24 = vector.broadcast %21 : bf16 to vector<32x256xbf16>
    %25 = arith.select %23, %20, %24 : vector<32x256xi1>, vector<32x256xbf16>
    %c64 = arith.constant 64 : index
    %c0_15 = arith.constant 0 : index
    %26 = vector.load %arg17[%c64, %c0_15] : memref<288x256xbf16, #tpu.memory_space<vmem>>, vector<32x256xbf16>
    tpu.vector_store %arg17[%c64, %c0_15], %25 {strides = array<i32>} : memref<288x256xbf16, #tpu.memory_space<vmem>>, vector<32x256xbf16>,
    %c0_16 = arith.constant 0 : index
    %c127 = arith.constant 127 : index
    %27 = vector.load %arg16[%c0_16, %c127] : memref<32x512xbf16, #tpu.memory_space<vmem>>, vector<32x256xbf16>
    %cst_17 = arith.constant 0.000000e+00 : f32
    %28 = arith.truncf %cst_17 : f32 to bf16
    %29 = vector.shape_cast %8 : vector<1x256xi1> to vector<1x256xi1>
    %30 = vector.broadcast %29 : vector<1x256xi1> to vector<32x256xi1>
    %31 = vector.broadcast %28 : bf16 to vector<32x256xbf16>
    %32 = arith.select %30, %27, %31 : vector<32x256xi1>, vector<32x256xbf16>
    %c96 = arith.constant 96 : index
    %c0_18 = arith.constant 0 : index
    %33 = vector.load %arg17[%c96, %c0_18] : memref<288x256xbf16, #tpu.memory_space<vmem>>, vector<32x256xbf16>
    tpu.vector_store %arg17[%c96, %c0_18], %32 {strides = array<i32>} : memref<288x256xbf16, #tpu.memory_space<vmem>>, vector<32x256xbf16>,
    %c0_19 = arith.constant 0 : index
    %c128_20 = arith.constant 128 : index
    %34 = vector.load %arg16[%c0_19, %c128_20] : memref<32x512xbf16, #tpu.memory_space<vmem>>, vector<32x256xbf16>
    %c128_21 = arith.constant 128 : index
    %c0_22 = arith.constant 0 : index
    %35 = vector.load %arg17[%c128_21, %c0_22] : memref<288x256xbf16, #tpu.memory_space<vmem>>, vector<32x256xbf16>
    tpu.vector_store %arg17[%c128_21, %c0_22], %34 {strides = array<i32>} : memref<288x256xbf16, #tpu.memory_space<vmem>>, vector<32x256xbf16>,
    %c0_23 = arith.constant 0 : index
    %c129 = arith.constant 129 : index
    %36 = vector.load %arg16[%c0_23, %c129] : memref<32x512xbf16, #tpu.memory_space<vmem>>, vector<32x256xbf16>
    %cst_24 = arith.constant 0.000000e+00 : f32
    %37 = arith.truncf %cst_24 : f32 to bf16
    %38 = vector.shape_cast %10 : vector<1x256xi1> to vector<1x256xi1>
    %39 = vector.broadcast %38 : vector<1x256xi1> to vector<32x256xi1>
    %40 = vector.broadcast %37 : bf16 to vector<32x256xbf16>
    %41 = arith.select %39, %36, %40 : vector<32x256xi1>, vector<32x256xbf16>
    %c160 = arith.constant 160 : index
    %c0_25 = arith.constant 0 : index
    %42 = vector.load %arg17[%c160, %c0_25] : memref<288x256xbf16, #tpu.memory_space<vmem>>, vector<32x256xbf16>
    tpu.vector_store %arg17[%c160, %c0_25], %41 {strides = array<i32>} : memref<288x256xbf16, #tpu.memory_space<vmem>>, vector<32x256xbf16>,
    %c0_26 = arith.constant 0 : index
    %c143 = arith.constant 143 : index
    %43 = vector.load %arg16[%c0_26, %c143] : memref<32x512xbf16, #tpu.memory_space<vmem>>, vector<32x256xbf16>
    %cst_27 = arith.constant 0.000000e+00 : f32
    %44 = arith.truncf %cst_27 : f32 to bf16
    %45 = vector.shape_cast %8 : vector<1x256xi1> to vector<1x256xi1>
    %46 = vector.broadcast %45 : vector<1x256xi1> to vector<32x256xi1>
    %47 = vector.broadcast %44 : bf16 to vector<32x256xbf16>
    %48 = arith.select %46, %43, %47 : vector<32x256xi1>, vector<32x256xbf16>
    %c192 = arith.constant 192 : index
    %c0_28 = arith.constant 0 : index
    %49 = vector.load %arg17[%c192, %c0_28] : memref<288x256xbf16, #tpu.memory_space<vmem>>, vector<32x256xbf16>
    tpu.vector_store %arg17[%c192, %c0_28], %48 {strides = array<i32>} : memref<288x256xbf16, #tpu.memory_space<vmem>>, vector<32x256xbf16>,
    %c0_29 = arith.constant 0 : index
    %c144 = arith.constant 144 : index
    %50 = vector.load %arg16[%c0_29, %c144] : memref<32x512xbf16, #tpu.memory_space<vmem>>, vector<32x256xbf16>
    %c224 = arith.constant 224 : index
    %c0_30 = arith.constant 0 : index
    %51 = vector.load %arg17[%c224, %c0_30] : memref<288x256xbf16, #tpu.memory_space<vmem>>, vector<32x256xbf16>
    tpu.vector_store %arg17[%c224, %c0_30], %50 {strides = array<i32>} : memref<288x256xbf16, #tpu.memory_space<vmem>>, vector<32x256xbf16>,
    %c0_31 = arith.constant 0 : index
    %c145 = arith.constant 145 : index
    %52 = vector.load %arg16[%c0_31, %c145] : memref<32x512xbf16, #tpu.memory_space<vmem>>, vector<32x256xbf16>
    %cst_32 = arith.constant 0.000000e+00 : f32
    %53 = arith.truncf %cst_32 : f32 to bf16
    %54 = vector.shape_cast %10 : vector<1x256xi1> to vector<1x256xi1>
    %55 = vector.broadcast %54 : vector<1x256xi1> to vector<32x256xi1>
    %56 = vector.broadcast %53 : bf16 to vector<32x256xbf16>
    %57 = arith.select %55, %52, %56 : vector<32x256xi1>, vector<32x256xbf16>
    %c256 = arith.constant 256 : index
    %c0_33 = arith.constant 0 : index
    %58 = vector.load %arg17[%c256, %c0_33] : memref<288x256xbf16, #tpu.memory_space<vmem>>, vector<32x256xbf16>
    tpu.vector_store %arg17[%c256, %c0_33], %57 {strides = array<i32>} : memref<288x256xbf16, #tpu.memory_space<vmem>>, vector<32x256xbf16>,
    %c0_34 = arith.constant 0 : index
    %c0_35 = arith.constant 0 : index
    %59 = vector.load %arg3[%c0_34, %c0_35] : memref<32x288xbf16, #tpu.memory_space<vmem>>, vector<32x288xbf16>
    %c0_36 = arith.constant 0 : index
    %c0_37 = arith.constant 0 : index
    %60 = vector.load %arg17[%c0_36, %c0_37] : memref<288x256xbf16, #tpu.memory_space<vmem>>, vector<288x256xbf16>
    %cst_38 = arith.constant dense<0.000000e+00> : vector<32x256xf32>
    %61 = tpu.matmul %59, %60, %cst_38 {dimension_numbers = #tpu.dot_dimension_numbers<[1], [0], [0], [1], [0, 0, 1, 1], [], []>} : vector<32x288xbf16>, vector<288x256xbf16>, vector<32x256xf32> -> vector<32x256xf32>
    %c0_39 = arith.constant 0 : index
    %c0_40 = arith.constant 0 : index
    %62 = vector.load %arg4[%c0_39, %c0_40] : memref<32x1xf32, #tpu.memory_space<vmem>>, vector<32x1xf32>
    %63 = vector.broadcast %62 : vector<32x1xf32> to vector<32x256xf32>
    %64 = arith.addf %61, %63 : vector<32x256xf32>
    %cst_41 = arith.constant 0.000000e+00 : f32
    %65 = vector.broadcast %cst_41 : f32 to vector<32x256xf32>
    %66 = arith.maximumf %64, %65 : vector<32x256xf32>
    %67 = arith.truncf %66 : vector<32x256xf32> to vector<32x256xbf16>
    %c0_42 = arith.constant 0 : index
    %c128_43 = arith.constant 128 : index
    %68 = vector.load %arg16[%c0_42, %c128_43] : memref<32x512xbf16, #tpu.memory_space<vmem>>, vector<32x256xbf16>
    tpu.vector_store %arg16[%c0_42, %c128_43], %67 {strides = array<i32>} : memref<32x512xbf16, #tpu.memory_space<vmem>>, vector<32x256xbf16>,
    %c2_i32 = arith.constant 2 : i32
    %69 = vector.broadcast %c2_i32 : i32 to vector<1x256xi32>
    %70 = arith.cmpi sge, %2, %69 : vector<1x256xi32>
    %c14_i32 = arith.constant 14 : i32
    %71 = vector.broadcast %c14_i32 : i32 to vector<1x256xi32>
    %72 = arith.cmpi slt, %2, %71 : vector<1x256xi32>
    %c0_44 = arith.constant 0 : index
    %c94 = arith.constant 94 : index
    %73 = vector.load %arg16[%c0_44, %c94] : memref<32x512xbf16, #tpu.memory_space<vmem>>, vector<32x256xbf16>
    %cst_45 = arith.constant 0.000000e+00 : f32
    %74 = arith.truncf %cst_45 : f32 to bf16
    %75 = vector.shape_cast %70 : vector<1x256xi1> to vector<1x256xi1>
    %76 = vector.broadcast %75 : vector<1x256xi1> to vector<32x256xi1>
    %77 = vector.broadcast %74 : bf16 to vector<32x256xbf16>
    %78 = arith.select %76, %73, %77 : vector<32x256xi1>, vector<32x256xbf16>
    %c0_46 = arith.constant 0 : index
    %c0_47 = arith.constant 0 : index
    %79 = vector.load %arg17[%c0_46, %c0_47] : memref<288x256xbf16, #tpu.memory_space<vmem>>, vector<32x256xbf16>
    tpu.vector_store %arg17[%c0_46, %c0_47], %78 {strides = array<i32>} : memref<288x256xbf16, #tpu.memory_space<vmem>>, vector<32x256xbf16>,
    %c0_48 = arith.constant 0 : index
    %c96_49 = arith.constant 96 : index
    %80 = vector.load %arg16[%c0_48, %c96_49] : memref<32x512xbf16, #tpu.memory_space<vmem>>, vector<32x256xbf16>
    %c32_50 = arith.constant 32 : index
    %c0_51 = arith.constant 0 : index
    %81 = vector.load %arg17[%c32_50, %c0_51] : memref<288x256xbf16, #tpu.memory_space<vmem>>, vector<32x256xbf16>
    tpu.vector_store %arg17[%c32_50, %c0_51], %80 {strides = array<i32>} : memref<288x256xbf16, #tpu.memory_space<vmem>>, vector<32x256xbf16>,
    %c0_52 = arith.constant 0 : index
    %c98 = arith.constant 98 : index
    %82 = vector.load %arg16[%c0_52, %c98] : memref<32x512xbf16, #tpu.memory_space<vmem>>, vector<32x256xbf16>
    %cst_53 = arith.constant 0.000000e+00 : f32
    %83 = arith.truncf %cst_53 : f32 to bf16
    %84 = vector.shape_cast %72 : vector<1x256xi1> to vector<1x256xi1>
    %85 = vector.broadcast %84 : vector<1x256xi1> to vector<32x256xi1>
    %86 = vector.broadcast %83 : bf16 to vector<32x256xbf16>
    %87 = arith.select %85, %82, %86 : vector<32x256xi1>, vector<32x256xbf16>
    %c64_54 = arith.constant 64 : index
    %c0_55 = arith.constant 0 : index
    %88 = vector.load %arg17[%c64_54, %c0_55] : memref<288x256xbf16, #tpu.memory_space<vmem>>, vector<32x256xbf16>
    tpu.vector_store %arg17[%c64_54, %c0_55], %87 {strides = array<i32>} : memref<288x256xbf16, #tpu.memory_space<vmem>>, vector<32x256xbf16>,
    %c0_56 = arith.constant 0 : index
    %c126 = arith.constant 126 : index
    %89 = vector.load %arg16[%c0_56, %c126] : memref<32x512xbf16, #tpu.memory_space<vmem>>, vector<32x256xbf16>
    %cst_57 = arith.constant 0.000000e+00 : f32
    %90 = arith.truncf %cst_57 : f32 to bf16
    %91 = vector.shape_cast %70 : vector<1x256xi1> to vector<1x256xi1>
    %92 = vector.broadcast %91 : vector<1x256xi1> to vector<32x256xi1>
    %93 = vector.broadcast %90 : bf16 to vector<32x256xbf16>
    %94 = arith.select %92, %89, %93 : vector<32x256xi1>, vector<32x256xbf16>
    %c96_58 = arith.constant 96 : index
    %c0_59 = arith.constant 0 : index
    %95 = vector.load %arg17[%c96_58, %c0_59] : memref<288x256xbf16, #tpu.memory_space<vmem>>, vector<32x256xbf16>
    tpu.vector_store %arg17[%c96_58, %c0_59], %94 {strides = array<i32>} : memref<288x256xbf16, #tpu.memory_space<vmem>>, vector<32x256xbf16>,
    %c0_60 = arith.constant 0 : index
    %c128_61 = arith.constant 128 : index
    %96 = vector.load %arg16[%c0_60, %c128_61] : memref<32x512xbf16, #tpu.memory_space<vmem>>, vector<32x256xbf16>
    %c128_62 = arith.constant 128 : index
    %c0_63 = arith.constant 0 : index
    %97 = vector.load %arg17[%c128_62, %c0_63] : memref<288x256xbf16, #tpu.memory_space<vmem>>, vector<32x256xbf16>
    tpu.vector_store %arg17[%c128_62, %c0_63], %96 {strides = array<i32>} : memref<288x256xbf16, #tpu.memory_space<vmem>>, vector<32x256xbf16>,
    %c0_64 = arith.constant 0 : index
    %c130 = arith.constant 130 : index
    %98 = vector.load %arg16[%c0_64, %c130] : memref<32x512xbf16, #tpu.memory_space<vmem>>, vector<32x256xbf16>
    %cst_65 = arith.constant 0.000000e+00 : f32
    %99 = arith.truncf %cst_65 : f32 to bf16
    %100 = vector.shape_cast %72 : vector<1x256xi1> to vector<1x256xi1>
    %101 = vector.broadcast %100 : vector<1x256xi1> to vector<32x256xi1>
    %102 = vector.broadcast %99 : bf16 to vector<32x256xbf16>
    %103 = arith.select %101, %98, %102 : vector<32x256xi1>, vector<32x256xbf16>
    %c160_66 = arith.constant 160 : index
    %c0_67 = arith.constant 0 : index
    %104 = vector.load %arg17[%c160_66, %c0_67] : memref<288x256xbf16, #tpu.memory_space<vmem>>, vector<32x256xbf16>
    tpu.vector_store %arg17[%c160_66, %c0_67], %103 {strides = array<i32>} : memref<288x256xbf16, #tpu.memory_space<vmem>>, vector<32x256xbf16>,
    %c0_68 = arith.constant 0 : index
    %c158 = arith.constant 158 : index
    %105 = vector.load %arg16[%c0_68, %c158] : memref<32x512xbf16, #tpu.memory_space<vmem>>, vector<32x256xbf16>
    %cst_69 = arith.constant 0.000000e+00 : f32
    %106 = arith.truncf %cst_69 : f32 to bf16
    %107 = vector.shape_cast %70 : vector<1x256xi1> to vector<1x256xi1>
    %108 = vector.broadcast %107 : vector<1x256xi1> to vector<32x256xi1>
    %109 = vector.broadcast %106 : bf16 to vector<32x256xbf16>
    %110 = arith.select %108, %105, %109 : vector<32x256xi1>, vector<32x256xbf16>
    %c192_70 = arith.constant 192 : index
    %c0_71 = arith.constant 0 : index
    %111 = vector.load %arg17[%c192_70, %c0_71] : memref<288x256xbf16, #tpu.memory_space<vmem>>, vector<32x256xbf16>
    tpu.vector_store %arg17[%c192_70, %c0_71], %110 {strides = array<i32>} : memref<288x256xbf16, #tpu.memory_space<vmem>>, vector<32x256xbf16>,
    %c0_72 = arith.constant 0 : index
    %c160_73 = arith.constant 160 : index
    %112 = vector.load %arg16[%c0_72, %c160_73] : memref<32x512xbf16, #tpu.memory_space<vmem>>, vector<32x256xbf16>
    %c224_74 = arith.constant 224 : index
    %c0_75 = arith.constant 0 : index
    %113 = vector.load %arg17[%c224_74, %c0_75] : memref<288x256xbf16, #tpu.memory_space<vmem>>, vector<32x256xbf16>
    tpu.vector_store %arg17[%c224_74, %c0_75], %112 {strides = array<i32>} : memref<288x256xbf16, #tpu.memory_space<vmem>>, vector<32x256xbf16>,
    %c0_76 = arith.constant 0 : index
    %c162 = arith.constant 162 : index
    %114 = vector.load %arg16[%c0_76, %c162] : memref<32x512xbf16, #tpu.memory_space<vmem>>, vector<32x256xbf16>
    %cst_77 = arith.constant 0.000000e+00 : f32
    %115 = arith.truncf %cst_77 : f32 to bf16
    %116 = vector.shape_cast %72 : vector<1x256xi1> to vector<1x256xi1>
    %117 = vector.broadcast %116 : vector<1x256xi1> to vector<32x256xi1>
    %118 = vector.broadcast %115 : bf16 to vector<32x256xbf16>
    %119 = arith.select %117, %114, %118 : vector<32x256xi1>, vector<32x256xbf16>
    %c256_78 = arith.constant 256 : index
    %c0_79 = arith.constant 0 : index
    %120 = vector.load %arg17[%c256_78, %c0_79] : memref<288x256xbf16, #tpu.memory_space<vmem>>, vector<32x256xbf16>
    tpu.vector_store %arg17[%c256_78, %c0_79], %119 {strides = array<i32>} : memref<288x256xbf16, #tpu.memory_space<vmem>>, vector<32x256xbf16>,
    %c0_80 = arith.constant 0 : index
    %c0_81 = arith.constant 0 : index
    %121 = vector.load %arg5[%c0_80, %c0_81] : memref<32x288xbf16, #tpu.memory_space<vmem>>, vector<32x288xbf16>
    %c0_82 = arith.constant 0 : index
    %c0_83 = arith.constant 0 : index
    %122 = vector.load %arg17[%c0_82, %c0_83] : memref<288x256xbf16, #tpu.memory_space<vmem>>, vector<288x256xbf16>
    %cst_84 = arith.constant dense<0.000000e+00> : vector<32x256xf32>
    %123 = tpu.matmul %121, %122, %cst_84 {dimension_numbers = #tpu.dot_dimension_numbers<[1], [0], [0], [1], [0, 0, 1, 1], [], []>} : vector<32x288xbf16>, vector<288x256xbf16>, vector<32x256xf32> -> vector<32x256xf32>
    %c0_85 = arith.constant 0 : index
    %c0_86 = arith.constant 0 : index
    %124 = vector.load %arg6[%c0_85, %c0_86] : memref<32x1xf32, #tpu.memory_space<vmem>>, vector<32x1xf32>
    %125 = vector.broadcast %124 : vector<32x1xf32> to vector<32x256xf32>
    %126 = arith.addf %123, %125 : vector<32x256xf32>
    %cst_87 = arith.constant 0.000000e+00 : f32
    %127 = vector.broadcast %cst_87 : f32 to vector<32x256xf32>
    %128 = arith.maximumf %126, %127 : vector<32x256xf32>
    %129 = arith.truncf %128 : vector<32x256xf32> to vector<32x256xbf16>
    %c0_88 = arith.constant 0 : index
    %c128_89 = arith.constant 128 : index
    %130 = vector.load %arg16[%c0_88, %c128_89] : memref<32x512xbf16, #tpu.memory_space<vmem>>, vector<32x256xbf16>
    tpu.vector_store %arg16[%c0_88, %c128_89], %129 {strides = array<i32>} : memref<32x512xbf16, #tpu.memory_space<vmem>>, vector<32x256xbf16>,
    %c1_i32_90 = arith.constant 1 : i32
    %131 = vector.broadcast %c1_i32_90 : i32 to vector<1x256xi32>
    %132 = arith.cmpi sge, %2, %131 : vector<1x256xi32>
    %c15_i32_91 = arith.constant 15 : i32
    %133 = vector.broadcast %c15_i32_91 : i32 to vector<1x256xi32>
    %134 = arith.cmpi slt, %2, %133 : vector<1x256xi32>
    %c0_92 = arith.constant 0 : index
    %c111_93 = arith.constant 111 : index
    %135 = vector.load %arg16[%c0_92, %c111_93] : memref<32x512xbf16, #tpu.memory_space<vmem>>, vector<32x256xbf16>
    %cst_94 = arith.constant 0.000000e+00 : f32
    %136 = arith.truncf %cst_94 : f32 to bf16
    %137 = vector.shape_cast %132 : vector<1x256xi1> to vector<1x256xi1>
    %138 = vector.broadcast %137 : vector<1x256xi1> to vector<32x256xi1>
    %139 = vector.broadcast %136 : bf16 to vector<32x256xbf16>
    %140 = arith.select %138, %135, %139 : vector<32x256xi1>, vector<32x256xbf16>
    %c0_95 = arith.constant 0 : index
    %c0_96 = arith.constant 0 : index
    %141 = vector.load %arg17[%c0_95, %c0_96] : memref<288x256xbf16, #tpu.memory_space<vmem>>, vector<32x256xbf16>
    tpu.vector_store %arg17[%c0_95, %c0_96], %140 {strides = array<i32>} : memref<288x256xbf16, #tpu.memory_space<vmem>>, vector<32x256xbf16>,
    %c0_97 = arith.constant 0 : index
    %c112_98 = arith.constant 112 : index
    %142 = vector.load %arg16[%c0_97, %c112_98] : memref<32x512xbf16, #tpu.memory_space<vmem>>, vector<32x256xbf16>
    %c32_99 = arith.constant 32 : index
    %c0_100 = arith.constant 0 : index
    %143 = vector.load %arg17[%c32_99, %c0_100] : memref<288x256xbf16, #tpu.memory_space<vmem>>, vector<32x256xbf16>
    tpu.vector_store %arg17[%c32_99, %c0_100], %142 {strides = array<i32>} : memref<288x256xbf16, #tpu.memory_space<vmem>>, vector<32x256xbf16>,
    %c0_101 = arith.constant 0 : index
    %c113_102 = arith.constant 113 : index
    %144 = vector.load %arg16[%c0_101, %c113_102] : memref<32x512xbf16, #tpu.memory_space<vmem>>, vector<32x256xbf16>
    %cst_103 = arith.constant 0.000000e+00 : f32
    %145 = arith.truncf %cst_103 : f32 to bf16
    %146 = vector.shape_cast %134 : vector<1x256xi1> to vector<1x256xi1>
    %147 = vector.broadcast %146 : vector<1x256xi1> to vector<32x256xi1>
    %148 = vector.broadcast %145 : bf16 to vector<32x256xbf16>
    %149 = arith.select %147, %144, %148 : vector<32x256xi1>, vector<32x256xbf16>
    %c64_104 = arith.constant 64 : index
    %c0_105 = arith.constant 0 : index
    %150 = vector.load %arg17[%c64_104, %c0_105] : memref<288x256xbf16, #tpu.memory_space<vmem>>, vector<32x256xbf16>
    tpu.vector_store %arg17[%c64_104, %c0_105], %149 {strides = array<i32>} : memref<288x256xbf16, #tpu.memory_space<vmem>>, vector<32x256xbf16>,
    %c0_106 = arith.constant 0 : index
    %c127_107 = arith.constant 127 : index
    %151 = vector.load %arg16[%c0_106, %c127_107] : memref<32x512xbf16, #tpu.memory_space<vmem>>, vector<32x256xbf16>
    %cst_108 = arith.constant 0.000000e+00 : f32
    %152 = arith.truncf %cst_108 : f32 to bf16
    %153 = vector.shape_cast %132 : vector<1x256xi1> to vector<1x256xi1>
    %154 = vector.broadcast %153 : vector<1x256xi1> to vector<32x256xi1>
    %155 = vector.broadcast %152 : bf16 to vector<32x256xbf16>
    %156 = arith.select %154, %151, %155 : vector<32x256xi1>, vector<32x256xbf16>
    %c96_109 = arith.constant 96 : index
    %c0_110 = arith.constant 0 : index
    %157 = vector.load %arg17[%c96_109, %c0_110] : memref<288x256xbf16, #tpu.memory_space<vmem>>, vector<32x256xbf16>
    tpu.vector_store %arg17[%c96_109, %c0_110], %156 {strides = array<i32>} : memref<288x256xbf16, #tpu.memory_space<vmem>>, vector<32x256xbf16>,
    %c0_111 = arith.constant 0 : index
    %c128_112 = arith.constant 128 : index
    %158 = vector.load %arg16[%c0_111, %c128_112] : memref<32x512xbf16, #tpu.memory_space<vmem>>, vector<32x256xbf16>
    %c128_113 = arith.constant 128 : index
    %c0_114 = arith.constant 0 : index
    %159 = vector.load %arg17[%c128_113, %c0_114] : memref<288x256xbf16, #tpu.memory_space<vmem>>, vector<32x256xbf16>
    tpu.vector_store %arg17[%c128_113, %c0_114], %158 {strides = array<i32>} : memref<288x256xbf16, #tpu.memory_space<vmem>>, vector<32x256xbf16>,
    %c0_115 = arith.constant 0 : index
    %c129_116 = arith.constant 129 : index
    %160 = vector.load %arg16[%c0_115, %c129_116] : memref<32x512xbf16, #tpu.memory_space<vmem>>, vector<32x256xbf16>
    %cst_117 = arith.constant 0.000000e+00 : f32
    %161 = arith.truncf %cst_117 : f32 to bf16
    %162 = vector.shape_cast %134 : vector<1x256xi1> to vector<1x256xi1>
    %163 = vector.broadcast %162 : vector<1x256xi1> to vector<32x256xi1>
    %164 = vector.broadcast %161 : bf16 to vector<32x256xbf16>
    %165 = arith.select %163, %160, %164 : vector<32x256xi1>, vector<32x256xbf16>
    %c160_118 = arith.constant 160 : index
    %c0_119 = arith.constant 0 : index
    %166 = vector.load %arg17[%c160_118, %c0_119] : memref<288x256xbf16, #tpu.memory_space<vmem>>, vector<32x256xbf16>
    tpu.vector_store %arg17[%c160_118, %c0_119], %165 {strides = array<i32>} : memref<288x256xbf16, #tpu.memory_space<vmem>>, vector<32x256xbf16>,
    %c0_120 = arith.constant 0 : index
    %c143_121 = arith.constant 143 : index
    %167 = vector.load %arg16[%c0_120, %c143_121] : memref<32x512xbf16, #tpu.memory_space<vmem>>, vector<32x256xbf16>
    %cst_122 = arith.constant 0.000000e+00 : f32
    %168 = arith.truncf %cst_122 : f32 to bf16
    %169 = vector.shape_cast %132 : vector<1x256xi1> to vector<1x256xi1>
    %170 = vector.broadcast %169 : vector<1x256xi1> to vector<32x256xi1>
    %171 = vector.broadcast %168 : bf16 to vector<32x256xbf16>
    %172 = arith.select %170, %167, %171 : vector<32x256xi1>, vector<32x256xbf16>
    %c192_123 = arith.constant 192 : index
    %c0_124 = arith.constant 0 : index
    %173 = vector.load %arg17[%c192_123, %c0_124] : memref<288x256xbf16, #tpu.memory_space<vmem>>, vector<32x256xbf16>
    tpu.vector_store %arg17[%c192_123, %c0_124], %172 {strides = array<i32>} : memref<288x256xbf16, #tpu.memory_space<vmem>>, vector<32x256xbf16>,
    %c0_125 = arith.constant 0 : index
    %c144_126 = arith.constant 144 : index
    %174 = vector.load %arg16[%c0_125, %c144_126] : memref<32x512xbf16, #tpu.memory_space<vmem>>, vector<32x256xbf16>
    %c224_127 = arith.constant 224 : index
    %c0_128 = arith.constant 0 : index
    %175 = vector.load %arg17[%c224_127, %c0_128] : memref<288x256xbf16, #tpu.memory_space<vmem>>, vector<32x256xbf16>
    tpu.vector_store %arg17[%c224_127, %c0_128], %174 {strides = array<i32>} : memref<288x256xbf16, #tpu.memory_space<vmem>>, vector<32x256xbf16>,
    %c0_129 = arith.constant 0 : index
    %c145_130 = arith.constant 145 : index
    %176 = vector.load %arg16[%c0_129, %c145_130] : memref<32x512xbf16, #tpu.memory_space<vmem>>, vector<32x256xbf16>
    %cst_131 = arith.constant 0.000000e+00 : f32
    %177 = arith.truncf %cst_131 : f32 to bf16
    %178 = vector.shape_cast %134 : vector<1x256xi1> to vector<1x256xi1>
    %179 = vector.broadcast %178 : vector<1x256xi1> to vector<32x256xi1>
    %180 = vector.broadcast %177 : bf16 to vector<32x256xbf16>
    %181 = arith.select %179, %176, %180 : vector<32x256xi1>, vector<32x256xbf16>
    %c256_132 = arith.constant 256 : index
    %c0_133 = arith.constant 0 : index
    %182 = vector.load %arg17[%c256_132, %c0_133] : memref<288x256xbf16, #tpu.memory_space<vmem>>, vector<32x256xbf16>
    tpu.vector_store %arg17[%c256_132, %c0_133], %181 {strides = array<i32>} : memref<288x256xbf16, #tpu.memory_space<vmem>>, vector<32x256xbf16>,
    %c0_134 = arith.constant 0 : index
    %c0_135 = arith.constant 0 : index
    %183 = vector.load %arg7[%c0_134, %c0_135] : memref<32x288xbf16, #tpu.memory_space<vmem>>, vector<32x288xbf16>
    %c0_136 = arith.constant 0 : index
    %c0_137 = arith.constant 0 : index
    %184 = vector.load %arg17[%c0_136, %c0_137] : memref<288x256xbf16, #tpu.memory_space<vmem>>, vector<288x256xbf16>
    %cst_138 = arith.constant dense<0.000000e+00> : vector<32x256xf32>
    %185 = tpu.matmul %183, %184, %cst_138 {dimension_numbers = #tpu.dot_dimension_numbers<[1], [0], [0], [1], [0, 0, 1, 1], [], []>} : vector<32x288xbf16>, vector<288x256xbf16>, vector<32x256xf32> -> vector<32x256xf32>
    %c0_139 = arith.constant 0 : index
    %c0_140 = arith.constant 0 : index
    %186 = vector.load %arg8[%c0_139, %c0_140] : memref<32x1xf32, #tpu.memory_space<vmem>>, vector<32x1xf32>
    %187 = vector.broadcast %186 : vector<32x1xf32> to vector<32x256xf32>
    %188 = arith.addf %185, %187 : vector<32x256xf32>
    %cst_141 = arith.constant 0.000000e+00 : f32
    %189 = vector.broadcast %cst_141 : f32 to vector<32x256xf32>
    %190 = arith.maximumf %188, %189 : vector<32x256xf32>
    %191 = arith.addf %1, %190 : vector<32x256xf32>
    %192 = arith.truncf %191 : vector<32x256xf32> to vector<32x256xbf16>
    %c0_142 = arith.constant 0 : index
    %c128_143 = arith.constant 128 : index
    %193 = vector.load %arg16[%c0_142, %c128_143] : memref<32x512xbf16, #tpu.memory_space<vmem>>, vector<32x256xbf16>
    tpu.vector_store %arg16[%c0_142, %c128_143], %192 {strides = array<i32>} : memref<32x512xbf16, #tpu.memory_space<vmem>>, vector<32x256xbf16>,
    %c1_i32_144 = arith.constant 1 : i32
    %194 = vector.broadcast %c1_i32_144 : i32 to vector<1x256xi32>
    %195 = arith.cmpi sge, %2, %194 : vector<1x256xi32>
    %c15_i32_145 = arith.constant 15 : i32
    %196 = vector.broadcast %c15_i32_145 : i32 to vector<1x256xi32>
    %197 = arith.cmpi slt, %2, %196 : vector<1x256xi32>
    %c0_146 = arith.constant 0 : index
    %c111_147 = arith.constant 111 : index
    %198 = vector.load %arg16[%c0_146, %c111_147] : memref<32x512xbf16, #tpu.memory_space<vmem>>, vector<32x256xbf16>
    %cst_148 = arith.constant 0.000000e+00 : f32
    %199 = arith.truncf %cst_148 : f32 to bf16
    %200 = vector.shape_cast %195 : vector<1x256xi1> to vector<1x256xi1>
    %201 = vector.broadcast %200 : vector<1x256xi1> to vector<32x256xi1>
    %202 = vector.broadcast %199 : bf16 to vector<32x256xbf16>
    %203 = arith.select %201, %198, %202 : vector<32x256xi1>, vector<32x256xbf16>
    %c0_149 = arith.constant 0 : index
    %c0_150 = arith.constant 0 : index
    %204 = vector.load %arg17[%c0_149, %c0_150] : memref<288x256xbf16, #tpu.memory_space<vmem>>, vector<32x256xbf16>
    tpu.vector_store %arg17[%c0_149, %c0_150], %203 {strides = array<i32>} : memref<288x256xbf16, #tpu.memory_space<vmem>>, vector<32x256xbf16>,
    %c0_151 = arith.constant 0 : index
    %c112_152 = arith.constant 112 : index
    %205 = vector.load %arg16[%c0_151, %c112_152] : memref<32x512xbf16, #tpu.memory_space<vmem>>, vector<32x256xbf16>
    %c32_153 = arith.constant 32 : index
    %c0_154 = arith.constant 0 : index
    %206 = vector.load %arg17[%c32_153, %c0_154] : memref<288x256xbf16, #tpu.memory_space<vmem>>, vector<32x256xbf16>
    tpu.vector_store %arg17[%c32_153, %c0_154], %205 {strides = array<i32>} : memref<288x256xbf16, #tpu.memory_space<vmem>>, vector<32x256xbf16>,
    %c0_155 = arith.constant 0 : index
    %c113_156 = arith.constant 113 : index
    %207 = vector.load %arg16[%c0_155, %c113_156] : memref<32x512xbf16, #tpu.memory_space<vmem>>, vector<32x256xbf16>
    %cst_157 = arith.constant 0.000000e+00 : f32
    %208 = arith.truncf %cst_157 : f32 to bf16
    %209 = vector.shape_cast %197 : vector<1x256xi1> to vector<1x256xi1>
    %210 = vector.broadcast %209 : vector<1x256xi1> to vector<32x256xi1>
    %211 = vector.broadcast %208 : bf16 to vector<32x256xbf16>
    %212 = arith.select %210, %207, %211 : vector<32x256xi1>, vector<32x256xbf16>
    %c64_158 = arith.constant 64 : index
    %c0_159 = arith.constant 0 : index
    %213 = vector.load %arg17[%c64_158, %c0_159] : memref<288x256xbf16, #tpu.memory_space<vmem>>, vector<32x256xbf16>
    tpu.vector_store %arg17[%c64_158, %c0_159], %212 {strides = array<i32>} : memref<288x256xbf16, #tpu.memory_space<vmem>>, vector<32x256xbf16>,
    %c0_160 = arith.constant 0 : index
    %c127_161 = arith.constant 127 : index
    %214 = vector.load %arg16[%c0_160, %c127_161] : memref<32x512xbf16, #tpu.memory_space<vmem>>, vector<32x256xbf16>
    %cst_162 = arith.constant 0.000000e+00 : f32
    %215 = arith.truncf %cst_162 : f32 to bf16
    %216 = vector.shape_cast %195 : vector<1x256xi1> to vector<1x256xi1>
    %217 = vector.broadcast %216 : vector<1x256xi1> to vector<32x256xi1>
    %218 = vector.broadcast %215 : bf16 to vector<32x256xbf16>
    %219 = arith.select %217, %214, %218 : vector<32x256xi1>, vector<32x256xbf16>
    %c96_163 = arith.constant 96 : index
    %c0_164 = arith.constant 0 : index
    %220 = vector.load %arg17[%c96_163, %c0_164] : memref<288x256xbf16, #tpu.memory_space<vmem>>, vector<32x256xbf16>
    tpu.vector_store %arg17[%c96_163, %c0_164], %219 {strides = array<i32>} : memref<288x256xbf16, #tpu.memory_space<vmem>>, vector<32x256xbf16>,
    %c0_165 = arith.constant 0 : index
    %c128_166 = arith.constant 128 : index
    %221 = vector.load %arg16[%c0_165, %c128_166] : memref<32x512xbf16, #tpu.memory_space<vmem>>, vector<32x256xbf16>
    %c128_167 = arith.constant 128 : index
    %c0_168 = arith.constant 0 : index
    %222 = vector.load %arg17[%c128_167, %c0_168] : memref<288x256xbf16, #tpu.memory_space<vmem>>, vector<32x256xbf16>
    tpu.vector_store %arg17[%c128_167, %c0_168], %221 {strides = array<i32>} : memref<288x256xbf16, #tpu.memory_space<vmem>>, vector<32x256xbf16>,
    %c0_169 = arith.constant 0 : index
    %c129_170 = arith.constant 129 : index
    %223 = vector.load %arg16[%c0_169, %c129_170] : memref<32x512xbf16, #tpu.memory_space<vmem>>, vector<32x256xbf16>
    %cst_171 = arith.constant 0.000000e+00 : f32
    %224 = arith.truncf %cst_171 : f32 to bf16
    %225 = vector.shape_cast %197 : vector<1x256xi1> to vector<1x256xi1>
    %226 = vector.broadcast %225 : vector<1x256xi1> to vector<32x256xi1>
    %227 = vector.broadcast %224 : bf16 to vector<32x256xbf16>
    %228 = arith.select %226, %223, %227 : vector<32x256xi1>, vector<32x256xbf16>
    %c160_172 = arith.constant 160 : index
    %c0_173 = arith.constant 0 : index
    %229 = vector.load %arg17[%c160_172, %c0_173] : memref<288x256xbf16, #tpu.memory_space<vmem>>, vector<32x256xbf16>
    tpu.vector_store %arg17[%c160_172, %c0_173], %228 {strides = array<i32>} : memref<288x256xbf16, #tpu.memory_space<vmem>>, vector<32x256xbf16>,
    %c0_174 = arith.constant 0 : index
    %c143_175 = arith.constant 143 : index
    %230 = vector.load %arg16[%c0_174, %c143_175] : memref<32x512xbf16, #tpu.memory_space<vmem>>, vector<32x256xbf16>
    %cst_176 = arith.constant 0.000000e+00 : f32
    %231 = arith.truncf %cst_176 : f32 to bf16
    %232 = vector.shape_cast %195 : vector<1x256xi1> to vector<1x256xi1>
    %233 = vector.broadcast %232 : vector<1x256xi1> to vector<32x256xi1>
    %234 = vector.broadcast %231 : bf16 to vector<32x256xbf16>
    %235 = arith.select %233, %230, %234 : vector<32x256xi1>, vector<32x256xbf16>
    %c192_177 = arith.constant 192 : index
    %c0_178 = arith.constant 0 : index
    %236 = vector.load %arg17[%c192_177, %c0_178] : memref<288x256xbf16, #tpu.memory_space<vmem>>, vector<32x256xbf16>
    tpu.vector_store %arg17[%c192_177, %c0_178], %235 {strides = array<i32>} : memref<288x256xbf16, #tpu.memory_space<vmem>>, vector<32x256xbf16>,
    %c0_179 = arith.constant 0 : index
    %c144_180 = arith.constant 144 : index
    %237 = vector.load %arg16[%c0_179, %c144_180] : memref<32x512xbf16, #tpu.memory_space<vmem>>, vector<32x256xbf16>
    %c224_181 = arith.constant 224 : index
    %c0_182 = arith.constant 0 : index
    %238 = vector.load %arg17[%c224_181, %c0_182] : memref<288x256xbf16, #tpu.memory_space<vmem>>, vector<32x256xbf16>
    tpu.vector_store %arg17[%c224_181, %c0_182], %237 {strides = array<i32>} : memref<288x256xbf16, #tpu.memory_space<vmem>>, vector<32x256xbf16>,
    %c0_183 = arith.constant 0 : index
    %c145_184 = arith.constant 145 : index
    %239 = vector.load %arg16[%c0_183, %c145_184] : memref<32x512xbf16, #tpu.memory_space<vmem>>, vector<32x256xbf16>
    %cst_185 = arith.constant 0.000000e+00 : f32
    %240 = arith.truncf %cst_185 : f32 to bf16
    %241 = vector.shape_cast %197 : vector<1x256xi1> to vector<1x256xi1>
    %242 = vector.broadcast %241 : vector<1x256xi1> to vector<32x256xi1>
    %243 = vector.broadcast %240 : bf16 to vector<32x256xbf16>
    %244 = arith.select %242, %239, %243 : vector<32x256xi1>, vector<32x256xbf16>
    %c256_186 = arith.constant 256 : index
    %c0_187 = arith.constant 0 : index
    %245 = vector.load %arg17[%c256_186, %c0_187] : memref<288x256xbf16, #tpu.memory_space<vmem>>, vector<32x256xbf16>
    tpu.vector_store %arg17[%c256_186, %c0_187], %244 {strides = array<i32>} : memref<288x256xbf16, #tpu.memory_space<vmem>>, vector<32x256xbf16>,
    %c0_188 = arith.constant 0 : index
    %c0_189 = arith.constant 0 : index
    %246 = vector.load %arg9[%c0_188, %c0_189] : memref<32x288xbf16, #tpu.memory_space<vmem>>, vector<32x288xbf16>
    %c0_190 = arith.constant 0 : index
    %c0_191 = arith.constant 0 : index
    %247 = vector.load %arg17[%c0_190, %c0_191] : memref<288x256xbf16, #tpu.memory_space<vmem>>, vector<288x256xbf16>
    %cst_192 = arith.constant dense<0.000000e+00> : vector<32x256xf32>
    %248 = tpu.matmul %246, %247, %cst_192 {dimension_numbers = #tpu.dot_dimension_numbers<[1], [0], [0], [1], [0, 0, 1, 1], [], []>} : vector<32x288xbf16>, vector<288x256xbf16>, vector<32x256xf32> -> vector<32x256xf32>
    %c0_193 = arith.constant 0 : index
    %c0_194 = arith.constant 0 : index
    %249 = vector.load %arg10[%c0_193, %c0_194] : memref<32x1xf32, #tpu.memory_space<vmem>>, vector<32x1xf32>
    %250 = vector.broadcast %249 : vector<32x1xf32> to vector<32x256xf32>
    %251 = arith.addf %248, %250 : vector<32x256xf32>
    %cst_195 = arith.constant 0.000000e+00 : f32
    %252 = vector.broadcast %cst_195 : f32 to vector<32x256xf32>
    %253 = arith.maximumf %251, %252 : vector<32x256xf32>
    %254 = arith.addf %191, %253 : vector<32x256xf32>
    %cst_196 = arith.constant 0.000000e+00 : f32
    %255 = vector.broadcast %cst_196 : f32 to vector<32x256xf32>
    %256 = arith.maximumf %254, %255 : vector<32x256xf32>
    %cst_197 = arith.constant dense<0.000000e+00> : vector<32xf32>
    %257 = vector.multi_reduction <add>, %256, %cst_197 [1] : vector<32x256xf32> to vector<32xf32>
    %258 = vector.shape_cast %257 : vector<32xf32> to vector<32x1xf32>
    %cst_198 = arith.constant 3.906250e-03 : f32
    %259 = vector.broadcast %cst_198 : f32 to vector<32x1xf32>
    %260 = arith.mulf %258, %259 : vector<32x1xf32>
    %c0_199 = arith.constant 0 : index
    %c0_200 = arith.constant 0 : index
    %261 = vector.load %arg11[%c0_199, %c0_200] : memref<32x8xf32, #tpu.memory_space<vmem>>, vector<32x8xf32>
    %262 = vector.broadcast %260 : vector<32x1xf32> to vector<32x8xf32>
    %263 = arith.mulf %261, %262 : vector<32x8xf32>
    %cst_201 = arith.constant dense<0.000000e+00> : vector<8xf32>
    %264 = vector.multi_reduction <add>, %263, %cst_201 [0] : vector<32x8xf32> to vector<8xf32>
    %265 = vector.shape_cast %264 : vector<8xf32> to vector<1x8xf32>
    %c0_202 = arith.constant 0 : index
    %c0_203 = arith.constant 0 : index
    %266 = vector.load %arg12[%c0_202, %c0_203] : memref<1x8xf32, #tpu.memory_space<vmem>>, vector<1x8xf32>
    %267 = arith.addf %265, %266 : vector<1x8xf32>
    %cst_204 = arith.constant 0.000000e+00 : f32
    %268 = vector.broadcast %cst_204 : f32 to vector<1x8xf32>
    %269 = arith.maximumf %267, %268 : vector<1x8xf32>
    %c0_205 = arith.constant 0 : index
    %c0_206 = arith.constant 0 : index
    %270 = vector.load %arg13[%c0_205, %c0_206] : memref<32x8xf32, #tpu.memory_space<vmem>>, vector<32x8xf32>
    %271 = vector.broadcast %269 : vector<1x8xf32> to vector<32x8xf32>
    %272 = arith.mulf %270, %271 : vector<32x8xf32>
    %cst_207 = arith.constant dense<0.000000e+00> : vector<32xf32>
    %273 = vector.multi_reduction <add>, %272, %cst_207 [1] : vector<32x8xf32> to vector<32xf32>
    %274 = vector.shape_cast %273 : vector<32xf32> to vector<32x1xf32>
    %c0_208 = arith.constant 0 : index
    %c0_209 = arith.constant 0 : index
    %275 = vector.load %arg14[%c0_208, %c0_209] : memref<32x1xf32, #tpu.memory_space<vmem>>, vector<32x1xf32>
    %276 = arith.addf %274, %275 : vector<32x1xf32>
    %cst_210 = arith.constant 0.000000e+00 : f32
    %277 = vector.broadcast %cst_210 : f32 to vector<32x1xf32>
    %278 = arith.subf %277, %276 : vector<32x1xf32>
    %279 = math.exp %278 : vector<32x1xf32>
    %cst_211 = arith.constant 1.000000e+00 : f32
    %280 = vector.broadcast %cst_211 : f32 to vector<32x1xf32>
    %281 = arith.addf %280, %279 : vector<32x1xf32>
    %cst_212 = arith.constant 1.000000e+00 : f32
    %282 = vector.broadcast %cst_212 : f32 to vector<32x1xf32>
    %283 = arith.divf %282, %281 : vector<32x1xf32>
    %284 = vector.broadcast %283 : vector<32x1xf32> to vector<32x256xf32>
    %285 = arith.mulf %284, %256 : vector<32x256xf32>
    %286 = arith.addf %1, %285 : vector<32x256xf32>
    %c0_213 = arith.constant 0 : index
    %c0_214 = arith.constant 0 : index
    %c0_215 = arith.constant 0 : index
    %287 = vector.load %arg15[%c0_213, %c0_214, %c0_215] : memref<1x32x256xf32, #tpu.memory_space<vmem>>, vector<1x32x256xf32>
    %288 = vector.shape_cast %287 : vector<1x32x256xf32> to vector<32x256xf32>
    %289 = vector.shape_cast %286 : vector<32x256xf32> to vector<1x32x256xf32>
    tpu.vector_store %arg15[%c0_213, %c0_214, %c0_215], %289 {strides = array<i32>} : memref<1x32x256xf32, #tpu.memory_space<vmem>>, vector<1x32x256xf32>,
    return
  }
  func.func @transform_0(%arg0: i32) -> (i32, i32, i32) {
    %c0_i32 = arith.constant 0 : i32
    %c0_i32_0 = arith.constant 0 : i32
    %c0_i32_1 = arith.constant 0 : i32
    return %arg0, %c0_i32, %c0_i32_0 : i32, i32, i32
  }
  func.func @transform_1(%arg0: i32) -> (i32, i32) {
    %c0_i32 = arith.constant 0 : i32
    %c0_i32_0 = arith.constant 0 : i32
    %c0_i32_1 = arith.constant 0 : i32
    return %c0_i32, %c0_i32_0 : i32, i32
  }
  func.func @transform_2(%arg0: i32) -> (i32, i32) {
    %c0_i32 = arith.constant 0 : i32
    %c0_i32_0 = arith.constant 0 : i32
    %c0_i32_1 = arith.constant 0 : i32
    return %c0_i32, %c0_i32_0 : i32, i32
  }
  func.func @transform_3(%arg0: i32) -> (i32, i32) {
    %c0_i32 = arith.constant 0 : i32
    %c0_i32_0 = arith.constant 0 : i32
    %c0_i32_1 = arith.constant 0 : i32
    return %c0_i32, %c0_i32_0 : i32, i32
  }
  func.func @transform_4(%arg0: i32) -> (i32, i32) {
    %c0_i32 = arith.constant 0 : i32
    %c0_i32_0 = arith.constant 0 : i32
    %c0_i32_1 = arith.constant 0 : i32
    return %c0_i32, %c0_i32_0 : i32, i32
  }
  func.func @transform_5(%arg0: i32) -> (i32, i32) {
    %c0_i32 = arith.constant 0 : i32
    %c0_i32_0 = arith.constant 0 : i32
    %c0_i32_1 = arith.constant 0 : i32
    return %c0_i32, %c0_i32_0 : i32, i32
  }
  func.func @transform_6(%arg0: i32) -> (i32, i32) {
    %c0_i32 = arith.constant 0 : i32
    %c0_i32_0 = arith.constant 0 : i32
    %c0_i32_1 = arith.constant 0 : i32
    return %c0_i32, %c0_i32_0 : i32, i32
  }
  func.func @transform_7(%arg0: i32) -> (i32, i32) {
    %c0_i32 = arith.constant 0 : i32
    %c0_i32_0 = arith.constant 0 : i32
    %c0_i32_1 = arith.constant 0 : i32
    return %c0_i32, %c0_i32_0 : i32, i32
  }
  func.func @transform_8(%arg0: i32) -> (i32, i32) {
    %c0_i32 = arith.constant 0 : i32
    %c0_i32_0 = arith.constant 0 : i32
    %c0_i32_1 = arith.constant 0 : i32
    return %c0_i32, %c0_i32_0 : i32, i32
  }
  func.func @transform_9(%arg0: i32) -> (i32, i32) {
    %c0_i32 = arith.constant 0 : i32
    %c0_i32_0 = arith.constant 0 : i32
    %c0_i32_1 = arith.constant 0 : i32
    return %c0_i32, %c0_i32_0 : i32, i32
  }
  func.func @transform_10(%arg0: i32) -> (i32, i32) {
    %c0_i32 = arith.constant 0 : i32
    %c0_i32_0 = arith.constant 0 : i32
    %c0_i32_1 = arith.constant 0 : i32
    return %c0_i32, %c0_i32_0 : i32, i32
  }
  func.func @transform_11(%arg0: i32) -> (i32, i32) {
    %c0_i32 = arith.constant 0 : i32
    %c0_i32_0 = arith.constant 0 : i32
    %c0_i32_1 = arith.constant 0 : i32
    return %c0_i32, %c0_i32_0 : i32, i32
  }
  func.func @transform_12(%arg0: i32) -> (i32, i32) {
    %c0_i32 = arith.constant 0 : i32
    %c0_i32_0 = arith.constant 0 : i32
    %c0_i32_1 = arith.constant 0 : i32
    return %c0_i32, %c0_i32_0 : i32, i32
  }
  func.func @transform_13(%arg0: i32) -> (i32, i32) {
    %c0_i32 = arith.constant 0 : i32
    %c0_i32_0 = arith.constant 0 : i32
    %c0_i32_1 = arith.constant 0 : i32
    return %c0_i32, %c0_i32_0 : i32, i32
  }
  func.func @transform_14(%arg0: i32) -> (i32, i32, i32) {
    %c0_i32 = arith.constant 0 : i32
    %c0_i32_0 = arith.constant 0 : i32
    %c0_i32_1 = arith.constant 0 : i32
    return %arg0, %c0_i32, %c0_i32_0 : i32, i32, i32
  }
}

</mosaic_0001>

<bundles_post_ra>
// kernel: tpu_custom_call.1
= control target key start
LH: loop header
LB: loop body
LE: loop exit
PB: predicated region body
PF: predicated region fallthrough
CT: control target
= control target key end

     0   :  { %s8092_s0 = inlined_call_operand.hbm [shape: f32[2,32,256], index: 0, kind: input, shape index: {}]   ;;  %s8093_s1 = inlined_call_operand.vmem [shape: s32[1,256], index: 1, kind: input, shape index: {}]   ;;  %s8094_s2 = inlined_call_operand.vmem [shape: bf16[32,288], index: 2, kind: input, shape index: {}]   ;;  %s8095_s3 = inlined_call_operand.vmem [shape: f32[32,1], index: 3, kind: input, shape index: {}]   ;;  %s8096_s4 = inlined_call_operand.vmem [shape: bf16[32,288], index: 4, kind: input, shape index: {}]   ;;  %s8097_s5 = inlined_call_operand.vmem [shape: f32[32,1], index: 5, kind: input, shape index: {}]   ;;  %s8098_s6 = inlined_call_operand.vmem [shape: bf16[32,288], index: 6, kind: input, shape index: {}]   ;;  %s8099_s7 = inlined_call_operand.vmem [shape: f32[32,1], index: 7, kind: input, shape index: {}]   ;;  %s8100_s8 = inlined_call_operand.vmem [shape: bf16[32,288], index: 8, kind: input, shape index: {}]   ;;  %s8101_s9 = inlined_call_operand.vmem [shape: f32[32,1], index: 9, kind: input, shape index: {}]   ;;  %s8102_s10 = inlined_call_operand.vmem [shape: f32[32,8], index: 10, kind: input, shape index: {}]   ;;  %s8103_s11 = inlined_call_operand.vmem [shape: f32[1,8], index: 11, kind: input, shape index: {}]   ;;  %s8104_s12 = inlined_call_operand.vmem [shape: f32[32,8], index: 12, kind: input, shape index: {}]   ;;  %s8105_s13 = inlined_call_operand.vmem [shape: f32[32,1], index: 13, kind: input, shape index: {}]   ;;  %s8106_s14 = inlined_call_operand.hbm [shape: f32[2,32,256], index: 14, kind: output, shape index: {}]  }
   0x1   :  { %8159 = sst [smem:[#allocation17_spill]] %s8092_s0 }
   0x2   :  { %8160 = sst [smem:[#allocation18_spill]] %s8093_s1 }
   0x3   :  { %8161 = sst [smem:[#allocation19_spill]] %s8106_s14 }
   0x4   :  { %19 = vsyncpa [#allocation5], 0 }
   0x5   :  { %21 = vsyncpa [#allocation5 + $0x1], 0 }
   0x6   :  { %22 = vsyncpa [#allocation6], 0 }
   0x7   :  { %24 = vsyncpa [#allocation6 + $0x1], 0  ;;  %s5924_s29 = smov 0   ;;  %s5926_s30 = smov 0  }
   0x8   :  { %s5928_s15 = smov 0   ;;  %s5930_s16 = smov 0  }
   0x9 LB: > { %8162 = sst [smem:[#allocation10_spill]] %s5815_s29  ;;  %s5945_s17 = sadd.s32 4294967295, %s5827_s16   ;;  %s5827_s16 = sphi %s5930_s16, %s8478_s16   ;;  %s5823_s15 = sphi %s5928_s15, %s8480_s15   ;;  %s5819_s30 = sphi %s5926_s30, %s8482_s30   ;;  %s5815_s29 = sphi %s5924_s29, %s8481_s29  }
   0xa   : > { %8163 = sst [smem:[#allocation11_spill]] %s5823_s15  ;;  %s4749_s18 = sadd.s32 4294967294, %s5827_s16  }
   0xb   : > { %8164 = sst [smem:[#allocation12_spill]] %s5945_s17  ;;  %s5949_s19 = sadd.s32 1, %s5827_s16  }
   0xc   : > { %8165 = sst [smem:[#allocation13_spill]] %s5949_s19  ;;  %s37_s20 = sadd.s32 1, %s5823_s15 }
   0xd   : > { %s34_s21 = ssub.s32 %s5827_s16, %s5949_s19  ;;  %p44_p0 = scmp.ne.s32.totalorder %s5823_s15, %s5819_s30 }
   0xe   : > { %p35_p1 = scmp.eq.s32.totalorder %s34_s21, 0  ;;  %p45_p2 = scmp.eq.s32.totalorder %s5827_s16, 0 }
   0xf   : > { %p50_p3 = scmp.ne.s32.totalorder %s5819_s30, %s5815_s29  ;;  %p51_p4 = scmp.eq.s32.totalorder %s5945_s17, 0 }
  0x10   : > { %s5961_s22 = scalar_select %p35_p1, %s5823_s15, %s37_s20  }
  0x11   : > { %p5963_p5 = por %p45_p2, %p44_p0  ;;  %p5967_p6 = por %p51_p4, %p50_p3 }
  0x12   : > { %8166 = sst [smem:[#allocation14_spill]] %s5961_s22  ;;  %p347_p7 = scmp.eq.s32.totalorder %s5945_s17, 1 }
  0x13   : > { %p353_p8 = scmp.eq.s32.totalorder %s4749_s18, 1  ;;  %p5641_p10 = scmp.lt.s32.totalorder %s5827_s16, 2 }
  0x14   : > { %p5974_p11 = por %p347_p7, %p44_p0  ;;  %s412_s27 = sand.u32 1, %s5823_s15  }
  0x15   : > { %p5978_p12 = por %p353_p8, %p50_p3  ;;  %s5451_s28 = sshll.u32 %s5827_s16, 6 }
  0x16   : > { %s8169_s25 = scalar_select %p5974_p11, 1, 0 }
  0x17   : > { %s8171_s26 = scalar_select %p5978_p12, 1, 0 }
  0x18   : > { %8170 = sst [smem:[#allocation15_spill]] %s8169_s25  ;;  %s4752_s20 = sshll.u32 %s412_s27, 6 }
  0x19   : > { %8172 = sst [smem:[#allocation16_spill]] %s8171_s26  ;;  %s416_s18 = scalar_lea.vmem [#allocation4], %s4752_s20 }
  0x1a   : > { %s8173_s0 = sld [smem:[#allocation17_spill]]  ;;  %s424_s14 = sshll.u32 %s416_s18, 4  ;;  %s425_s14 = int_to_ptr.vmem [resolvable:$true] %s424_s14 }
  0x1b   : > { %p5989_p13 = pnand %p5641_p10, %p5963_p5  ;;  %p4755_p0 = scmp.ge.s32.totalorder %s5827_s16, 1 }
  0x1c   : > { %p432_p1 = scmp.lt.s32.totalorder %s5827_s16, 3  ;;  %s413_s15 = scalar_lea.sflag [#allocation5], %s412_s27 }
  0x1d   : > { %p5735_p3 = pneg %p5989_p13 }
  0x20   : > { %s421_s19 = scalar_lea.hbm %s8173_s0, %s5451_s28  ;;  %s5738_s23 = scalar_lea.hbm %s8173_s0, 128 }
  0x21   : > { %s422_s29 = sshll.u32 %s421_s19, 4  ;;  %s423_s29 = int_to_ptr.hbm [resolvable:$true] %s422_s29 }
  0x22   : > { %s5731_s26 = sshra.s32 %s423_s29, 4  ;;  %s5732_s26 = int_to_ptr.hbm [resolvable:$true] %s5731_s26 }
  0x23   : > { %s5733_s25 = scalar_lea.hbm %s5732_s26, 64  ;;  %p5739_p5 = scmp.lt.s32.totalorder %s5732_s26, %s8173_s0 }
  0x24   : > { %p5734_p2 = scmp.ne.s32.totalorder %s5732_s26, %s5733_s25  ;;  %p5740_p8 = scmp.lt.s32.totalorder %s5738_s23, %s5733_s25 }
  0x26   : > { %p5736_p4 = pnand %p5735_p3, %p5734_p2  ;;  %p5741_p10 = por %p5740_p8, %p5739_p5 }
  0x28   : > { %p5737_p7 = pneg %p5736_p4 }
  0x2a   : > { %p5742_p9 = pnand %p5741_p10, %p5737_p7 }
  0x2c   : > { %5745 = shalt.err (!%p5742_p9)
}
  0x2d   : > { %s5829_s27 = smov 256   ;;  %s5830_s21 = smov 16  }
  0x2e   : > { %5636 = dma.hbm_to_vmem [thread:$0]  (!%p5989_p13), %s423_s29, 1024, %s425_s14, %s413_s15, %s5829_s27, %s5829_s27, %s5830_s21  }
  0x2f   : > { %p433_p2 = pnand %p4755_p0, %p432_p1 }
  0x30   : > { %s6010_s18 = sand.u32 (!%p433_p2), 1, %s5819_s30  }
  0x31   : > { %436 = sbr.rel (%p433_p2) target bundleno = 2336 (0x920), region = 76  ;;  %s8129_s25 = sshll.u32 (!%p433_p2), %s6010_s18, 6 }
  0x32   : > { %s439_s26 = scalar_lea.sflag (!%p433_p2), [#allocation5], %s6010_s18  ;;  %s6016_s19 = scalar_lea.vmem (!%p433_p2), [#allocation4], %s8129_s25 }
  0x36   : > { %5806 = dma.done.wait (%p5967_p6), %s439_s26, 1024  }
  0x37   : > { %5808 = vsyncadd (%p5967_p6), %s439_s26, 4294966272  ;;  %v5831_v0 = vmov 0   ;;  %s8175_s1 = sld [smem:[#allocation18_spill]]  ;;  %v497_v2 = vld [vmem:[%s6016_s19 + $0x30] sm:$0xff]  ;;  %v498_v3 = vld [vmem:[%s6016_s19 + $0x38] sm:$0xff]  ;;  %s8141_s15 = smov 127  }
  0x38   : > { %500 = vst [vmem:[#allocation2] sm:$0xff] %v5831_v0  ;;  %5695 = vset.pattern.permute.xlu1 %v5831_v0  ;;  %5697 = vset.pattern.permute.xlu0 %v5831_v0  ;;  %v6042_v4 = vpack.c.bf16 %v498_v3, %v497_v2  ;;  %v495_v5 = vld [vmem:[%s6016_s19 + $0x20] sm:$0xff]  ;;  %v496_v6 = vld [vmem:[%s6016_s19 + $0x28] sm:$0xff]  ;;  %s8134_s17 = smov 15   ;;  %s8132_s24 = smov 17   ;;  %v493_v19 = vld [vmem:[%s6016_s19 + $0x10] sm:$0xff]  ;;  %v6105_v35 = vunpack.c.l.b16 %v5831_v0  ;;  %v6108_v36 = vunpack.c.h.b16 %v5831_v0 }
  0x39   : > { %501 = vst [vmem:[#allocation2 + $0x8] sm:$0xff] %v5831_v0  ;;  %5696 = vset.pattern.permute.xlu2 %v5831_v0  ;;  %v491_v7 = vld [vmem:[%s6016_s19] sm:$0xff]  ;;  %v6049_v10 = vpack.c.bf16 %v496_v6, %v495_v5  ;;  %v492_v11 = vld [vmem:[%s6016_s19 + $0x8] sm:$0xff]  ;;  %v494_v20 = vld [vmem:[%s6016_s19 + $0x18] sm:$0xff]  ;;  %s8155_s22 = smov 113   ;;  %s8137_s23 = smov 1  }
  0x3a   : > { %502 = vst [vmem:[#allocation2 + $0x10] sm:$0xff] %v5831_v0  ;;  %v6054_v16 = vpack.c.bf16 %v492_v11, %v491_v7  ;;  %v6064_v21 = vpack.c.bf16 %v494_v20, %v493_v19  ;;  %s8130_s28 = smov 111   ;;  %s8139_s20 = smov 16   ;;  %v8178_v59 = vmov 0  ;;  %v8180_v2 = vmov 0 }
  0x3b   : > { %503 = vst [vmem:[#allocation2 + $0x18] sm:$0xff] %v5831_v0  ;;  %s8157_s27 = smov 112   ;;  %s5840_s21 = smov 30  }
  0x3c   : > { %504 = vst [vmem:[#allocation2 + $0x20] sm:$0xff] %v5831_v0  ;;  %s5841_s26 = smov 94   ;;  %s5845_s14 = smov 98  }
  0x3d   : > { %505 = vst [vmem:[#allocation2 + $0x28] sm:$0xff] %v5831_v0  ;;  %v6034_v1 = vld [vmem:[%s8175_s1] sm:$0x3]  ;;  %s8347_s29 = smov 111   ;;  %s8404_s0 = smov 112  }
  0x3e   : > { %506 = vst [vmem:[#allocation2 + $0x30] sm:$0xff] %v5831_v0  ;;  %vm516_vm0 = vcmp.ge.s32.totalorder %v6034_v1, 1  ;;  %vm517_vm1 = vcmp.lt.s32.totalorder %v6034_v1, 15 }
  0x3f   : > { %507 = vst [vmem:[#allocation2 + $0x38] sm:$0xff] %v5831_v0  ;;  %v526_v8 = vsel %vm516_vm0, 1, %v5831_v0  ;;  %v675_v9 = vsel %vm517_vm1, 1, %v5831_v0  ;;  %vm8124_vm1 = vcmask 1043456  }
  0x40   : > { %v527_v12 = vperm.slane %v526_v8, 0  ;;  %v528_v13 = vperm.slane %v526_v8, 1  ;;  %v676_v14 = vperm.slane %v675_v9, 0  ;;  %v677_v15 = vperm.slane %v675_v9, 1  ;;  %515 = vst [vmem:[#allocation2 + $0x34] sm:$0xff] %v6042_v4 }
  0x41   : > { %514 = vst [vmem:[#allocation2 + $0x24] sm:$0xff] %v6049_v10  ;;  %v1015_v32 = vld [vmem:[#allocation2 + $0xc] sm:$0xf] }
  0x42   : > { %vm529_vm2 = vcmp.eq.s32.totalorder %v527_v12, 1  ;;  %vm530_vm3 = vcmp.eq.s32.totalorder %v528_v13, 1  ;;  %vm678_vm4 = vcmp.eq.s32.totalorder %v676_v14, 1  ;;  %vm679_vm5 = vcmp.eq.s32.totalorder %v677_v15, 1  ;;  %512 = vst [vmem:[#allocation2 + $0x4] sm:$0xff] %v6054_v16 }
  0x43   : > { %vm531_vm6 = vmpackc.low %vm530_vm3, %vm529_vm2  ;;  %513 = vst [vmem:[#allocation2 + $0x14] sm:$0xff] %v6064_v21  ;;  %v1017_v33 = vld [vmem:[#allocation2 + $0x1c] sm:$0xf]  ;;  %v1072_v15 = vld [vmem:[#allocation2 + $0xc] sm:$0xf]  ;;  %vm8116_vm2 = vcmask 130048  }
  0x44   : > { %v532_v17 = vsel %vm531_vm6, 65537, %v5831_v0  ;;  %vm680_vm7 = vmpackc.low %vm679_vm5, %vm678_vm4  ;;  %v1019_v30 = vld [vmem:[#allocation2 + $0x2c] sm:$0xf]  ;;  %vm8118_vm3 = vcmask 1039360  }
  0x45   : > { %766 = vrot.lane.b32.xlu0 %v532_v17, %s8141_s15  ;;  %v681_v18 = vsel %vm680_vm7, 65537, %v5831_v0  ;;  %940 = vrot.lane.b32.xlu2 %v532_v17, %s8134_s17  ;;  %vm8119_vm7 = vcmask 924672  }
  0x46   : > { %1079 = vrot.lane.b32.xlu1 %v681_v18, %s8132_s24  ;;  %v1021_v31 = vld [vmem:[#allocation2 + $0x3c] sm:$0xf] }
  0x47   : > { %v6070_v22 = vld [vmem:[#allocation2 + $0x30] sm:$0xff]  ;;  %v617_v27 = vld [vmem:[#allocation2 + $0x38] sm:$0xf]  ;;  %v1078_v3 = vld [vmem:[#allocation2 + $0x3c] sm:$0xf] }
  0x48   : > { %v615_v23 = vld [vmem:[#allocation2 + $0x28] sm:$0xf]  ;;  %v6072_v24 = vld [vmem:[#allocation2 + $0x20] sm:$0xff]  ;;  %v765_v43 = vld [vmem:[#allocation2 + $0x38] sm:$0xf] }
  0x49   : > { %v6079_v25 = vld [vmem:[#allocation2] sm:$0xff]  ;;  %v611_v29 = vld [vmem:[#allocation2 + $0x8] sm:$0xf]  ;;  %v674_v56 = vld [vmem:[#allocation2 + $0x38] sm:$0xf] }
  0x4a   : > { %v6081_v26 = vld [vmem:[#allocation2 + $0x10] sm:$0xff]  ;;  %v613_v28 = vld [vmem:[#allocation2 + $0x18] sm:$0xf]  ;;  %v759_v41 = vld [vmem:[#allocation2 + $0x8] sm:$0xf] }
  0x4b   : > { %v763_v42 = vld [vmem:[#allocation2 + $0x28] sm:$0xf]  ;;  %v761_v57 = vld [vmem:[#allocation2 + $0x18] sm:$0xf] }
  0x4c   : > { %v672_v58 = vld [vmem:[#allocation2 + $0x28] sm:$0xf]  ;;  %v670_v8 = vld [vmem:[#allocation2 + $0x18] sm:$0xf] }
  0x4d   : > { %682 = vrot.lane.b32.xlu0 %v681_v18, %s8155_s22  ;;  %858 = vrot.lane.b32.xlu2 %v681_v18, %s8137_s23  ;;  %v668_v6 = vld [vmem:[#allocation2 + $0x8] sm:$0xf] }
  0x4e   : > { %533 = vrot.lane.b32.xlu1 %v532_v17, %s8130_s28  ;;  %v1074_v17 = vld [vmem:[#allocation2 + $0x1c] sm:$0xf] }
  0x55   : > { %638 = vrot.lane.b32.xlu0 %v6070_v22, %s8139_s20  ;;  %636 = vrot.lane.b32.xlu2 %v615_v23, %s8139_s20 }
  0x56   : > { %634 = vrot.lane.b32.xlu1 %v6072_v24, %s8139_s20 }
  0x5d   : > { %626 = vrot.lane.b32.xlu0 %v6079_v25, %s8139_s20  ;;  %630 = vrot.lane.b32.xlu2 %v6081_v26, %s8139_s20 }
  0x5e   : > { %640 = vrot.lane.b32.xlu1 %v617_v27, %s8139_s20  ;;  %v1076_v27 = vld [vmem:[#allocation2 + $0x2c] sm:$0xf] }
  0x65   : > { %632 = vrot.lane.b32.xlu0 %v613_v28, %s8139_s20  ;;  %1042 = vrot.lane.b32.xlu2 %v6042_v4, %s8157_s27 }
  0x66   : > { %628 = vrot.lane.b32.xlu1 %v611_v29, %s8139_s20  ;;  %s5847_s20 = smov 32  }
  0x6d   : > { %1038 = vrot.lane.b32.xlu0 %v6049_v10, %s8157_s27  ;;  %1030 = vrot.lane.b32.xlu2 %v6054_v16, %s8157_s27 }
  0x6e   : > { %1040 = vrot.lane.b32.xlu1 %v1019_v30, %s8157_s27 }
  0x75   : > { %1044 = vrot.lane.b32.xlu0 %v1021_v31, %s8157_s27  ;;  %1036 = vrot.lane.b32.xlu2 %v1017_v33, %s8157_s27 }
  0x76   : > { %1034 = vrot.lane.b32.xlu1 %v6064_v21, %s8157_s27 }
  0x7d   : > { %1032 = vrot.lane.b32.xlu0 %v1015_v32, %s8157_s27 }
  0x9f   : > { %v6140_v51 = vpop.permute.xlu2 %940 }
  0xa7   : > { %v6163_v63 = vpop.permute.xlu2 %858 }
  0xaf   : > { %v637_v13 = vpop.permute.xlu2 %636 }
  0xb0   : > { %v647_v18 = vrot.slane %v637_v13, 4 }
  0xb7   : > { %v6102_v34 = vpop.permute.xlu0 %766 }
  0xb8   : > { %v6111_v37 = vrot.slane %v6102_v34, 4  ;;  %v6115_v40 = vpop.permute.xlu1 %1079 }
  0xb9   : > { %v6124_v45 = vrot.slane %v6115_v40, 4 }
  0xba   : > { %v778_v38 = vunpack.c.l.b16 %v6111_v37  ;;  %v779_v39 = vunpack.c.h.b16 %v6111_v37 }
  0xbb   : > { %v1090_v52 = vunpack.c.l.b16 %v6124_v45  ;;  %v1091_v55 = vunpack.c.h.b16 %v6124_v45 }
  0xbc   : > { %vm782_vm8 = vcmp.ne.s32.totalorder %v778_v38, %v6105_v35  ;;  %vm783_vm9 = vcmp.ne.s32.totalorder %v779_v39, %v6108_v36  ;;  %v770_v38 = vsel %vm8118_vm3, %v6111_v37, %v6102_v34 }
  0xbd   : > { %vm6119_vm10 = vmpackc.low %vm783_vm9, %vm782_vm8  ;;  %vm1094_vm14 = vcmp.ne.s32.totalorder %v1090_v52, %v6105_v35  ;;  %vm1095_vm15 = vcmp.ne.s32.totalorder %v1091_v55, %v6108_v36  ;;  %v631_v52 = vpop.permute.xlu2 %630  ;;  %v772_v55 = vunpack.c.h.b16 %v770_v38 }
  0xbe   : > { %v786_v46 = vsel %vm6119_vm10, %v759_v41, 0  ;;  %v790_v47 = vsel %vm6119_vm10, %v763_v42, 0  ;;  %v792_v48 = vsel %vm6119_vm10, %v765_v43, 0  ;;  %v788_v61 = vsel %vm6119_vm10, %v761_v57, 0  ;;  %vm6165_vm0 = vmpackc.low %vm1095_vm15, %vm1094_vm14  ;;  %v525_v43 = vld [vmem:[#allocation2 + $0x38] sm:$0xf] }
  0xbf   : > { %v6132_v49 = vpop.permute.xlu0 %682  ;;  %803 = vrot.lane.b32.xlu2 %v786_v46, %s8137_s23  ;;  %811 = vrot.lane.b32.xlu1 %v790_v47, %s8137_s23  ;;  %v8181_v2 = vsel %vm6165_vm0, 4294967295, %v8180_v2  ;;  %v1104_v7 = vsel %vm6165_vm0, %v1078_v3, 0  ;;  %v1098_v29 = vsel %vm6165_vm0, %v1072_v15, 0  ;;  %v1100_v30 = vsel %vm6165_vm0, %v1074_v17, 0  ;;  %v521_v46 = vld [vmem:[#allocation2 + $0x18] sm:$0xf] }
  0xc0   : > { %v6137_v50 = vrot.slane %v6132_v49, 4  ;;  %815 = vrot.lane.b32.xlu0 %v792_v48, %s8137_s23  ;;  %v6169_v5 = vpop.permute.xlu1 %533  ;;  %v1102_v32 = vsel %vm6165_vm0, %v1076_v27, 0  ;;  %v8182_v42 = vmov 0  ;;  %v523_v48 = vld [vmem:[#allocation2 + $0x28] sm:$0xf]  ;;  %vm776_vm9 = vcmp.ne.s32.totalorder %v772_v55, %v6108_v36 }
  0xc1   : > { %v6181_v12 = vrot.slane %v6169_v5, 4 }
  0xc2   : > { %v694_v53 = vunpack.c.l.b16 %v6137_v50  ;;  %v695_v54 = vunpack.c.h.b16 %v6137_v50  ;;  %v686_v3 = vsel %vm8119_vm7, %v6137_v50, %v6132_v49 }
  0xc3   : > { %v545_v20 = vunpack.c.l.b16 %v6181_v12  ;;  %v546_v23 = vunpack.c.h.b16 %v6181_v12  ;;  %v688_v15 = vunpack.c.h.b16 %v686_v3 }
  0xc4   : > { %vm698_vm11 = vcmp.ne.s32.totalorder %v694_v53, %v6105_v35  ;;  %vm699_vm12 = vcmp.ne.s32.totalorder %v695_v54, %v6108_v36  ;;  %v771_v54 = vunpack.c.l.b16 %v770_v38 }
  0xc5   : > { %vm6148_vm13 = vmpackc.low %vm699_vm12, %vm698_vm11  ;;  %vm549_vm4 = vcmp.ne.s32.totalorder %v545_v20, %v6105_v35  ;;  %vm550_vm5 = vcmp.ne.s32.totalorder %v546_v23, %v6108_v36  ;;  %v1043_v17 = vpop.permute.xlu2 %1042  ;;  %vm8120_vm12 = vcmask 138240   ;;  %vm692_vm15 = vcmp.ne.s32.totalorder %v688_v15, %v6108_v36 }
  0xc6   : > { %v8179_v59 = vsel %vm6148_vm13, 4294967295, %v8178_v59  ;;  %v708_v60 = vsel %vm6148_vm13, %v674_v56, 0  ;;  %v706_v62 = vsel %vm6148_vm13, %v672_v58, 0  ;;  %v702_v9 = vsel %vm6148_vm13, %v668_v6, 0  ;;  %vm6201_vm6 = vmpackc.low %vm550_vm5, %vm549_vm4 }
  0xc7   : > { %731 = vrot.lane.b32.xlu2 %v708_v60, %s8134_s17  ;;  %807 = vrot.lane.b32.xlu1 %v788_v61, %s8137_s23  ;;  %v704_v11 = vsel %vm6148_vm13, %v670_v8, 0  ;;  %v639_v14 = vpop.permute.xlu0 %638  ;;  %v8183_v42 = vsel %vm6201_vm6, 4294967295, %v8182_v42  ;;  %v559_v56 = vsel %vm6201_vm6, %v525_v43, 0  ;;  %v555_v34 = vsel %vm6201_vm6, %v521_v46, 0 }
  0xc8   : > { %727 = vrot.lane.b32.xlu0 %v706_v62, %s8134_s17  ;;  %v635_v19 = vpop.permute.xlu1 %634  ;;  %v648_v39 = vrot.slane %v639_v14, 4  ;;  %v557_v57 = vsel %vm6201_vm6, %v523_v48, 0  ;;  %v644_v60 = vrot.slane %v631_v52, 4  ;;  %vm775_vm8 = vcmp.ne.s32.totalorder %v771_v54, %v6105_v35 }
  0xc9   : > { %v646_v28 = vrot.slane %v635_v19, 4  ;;  %vm6221_vm11 = vmpackc.low %vm776_vm9, %vm775_vm8  ;;  %vm8117_vm9 = vcmask 916480   ;;  %v8188_v48 = vmov 0 }
  0xca   : > { %v785_v49 = vsel %vm6221_vm11, %v6079_v25, 0  ;;  %v789_v23 = vsel %vm6221_vm11, %v6072_v24, 0 }
  0xcb   : > { %v655_v31 = vsel %vm8124_vm1, %v646_v28, %v647_v18  ;;  %v1082_v28 = vsel %vm8120_vm12, %v6124_v45, %v6115_v40  ;;  %v787_v40 = vsel %vm6221_vm11, %v6081_v26, 0  ;;  %v1052_v45 = vrot.slane %v1043_v17, 4 }
  0xcc   : > { %v656_v33 = vsel %vm8116_vm2, %v635_v19, %v655_v31  ;;  %v1084_v31 = vunpack.c.h.b16 %v1082_v28  ;;  %vm8123_vm12 = vcmask 7168  }
  0xcd   : > { %665 = vst [vmem:[#allocation3 + $0x30] sm:$0xff] %v656_v33  ;;  %v791_v33 = vsel %vm6221_vm11, %v6070_v22, 0  ;;  %v1031_v38 = vpop.permute.xlu2 %1030 }
  0xce   : > { %vm1088_vm8 = vcmp.ne.s32.totalorder %v1084_v31, %v6108_v36 }
  0xcf   : > { %1127 = vrot.lane.b32.xlu2 %v1104_v7, %s8130_s28  ;;  %719 = vrot.lane.b32.xlu1 %v702_v9, %s8134_s17  ;;  %v627_v41 = vpop.permute.xlu0 %626 }
  0xd0   : > { %723 = vrot.lane.b32.xlu0 %v704_v11, %s8134_s17  ;;  %v641_v47 = vpop.permute.xlu1 %640  ;;  %v642_v61 = vrot.slane %v627_v41, 4  ;;  %v519_v11 = vld [vmem:[#allocation2 + $0x8] sm:$0xf] }
  0xd1   : > { %v649_v53 = vrot.slane %v641_v47, 4  ;;  %v553_v50 = vsel %vm6201_vm6, %v519_v11, 0 }
  0xd3   : > { %v657_v37 = vsel %vm8124_vm1, %v648_v39, %v649_v53 }
  0xd4   : > { %v658_v58 = vsel %vm8116_vm2, %v639_v14, %v657_v37  ;;  %v687_v14 = vunpack.c.l.b16 %v686_v3 }
  0xd5   : > { %666 = vst [vmem:[#allocation3 + $0x38] sm:$0xff] %v658_v58 }
  0xd6   : > { %vm691_vm14 = vcmp.ne.s32.totalorder %v687_v14, %v6105_v35 }
  0xd7   : > { %1115 = vrot.lane.b32.xlu2 %v1098_v29, %s8130_s28  ;;  %1119 = vrot.lane.b32.xlu1 %v1100_v30, %s8130_s28  ;;  %v633_v62 = vpop.permute.xlu0 %632  ;;  %vm6245_vm4 = vmpackc.low %vm692_vm15, %vm691_vm14  ;;  %v1083_v30 = vunpack.c.l.b16 %v1082_v28  ;;  %vm8121_vm15 = vcmask 908288  }
  0xd8   : > { %1123 = vrot.lane.b32.xlu0 %v1102_v32, %s8130_s28  ;;  %v629_v6 = vpop.permute.xlu1 %628  ;;  %v645_v7 = vrot.slane %v633_v62, 4  ;;  %v707_v32 = vsel %vm6245_vm4, %v6070_v22, 0  ;;  %v701_v37 = vsel %vm6245_vm4, %v6079_v25, 0  ;;  %v537_v58 = vsel %vm8121_vm15, %v6181_v12, %v6169_v5 }
  0xd9   : > { %v643_v8 = vrot.slane %v629_v6, 4  ;;  %vm1087_vm5 = vcmp.ne.s32.totalorder %v1083_v30, %v6105_v35  ;;  %v539_v11 = vunpack.c.h.b16 %v537_v58  ;;  %v703_v5 = vsel %vm6245_vm4, %v6081_v26, 0 }
  0xda   : > { %v653_v13 = vsel %vm8124_vm1, %v644_v60, %v645_v7  ;;  %vm6263_vm14 = vmpackc.low %vm1088_vm8, %vm1087_vm5  ;;  %v1046_v60 = vrot.slane %v1031_v38, 4  ;;  %vm8122_vm5 = vcmask 121856  }
  0xdb   : > { %v650_v18 = vsel %vm8124_vm1, %v642_v61, %v643_v8  ;;  %v654_v19 = vsel %vm8116_vm2, %v631_v52, %v653_v13  ;;  %v8189_v48 = vsel %vm6263_vm14, 4294967295, %v8188_v48  ;;  %v538_v8 = vunpack.c.l.b16 %v537_v58 }
  0xdc   : > { %v652_v20 = vsel %vm8116_vm2, %v627_v41, %v650_v18  ;;  %664 = vst [vmem:[#allocation3 + $0x28] sm:$0xff] %v654_v19  ;;  %v942_v13 = vrot.slane %v6140_v51, 4  ;;  %v1099_v19 = vsel %vm6263_vm14, %v6064_v21, 0  ;;  %vm543_vm2 = vcmp.ne.s32.totalorder %v539_v11, %v6108_v36  ;;  %v855_v11 = vld [vmem:[#allocation2 + $0x2c] sm:$0xf] }
  0xdd   : > { %663 = vst [vmem:[#allocation3 + $0x20] sm:$0xff] %v652_v20  ;;  %vm542_vm8 = vcmp.ne.s32.totalorder %v538_v8, %v6105_v35 }
  0xde   : > { %v943_v20 = vsel %vm8122_vm5, %v942_v13, %v6140_v51 }
  0xdf   : > { %582 = vrot.lane.b32.xlu2 %v559_v56, %s8132_s24  ;;  %574 = vrot.lane.b32.xlu1 %v555_v34, %s8132_s24  ;;  %v1039_v27 = vpop.permute.xlu0 %1038  ;;  %v1103_v56 = vsel %vm6263_vm14, %v6042_v4, 0  ;;  %v705_v34 = vsel %vm6245_vm4, %v6072_v24, 0  ;;  %v944_v28 = vunpack.c.l.b16 %v943_v20  ;;  %v945_v30 = vunpack.c.h.b16 %v943_v20 }
  0xe0   : > { %578 = vrot.lane.b32.xlu0 %v557_v57, %s8132_s24  ;;  %v1050_v39 = vrot.slane %v1039_v27, 4  ;;  %v1041_v41 = vpop.permute.xlu1 %1040  ;;  %v1037_v57 = vpop.permute.xlu2 %1036 }
  0xe1   : > { %v1051_v46 = vrot.slane %v1041_v41, 4  ;;  %v1049_v61 = vrot.slane %v1037_v57, 4 }
  0xe3   : > { %v1059_v52 = vsel %vm8124_vm1, %v1050_v39, %v1051_v46  ;;  %v952_v39 = vunpack.c.h.b16 %v942_v13  ;;  %v937_v46 = vld [vmem:[#allocation2 + $0x2c] sm:$0xf] }
  0xe4   : > { %v1060_v54 = vsel %vm8117_vm9, %v1039_v27, %v1059_v52 }
  0xe5   : > { %1069 = vst [vmem:[#allocation3 + $0xf0] sm:$0xff] %v1060_v54 }
  0xe7   : > { %801 = vrot.lane.b32.xlu1 %v785_v49, %s8137_s23  ;;  %570 = vrot.lane.b32.xlu2 %v553_v50, %s8132_s24  ;;  %v1045_v43 = vpop.permute.xlu0 %1044 }
  0xe8   : > { %809 = vrot.lane.b32.xlu0 %v789_v23, %s8137_s23  ;;  %v1053_v47 = vrot.slane %v1045_v43, 4  ;;  %v1035_v62 = vpop.permute.xlu1 %1034  ;;  %v8190_v23 = vmov 0 }
  0xe9   : > { %v1048_v6 = vrot.slane %v1035_v62, 4 }
  0xea   : > { %v1061_v53 = vsel %vm8124_vm1, %v1052_v45, %v1053_v47  ;;  %v951_v45 = vunpack.c.l.b16 %v942_v13  ;;  %v860_v47 = vrot.slane %v6163_v63, 4 }
  0xeb   : > { %v1062_v55 = vsel %vm8117_vm9, %v1043_v17, %v1061_v53  ;;  %v1057_v14 = vsel %vm8124_vm1, %v1048_v6, %v1049_v61  ;;  %v1097_v17 = vsel %vm6263_vm14, %v6054_v16, 0  ;;  %v8196_v6 = vmov 0 }
  0xec   : > { %1070 = vst [vmem:[#allocation3 + $0xf8] sm:$0xff] %v1062_v55  ;;  %v1058_v12 = vsel %vm8117_vm9, %v1035_v62, %v1057_v14  ;;  %v4904_v49 = vld [vmem:[#allocation3 + $0xf0] sm:$0xf]  ;;  %v861_v55 = vsel %vm8123_vm12, %v860_v47, %v6163_v63  ;;  %v869_v58 = vunpack.c.l.b16 %v860_v47 }
  0xed   : > { %1068 = vst [vmem:[#allocation3 + $0xe8] sm:$0xff] %v1058_v12  ;;  %v863_v57 = vunpack.c.h.b16 %v861_v55 }
  0xee   : > { %vm873_vm15 = vcmp.ne.s32.totalorder %v869_v58, %v6105_v35 }
  0xef   : > { %729 = vrot.lane.b32.xlu1 %v707_v32, %s8134_s17  ;;  %813 = vrot.lane.b32.xlu2 %v791_v33, %s8137_s23  ;;  %v1033_v3 = vpop.permute.xlu0 %1032  ;;  %v1101_v32 = vsel %vm6263_vm14, %v6049_v10, 0  ;;  %vm8201_vm14 = vcmask 7168  }
  0xf0   : > { %805 = vrot.lane.b32.xlu0 %v787_v40, %s8137_s23  ;;  %v1047_v7 = vrot.slane %v1033_v3, 4  ;;  %s5844_s23 = smov 126  }
  0xf2   : > { %v1054_v15 = vsel %vm8124_vm1, %v1046_v60, %v1047_v7  ;;  %v870_v60 = vunpack.c.h.b16 %v860_v47  ;;  %v935_v7 = vld [vmem:[#allocation2 + $0x1c] sm:$0xf] }
  0xf3   : > { %v1056_v18 = vsel %vm8117_vm9, %v1031_v38, %v1054_v15  ;;  %v5489_v50 = vld [vmem:[#allocation3 + $0xf4] sm:$0xf0]  ;;  %vm6307_vm9 = vmpackc.low %vm543_vm2, %vm542_vm8  ;;  %vm948_vm2 = vcmp.ne.s32.totalorder %v944_v28, %v6105_v35  ;;  %vm949_vm8 = vcmp.ne.s32.totalorder %v945_v30, %v6108_v36 }
  0xf4   : > { %1067 = vst [vmem:[#allocation3 + $0xe0] sm:$0xff] %v1056_v18  ;;  %v8191_v23 = vsel %vm6307_vm9, 4294967295, %v8190_v23  ;;  %v4905_v27 = vor.u32 %v5489_v50, %v4904_v49  ;;  %v558_v31 = vsel %vm6307_vm9, %v6070_v22, 0  ;;  %v554_v51 = vsel %vm6307_vm9, %v6081_v26, 0  ;;  %v5487_v22 = vld [vmem:[#allocation3 + $0xe4] sm:$0xf0]  ;;  %vm6325_vm3 = vmpackc.low %vm949_vm8, %vm948_vm2 }
  0xf5   : > { %v556_v26 = vsel %vm6307_vm9, %v6072_v24, 0  ;;  %v552_v41 = vsel %vm6307_vm9, %v6079_v25, 0  ;;  %v962_v43 = vsel %vm6325_vm3, %v6049_v10, 0  ;;  %vm955_vm2 = vcmp.ne.s32.totalorder %v951_v45, %v6105_v35  ;;  %v939_v25 = vld [vmem:[#allocation2 + $0x3c] sm:$0xf] }
  0xf6   : > { %1457 = vmatpush.bf16.msra.mxu1 %v4905_v27  ;;  %vm956_vm8 = vcmp.ne.s32.totalorder %v952_v39, %v6108_v36  ;;  %v964_v52 = vsel %vm6325_vm3, %v6042_v4, 0  ;;  %v958_v62 = vsel %vm6325_vm3, %v6054_v16, 0  ;;  %v960_v3 = vsel %vm6325_vm3, %v6064_v21, 0  ;;  %v851_v50 = vld [vmem:[#allocation2 + $0xc] sm:$0xf] }
  0xf7   : > { %1125 = vrot.lane.b32.xlu1 %v1103_v56, %s8130_s28  ;;  %725 = vrot.lane.b32.xlu2 %v705_v34, %s8134_s17  ;;  %vm6343_vm7 = vmpackc.low %vm956_vm8, %vm955_vm2  ;;  %v933_v34 = vld [vmem:[#allocation2 + $0xc] sm:$0xf]  ;;  %vm867_vm8 = vcmp.ne.s32.totalorder %v863_v57, %v6108_v36  ;;  %vm874_vm5 = vcmp.ne.s32.totalorder %v870_v60, %v6108_v36  ;;  %v853_v27 = vld [vmem:[#allocation2 + $0x1c] sm:$0xf]  ;;  %vm8248_vm9 = vcmask 15360  }
  0xf8   : > { %717 = vrot.lane.b32.xlu0 %v701_v37, %s8134_s17  ;;  %v963_v53 = vsel %vm6343_vm7, %v937_v46, 0  ;;  %v965_v54 = vsel %vm6343_vm7, %v939_v25, 0  ;;  %v862_v37 = vunpack.c.l.b16 %v861_v55  ;;  %v959_v61 = vsel %vm6343_vm7, %v933_v34, 0  ;;  %vm6383_vm1 = vmpackc.low %vm874_vm5, %vm873_vm15 }
  0xf9   : > { %v961_v14 = vsel %vm6343_vm7, %v935_v7, 0  ;;  %v881_v15 = vsel %vm6383_vm1, %v855_v11, 0  ;;  %v877_v28 = vsel %vm6383_vm1, %v851_v50, 0  ;;  %vm1568_vm15 = vcmp.ge.s32.totalorder %v6034_v1, 2 }
  0xfa   : > { %vm866_vm2 = vcmp.ne.s32.totalorder %v862_v37, %v6105_v35 }
  0xfb   : > { %v4896_v33 = vld [vmem:[#allocation3 + $0xe0] sm:$0xf]  ;;  %vm6379_vm12 = vmpackc.low %vm867_vm8, %vm866_vm2 }
  0xfc   : > { %v4897_v38 = vor.u32 %v5487_v22, %v4896_v33  ;;  %v8197_v6 = vsel %vm6379_vm12, 4294967295, %v8196_v6  ;;  %v880_v13 = vsel %vm6379_vm12, %v6049_v10, 0  ;;  %v882_v10 = vsel %vm6379_vm12, %v6042_v4, 0 }
  0xfd   : > { %v876_v18 = vsel %vm6379_vm12, %v6054_v16, 0  ;;  %v878_v4 = vsel %vm6379_vm12, %v6064_v21, 0  ;;  %v879_v16 = vsel %vm6383_vm1, %v853_v27, 0  ;;  %v1199_v21 = vld [vmem:[%s8095_s3 + $0x10] sm:$0xff] }
  0xfe   : > { %1458 = vmatpush.bf16.msra.mxu1 %v4897_v38 }
  0xff   : > { %1113 = vrot.lane.b32.xlu1 %v1097_v17, %s8130_s28  ;;  %721 = vrot.lane.b32.xlu2 %v703_v5, %s8134_s17  ;;  %v857_v5 = vld [vmem:[#allocation2 + $0x3c] sm:$0xf]  ;;  %s5842_s17 = smov 96  }
 0x100   : > { %1117 = vrot.lane.b32.xlu0 %v1099_v19, %s8130_s28  ;;  %v883_v12 = vsel %vm6383_vm1, %v857_v5, 0 }
 0x107   : > { %580 = vrot.lane.b32.xlu1 %v558_v31, %s8132_s24  ;;  %1121 = vrot.lane.b32.xlu2 %v1101_v32, %s8130_s28  ;;  %s8364_s28 = smov 113  }
 0x108   : > { %572 = vrot.lane.b32.xlu0 %v554_v51, %s8132_s24  ;;  %v1578_v51 = vsel %vm1568_vm15, 1, %v5831_v0  ;;  %vm8200_vm15 = vcmask 1043456  }
 0x109   : > { %v1579_v45 = vperm.slane %v1578_v51, 0  ;;  %v1580_v39 = vperm.slane %v1578_v51, 1 }
 0x10b   : > { %vm1581_vm5 = vcmp.eq.s32.totalorder %v1579_v45, 1  ;;  %vm1582_vm2 = vcmp.eq.s32.totalorder %v1580_v39, 1 }
 0x10c   : > { %vm1583_vm8 = vmpackc.low %vm1582_vm2, %vm1581_vm5  ;;  %vm8203_vm2 = vcmask 121856  }
 0x10d   : > { %vm8202_vm5 = vmmov %vm8200_vm15 }
 0x10f   : > { %576 = vrot.lane.b32.xlu2 %v556_v26, %s8132_s24  ;;  %568 = vrot.lane.b32.xlu1 %v552_v41, %s8132_s24  ;;  %v1198_v26 = vld [vmem:[%s8095_s3 + $0x8] sm:$0xff]  ;;  %s5843_s24 = smov 2  }
 0x110   : > { %982 = vrot.lane.b32.xlu0 %v962_v43, %s8155_s22 }
 0x117   : > { %986 = vrot.lane.b32.xlu2 %v964_v52, %s8155_s22  ;;  %984 = vrot.lane.b32.xlu1 %v963_v53, %s8155_s22  ;;  %v6442_v52 = vsel %vm1583_vm8, 65537, %v5831_v0  ;;  %vm8205_vm8 = vmmov %vm8202_vm5 }
 0x118   : > { %988 = vrot.lane.b32.xlu0 %v965_v54, %s8155_s22 }
 0x119   : > { %v6360_v56 = vpop.permute.xlu2 %803 }
 0x11f   : > { %976 = vrot.lane.b32.xlu2 %v959_v61, %s8155_s22  ;;  %974 = vrot.lane.b32.xlu1 %v958_v62, %s8155_s22 }
 0x120   : > { %978 = vrot.lane.b32.xlu0 %v960_v3, %s8155_s22  ;;  %v818_v3 = vrot.slane %v6360_v56, 4 }
 0x121   : > { %v6377_v63 = vpop.permute.xlu2 %731 }
 0x127   : > { %900 = vrot.lane.b32.xlu2 %v880_v13, %s8141_s15  ;;  %980 = vrot.lane.b32.xlu1 %v961_v14, %s8155_s22 }
 0x128   : > { %902 = vrot.lane.b32.xlu0 %v881_v15, %s8141_s15 }
 0x129   : > { %v6397_v17 = vpop.permute.xlu2 %1127 }
 0x12f   : > { %906 = vrot.lane.b32.xlu2 %v883_v12, %s8141_s15  ;;  %904 = vrot.lane.b32.xlu1 %v882_v10, %s8141_s15 }
 0x130   : > { %892 = vrot.lane.b32.xlu0 %v876_v18, %s8141_s15 }
 0x131   : > { %v6410_v19 = vpop.permute.xlu2 %1115  ;;  %v812_v20 = vpop.permute.xlu1 %811 }
 0x132   : > { %v816_v49 = vpop.permute.xlu0 %815  ;;  %v822_v15 = vrot.slane %v812_v20, 4  ;;  %v740_v20 = vrot.slane %v6377_v63, 4 }
 0x133   : > { %v824_v43 = vrot.slane %v816_v49, 4 }
 0x137   : > { %896 = vrot.lane.b32.xlu2 %v878_v4, %s8141_s15  ;;  %894 = vrot.lane.b32.xlu1 %v877_v28, %s8141_s15 }
 0x138   : > { %898 = vrot.lane.b32.xlu0 %v879_v16, %s8141_s15  ;;  %s5846_s15 = smov 34  }
 0x139   : > { %v6422_v30 = vpop.permute.xlu2 %582  ;;  %v6424_v31 = vpop.permute.xlu1 %807 }
 0x13a   : > { %v728_v32 = vpop.permute.xlu0 %727  ;;  %v820_v51 = vrot.slane %v6424_v31, 4 }
 0x13b   : > { %v738_v34 = vrot.slane %v728_v32, 4 }
 0x13f   : > { %1213 = vperm.xlu1 %5695, %v1199_v21  }
 0x141   : > { %v6431_v33 = vpop.permute.xlu1 %719  ;;  %v6433_v22 = vpop.permute.xlu2 %570 }
 0x142   : > { %v724_v38 = vpop.permute.xlu0 %723 }
 0x143   : > { %v736_v7 = vrot.slane %v724_v38, 4 }
 0x147   : > { %1208 = vperm.xlu1 %5695, %v1198_v26  }
 0x149   : > { %v6438_v41 = vpop.permute.xlu1 %1119  ;;  %v814_v1 = vpop.permute.xlu2 %813 }
 0x14a   : > { %v1124_v46 = vpop.permute.xlu0 %1123  ;;  %v823_v25 = vrot.slane %v814_v1, 4 }
 0x14b   : > { %v1134_v28 = vrot.slane %v1124_v46, 4 }
 0x14c   : > { %v832_v47 = vsel %vm8200_vm15, %v823_v25, %v824_v43  ;;  %vm8206_vm15 = vcmask 7168  }
 0x14d   : > { %v833_v53 = vsel %vm8201_vm14, %v814_v1, %v832_v47  ;;  %vm8204_vm14 = vmmov %vm8202_vm5 }
 0x14e   : > { %841 = vst [vmem:[#allocation3 + $0x78] sm:$0xff] %v833_v53  ;;  %vm8207_vm0 = vmmov %vm8206_vm15 }
 0x14f   : > { %1991 = vrot.lane.b32.xlu1 %v6442_v52, %s5840_s21 }
 0x151   : > { %v6447_v54 = vpop.permute.xlu1 %574  ;;  %v726_v55 = vpop.permute.xlu2 %725 }
 0x152   : > { %v6449_v37 = vpop.permute.xlu0 %578  ;;  %v737_v57 = vrot.slane %v726_v55, 4 }
 0x154   : > { %v746_v58 = vsel %vm8202_vm5, %v737_v57, %v738_v34 }
 0x155   : > { %v747_v60 = vsel %vm8203_vm2, %v726_v55, %v746_v58  ;;  %v5473_v25 = vld [vmem:[#allocation3 + $0x74] sm:$0xf0]  ;;  %v4842_v47 = vld [vmem:[#allocation3 + $0x78] sm:$0xf0]  ;;  %v1136_v58 = vrot.slane %v6397_v17, 4 }
 0x156   : > { %756 = vst [vmem:[#allocation3 + $0x50] sm:$0xff] %v747_v60  ;;  %v589_v60 = vrot.slane %v6449_v37, 4 }
 0x157   : > { %1585 = vrot.lane.b32.xlu1 %v6442_v52, %s5841_s26 }
 0x159   : > { %v802_v61 = vpop.permute.xlu1 %801  ;;  %v722_v62 = vpop.permute.xlu2 %721 }
 0x15a   : > { %v817_v11 = vrot.slane %v802_v61, 4  ;;  %v810_v13 = vpop.permute.xlu0 %809  ;;  %v735_v14 = vrot.slane %v722_v62, 4 }
 0x15b   : > { %v821_v5 = vrot.slane %v810_v13, 4 }
 0x15c   : > { %v825_v12 = vsel %vm8204_vm14, %v817_v11, %v818_v3  ;;  %v744_v10 = vsel %vm8205_vm8, %v735_v14, %v736_v7  ;;  %vm8208_vm14 = vmmov %vm8202_vm5  ;;  %v734_v7 = vrot.slane %v6431_v33, 4 }
 0x15d   : > { %v827_v18 = vsel %vm8206_vm15, %v802_v61, %v825_v12  ;;  %v830_v49 = vsel %vm8202_vm5, %v821_v5, %v822_v15  ;;  %v745_v50 = vsel %vm8203_vm2, %v722_v62, %v744_v10  ;;  %vm8209_vm8 = vmmov %vm8202_vm5 }
 0x15e   : > { %838 = vst [vmem:[#allocation3 + $0x60] sm:$0xff] %v827_v18  ;;  %v831_v27 = vsel %vm8207_vm0, %v810_v13, %v830_v49  ;;  %vm8210_vm15 = vmmov %vm8203_vm2  ;;  %vm8213_vm2 = vcmask 7168  }
 0x15f   : > { %840 = vst [vmem:[#allocation3 + $0x70] sm:$0xff] %v831_v27  ;;  %vm8211_vm0 = vmmov %vm8202_vm5  ;;  %vm8212_vm5 = vcmask 908288  }
 0x160   : > { %755 = vst [vmem:[#allocation3 + $0x48] sm:$0xff] %v745_v50 }
 0x161   : > { %v730_v56 = vpop.permute.xlu1 %729  ;;  %v1122_v4 = vpop.permute.xlu2 %1121 }
 0x162   : > { %v739_v16 = vrot.slane %v730_v56, 4  ;;  %v806_v32 = vpop.permute.xlu0 %805  ;;  %v1133_v21 = vrot.slane %v1122_v4, 4 }
 0x163   : > { %v819_v38 = vrot.slane %v806_v32, 4 }
 0x164   : > { %v748_v45 = vsel %vm8208_vm14, %v739_v16, %v740_v20  ;;  %v1141_v39 = vsel %vm8209_vm8, %v1133_v21, %v1134_v28  ;;  %vm8214_vm14 = vmmov %vm8211_vm0  ;;  %v1130_v20 = vrot.slane %v6410_v19, 4  ;;  %v5468_v21 = vld [vmem:[#allocation3 + $0x54] sm:$0xf] }
 0x165   : > { %v749_v26 = vsel %vm8210_vm15, %v730_v56, %v748_v45  ;;  %v828_v1 = vsel %vm8211_vm0, %v819_v38, %v820_v51  ;;  %v1142_v43 = vsel %vm8212_vm5, %v1122_v4, %v1141_v39  ;;  %vm8215_vm8 = vmmov %vm8211_vm0  ;;  %v4832_v10 = vld [vmem:[#allocation3 + $0x60] sm:$0xf]  ;;  %v5470_v17 = vld [vmem:[#allocation3 + $0x64] sm:$0xf]  ;;  %v1132_v51 = vrot.slane %v6438_v41, 4 }
 0x166   : > { %757 = vst [vmem:[#allocation3 + $0x58] sm:$0xff] %v749_v26  ;;  %v829_v63 = vsel %vm8213_vm2, %v806_v32, %v828_v1  ;;  %v4840_v46 = vld [vmem:[#allocation3 + $0x70] sm:$0xf]  ;;  %v5472_v53 = vld [vmem:[#allocation3 + $0x74] sm:$0xf]  ;;  %vm8216_vm15 = vmmov %vm8212_vm5  ;;  %vm8217_vm5 = vcmask 138240  }
 0x167   : > { %839 = vst [vmem:[#allocation3 + $0x68] sm:$0xff] %v829_v63  ;;  %v4841_v31 = vor.u32 %v5473_v25, %v4840_v46  ;;  %v4845_v55 = vor.u32 %v5472_v53, %v4842_v47  ;;  %vm8218_vm2 = vcmask 121856   ;;  %v4824_v32 = vld [vmem:[#allocation3 + $0x50] sm:$0xf]  ;;  %v5467_v1 = vld [vmem:[#allocation3 + $0x44] sm:$0xf0] }
 0x168   : > { %1151 = vst [vmem:[#allocation3 + $0x110] sm:$0xff] %v1142_v43  ;;  %v4818_v63 = vld [vmem:[#allocation3 + $0x48] sm:$0xf0] }
 0x169   : > { %1438 = vmatpush.bf16.msra.mxu0 %v4841_v31  ;;  %1495 = vmatpush.bf16.msra.mxu3 %v4845_v55  ;;  %v1126_v34 = vpop.permute.xlu1 %1125  ;;  %v577_v57 = vpop.permute.xlu2 %576 }
 0x16a   : > { %v1135_v61 = vrot.slane %v1126_v34, 4  ;;  %v718_v62 = vpop.permute.xlu0 %717  ;;  %v588_v3 = vrot.slane %v577_v57, 4 }
 0x16b   : > { %v733_v11 = vrot.slane %v718_v62, 4 }
 0x16c   : > { %v1143_v13 = vsel %vm8214_vm14, %v1135_v61, %v1136_v58  ;;  %v598_v14 = vsel %vm8215_vm8, %v588_v3, %v589_v60  ;;  %vm8219_vm14 = vmmov %vm8211_vm0  ;;  %v5465_v58 = vld [vmem:[#allocation3 + $0x34] sm:$0xf0]  ;;  %v5464_v60 = vld [vmem:[#allocation3 + $0x34] sm:$0xf]  ;;  %v591_v3 = vrot.slane %v6422_v30, 4 }
 0x16d   : > { %v1144_v15 = vsel %vm8216_vm15, %v1126_v34, %v1143_v13  ;;  %v741_v5 = vsel %vm8211_vm0, %v733_v11, %v734_v7  ;;  %v599_v12 = vsel %vm8217_vm5, %v577_v57, %v598_v14  ;;  %v5469_v27 = vld [vmem:[#allocation3 + $0x54] sm:$0xf0]  ;;  %v4826_v56 = vld [vmem:[#allocation3 + $0x58] sm:$0xf0]  ;;  %vm8220_vm8 = vmmov %vm8216_vm15  ;;  %v587_v13 = vrot.slane %v6447_v54, 4 }
 0x16e   : > { %1152 = vst [vmem:[#allocation3 + $0x118] sm:$0xff] %v1144_v15  ;;  %v743_v37 = vsel %vm8218_vm2, %v718_v62, %v741_v5  ;;  %v5471_v18 = vld [vmem:[#allocation3 + $0x64] sm:$0xf0]  ;;  %v4834_v49 = vld [vmem:[#allocation3 + $0x68] sm:$0xf0]  ;;  %v4825_v45 = vor.u32 %v5469_v27, %v4824_v32  ;;  %v4829_v39 = vor.u32 %v5468_v21, %v4826_v56  ;;  %vm8221_vm15 = vmmov %vm8211_vm0  ;;  %vm8224_vm2 = vcmask 138240  }
 0x16f   : > { %754 = vst [vmem:[#allocation3 + $0x40] sm:$0xff] %v743_v37  ;;  %v4833_v33 = vor.u32 %v5471_v18, %v4832_v10  ;;  %v4837_v50 = vor.u32 %v5470_v17, %v4834_v49  ;;  %v4920_v47 = vld [vmem:[#allocation3 + $0x110] sm:$0xf]  ;;  %vm8222_vm0 = vmmov %vm8220_vm8  ;;  %v4810_v61 = vld [vmem:[#allocation3 + $0x38] sm:$0xf0] }
 0x170   : > { %608 = vst [vmem:[#allocation3 + $0x10] sm:$0xff] %v599_v12  ;;  %v4808_v57 = vld [vmem:[#allocation3 + $0x30] sm:$0xf]  ;;  %v4813_v5 = vor.u32 %v5464_v60, %v4810_v61  ;;  %v4800_v12 = vld [vmem:[#allocation3 + $0x20] sm:$0xf]  ;;  %vm8223_vm5 = vmmov %vm8219_vm14 }
 0x171   : > { %1439 = vmatpush.bf16.msra.mxu0 %v4833_v33  ;;  %1496 = vmatpush.bf16.msra.mxu3 %v4837_v50  ;;  %v1114_v4 = vpop.permute.xlu1 %1113  ;;  %v4809_v15 = vor.u32 %v5465_v58, %v4808_v57  ;;  %v5463_v17 = vld [vmem:[#allocation3 + $0x24] sm:$0xf0]  ;;  %v5462_v37 = vld [vmem:[#allocation3 + $0x24] sm:$0xf]  ;;  %v4802_v18 = vld [vmem:[#allocation3 + $0x28] sm:$0xf0]  ;;  %v987_v32 = vpop.permute.xlu2 %986 }
 0x172   : > { %v1129_v28 = vrot.slane %v1114_v4, 4  ;;  %v1118_v16 = vpop.permute.xlu0 %1117  ;;  %v5488_v50 = vld [vmem:[#allocation3 + $0xf4] sm:$0xf]  ;;  %v4906_v27 = vld [vmem:[#allocation3 + $0xf8] sm:$0xf0]  ;;  %v4805_v21 = vor.u32 %v5462_v37, %v4802_v18 }
 0x173   : > { %v1131_v38 = vrot.slane %v1118_v16, 4 }
 0x174   : > { %v1137_v26 = vsel %vm8219_vm14, %v1129_v28, %v1130_v20  ;;  %vm8225_vm14 = vmmov %vm8223_vm5  ;;  %v4768_v28 = vld [vmem:[%s8094_s2 + $0x8] sm:$0xf] }
 0x175   : > { %v1138_v43 = vsel %vm8220_vm8, %v1114_v4, %v1137_v26  ;;  %v1139_v25 = vsel %vm8221_vm15, %v1131_v38, %v1132_v51  ;;  %1440 = vmatpush.bf16.msra.mxu0 %v4825_v45  ;;  %1497 = vmatpush.bf16.msra.mxu3 %v4829_v39  ;;  %v5493_v19 = vld [vmem:[#allocation3 + $0x114] sm:$0xf0]  ;;  %vm8226_vm8 = vmmov %vm8224_vm2  ;;  %v4801_v4 = vor.u32 %v5463_v17, %v4800_v12  ;;  %v5486_v39 = vld [vmem:[#allocation3 + $0xe4] sm:$0xf]  ;;  %vm8136_vm15 = vcmask 261120  }
 0x176   : > { %1149 = vst [vmem:[#allocation3 + $0x100] sm:$0xff] %v1138_v43  ;;  %v1140_v46 = vsel %vm8222_vm0, %v1118_v16, %v1139_v25  ;;  %v4816_v53 = vld [vmem:[#allocation3 + $0x40] sm:$0xf]  ;;  %v4921_v41 = vor.u32 %v5493_v19, %v4920_v47  ;;  %v5466_v31 = vld [vmem:[#allocation3 + $0x44] sm:$0xf]  ;;  %v4909_v51 = vor.u32 %v5488_v50, %v4906_v27  ;;  %vm8227_vm0 = vmmov %vm8223_vm5 }
 0x177   : > { %1150 = vst [vmem:[#allocation3 + $0x108] sm:$0xff] %v1140_v46  ;;  %v4817_v55 = vor.u32 %v5467_v1, %v4816_v53  ;;  %v4821_v34 = vor.u32 %v5466_v31, %v4818_v63  ;;  %v5454_v16 = vld [vmem:[%s8094_s2 + $0x10] sm:$0xf0]  ;;  %v4898_v26 = vld [vmem:[#allocation3 + $0xe8] sm:$0xf0]  ;;  %v585_v1 = vrot.slane %v6433_v22, 4 }
 0x178   : > { %1482 = vmatpush.bf16.msra.mxu2 %v4921_v41  ;;  %v6497_v38 = vor.u32 %v5454_v16, %v4768_v28  ;;  %v4901_v19 = vor.u32 %v5486_v39, %v4898_v26  ;;  %v4792_v63 = vld [vmem:[#allocation3 + $0x10] sm:$0xf]  ;;  %v5460_v41 = vld [vmem:[#allocation3 + $0x14] sm:$0xf]  ;;  %v4780_v50 = vld [vmem:[%s8094_s2 + $0x20] sm:$0xf] }
 0x179   : > { %1441 = vmatpush.bf16.msra.mxu0 %v4817_v55  ;;  %1498 = vmatpush.bf16.msra.mxu3 %v4821_v34  ;;  %v581_v62 = vpop.permute.xlu1 %580  ;;  %v977_v57 = vpop.permute.xlu2 %976  ;;  %v5457_v27 = vld [vmem:[%s8094_s2 + $0x28] sm:$0xf0]  ;;  %v1197_v16 = vld [vmem:[%s8095_s3] sm:$0xff] }
 0x17a   : > { %v590_v7 = vrot.slane %v581_v62, 4  ;;  %v573_v11 = vpop.permute.xlu0 %572  ;;  %v6520_v28 = vor.u32 %v5457_v27, %v4780_v50  ;;  %1203 = vperm.xlu0 %5697, %v1197_v16   ;;  %v5714_v50 = vld [vmem:[%s8175_s1] sm:$0x3]  ;;  %s4661_s1 = scalar_lea.sflag [#allocation6], %s6010_s18 }
 0x17b   : > { %v586_v14 = vrot.slane %v573_v11, 4 }
 0x17c   : > { %v600_v10 = vsel %vm8223_vm5, %v590_v7, %v591_v3  ;;  %vm8228_vm5 = vmmov %vm8224_vm2  ;;  %v4922_v7 = vld [vmem:[#allocation3 + $0x118] sm:$0xf0] }
 0x17d   : > { %v601_v49 = vsel %vm8224_vm2, %v581_v62, %v600_v10  ;;  %v596_v33 = vsel %vm8225_vm14, %v586_v14, %v587_v13  ;;  %1442 = vmatpush.bf16.msra.mxu0 %v4809_v15  ;;  %1499 = vmatpush.bf16.msra.mxu3 %v4813_v5  ;;  %v4912_v30 = vld [vmem:[#allocation3 + $0x100] sm:$0xf]  ;;  %v996_v62 = vrot.slane %v987_v32, 4  ;;  %vm8229_vm2 = vmmov %vm8227_vm0  ;;  %v5492_v14 = vld [vmem:[#allocation3 + $0x114] sm:$0xf] }
 0x17e   : > { %609 = vst [vmem:[#allocation3 + $0x18] sm:$0xff] %v601_v49  ;;  %v597_v54 = vsel %vm8226_vm8, %v573_v11, %v596_v33  ;;  %v5491_v56 = vld [vmem:[#allocation3 + $0x104] sm:$0xf0]  ;;  %v4760_v15 = vld [vmem:[%s8094_s2] sm:$0xf]  ;;  %vm8230_vm14 = vmmov %vm8227_vm0  ;;  %vm8231_vm8 = vcmask 924672  }
 0x17f   : > { %607 = vst [vmem:[#allocation3 + $0x8] sm:$0xff] %v597_v54  ;;  %v4913_v20 = vor.u32 %v5491_v56, %v4912_v30  ;;  %v5453_v5 = vld [vmem:[%s8094_s2 + $0x8] sm:$0xf0]  ;;  %v4925_v54 = vor.u32 %v5492_v14, %v4922_v7  ;;  %v4772_v7 = vld [vmem:[%s8094_s2 + $0x18] sm:$0xf] }
 0x180   : > { %v4761_v56 = vor.u32 %v5453_v5, %v4760_v15 }
 0x181   : > { %1443 = vmatpush.bf16.msra.mxu0 %v4801_v4  ;;  %1483 = vmatpush.bf16.msra.mxu2 %v4913_v20  ;;  %v569_v45 = vpop.permute.xlu1 %568  ;;  %v5490_v4 = vld [vmem:[#allocation3 + $0x104] sm:$0xf]  ;;  %v4914_v20 = vld [vmem:[#allocation3 + $0x108] sm:$0xf0]  ;;  %v901_v26 = vpop.permute.xlu2 %900 }
 0x182   : > { %1500 = vmatpush.bf16.msra.mxu3 %v4805_v21  ;;  %v983_v43 = vpop.permute.xlu0 %982  ;;  %v584_v25 = vrot.slane %v569_v45, 4  ;;  %v991_v21 = vrot.slane %v977_v57, 4  ;;  %v4917_v39 = vor.u32 %v5490_v4, %v4914_v20 }
 0x183   : > { %v994_v58 = vrot.slane %v983_v43, 4 }
 0x184   : > { %v593_v47 = vsel %vm8227_vm0, %v584_v25, %v585_v1  ;;  %4926 = vmatmul.msk.bf16.vlgmr.msra.gmra.mxu2 %vm8136_vm15, %v6497_v38  ;;  %vm8232_vm0 = vmmov %vm8231_vm8 }
 0x185   : > { %1514 = vmatpush.bf16.msrb.mxu2 %v4909_v51  ;;  %v595_v46 = vsel %vm8228_vm5, %v569_v45, %v593_v47  ;;  %v5461_v53 = vld [vmem:[#allocation3 + $0x14] sm:$0xf0]  ;;  %v4794_v31 = vld [vmem:[#allocation3 + $0x18] sm:$0xf0]  ;;  %vm8233_vm5 = vmmov %vm8229_vm2 }
 0x186   : > { %606 = vst [vmem:[#allocation3] sm:$0xff] %v595_v46  ;;  %v4793_v55 = vor.u32 %v5461_v53, %v4792_v63  ;;  %v4797_v22 = vor.u32 %v5460_v41, %v4794_v31  ;;  %v5459_v13 = vld [vmem:[#allocation3 + $0x4] sm:$0xf0]  ;;  %v4786_v18 = vld [vmem:[#allocation3 + $0x8] sm:$0xf0]  ;;  %v845_v31 = vld [vmem:[#allocation2 + $0x34] sm:$0xff] }
 0x187   : > { %v844_v41 = vld [vmem:[#allocation2 + $0x24] sm:$0xff]  ;;  %849 = vst [vmem:[#allocation3 + $0x98] sm:$0xff] %v845_v31 }
 0x188   : > { %1444 = vmatpush.bf16.msra.mxu0 %v4793_v55  ;;  %1501 = vmatpush.bf16.msra.mxu3 %v4797_v22  ;;  %848 = vst [vmem:[#allocation3 + $0x90] sm:$0xff] %v844_v41 }
 0x189   : > { %1515 = vmatpush.bf16.msrb.mxu2 %v4901_v19  ;;  %v985_v34 = vpop.permute.xlu1 %984  ;;  %v907_v15 = vpop.permute.xlu2 %906 }
 0x18a   : > { %v989_v60 = vpop.permute.xlu0 %988  ;;  %v995_v61 = vrot.slane %v985_v34, 4 }
 0x18b   : > { %v997_v3 = vrot.slane %v989_v60, 4 }
 0x18c   : > { %v1002_v11 = vsel %vm8229_vm2, %v994_v58, %v995_v61  ;;  %vm8234_vm2 = vmmov %vm8232_vm0  ;;  %v912_v58 = vrot.slane %v901_v26, 4  ;;  %v842_v61 = vld [vmem:[#allocation2 + $0x4] sm:$0xff] }
 0x18d   : > { %v1004_v12 = vsel %vm8230_vm14, %v996_v62, %v997_v3  ;;  %v1003_v10 = vsel %vm8231_vm8, %v983_v43, %v1002_v11  ;;  %v4784_v17 = vld [vmem:[#allocation3] sm:$0xf]  ;;  %v5458_v37 = vld [vmem:[#allocation3 + $0x4] sm:$0xf]  ;;  %v843_v62 = vld [vmem:[#allocation2 + $0x14] sm:$0xff]  ;;  %846 = vst [vmem:[#allocation3 + $0x80] sm:$0xff] %v842_v61 }
 0x18e   : > { %v1005_v49 = vsel %vm8232_vm0, %v987_v32, %v1004_v12  ;;  %1012 = vst [vmem:[#allocation3 + $0xd0] sm:$0xff] %v1003_v10  ;;  %v4785_v33 = vor.u32 %v5459_v13, %v4784_v17  ;;  %v4789_v30 = vor.u32 %v5458_v37, %v4786_v18  ;;  %vm8235_vm14 = vmmov %vm8233_vm5  ;;  %v5456_v11 = vld [vmem:[%s8094_s2 + $0x20] sm:$0xf0]  ;;  %v915_v17 = vrot.slane %v907_v15, 4  ;;  %v4858_v15 = vld [vmem:[#allocation3 + $0x98] sm:$0xf0] }
 0x18f   : > { %1013 = vst [vmem:[#allocation3 + $0xd8] sm:$0xff] %v1005_v49  ;;  %vm8236_vm8 = vmmov %vm8233_vm5  ;;  %v4773_v12 = vor.u32 %v5456_v11, %v4772_v7  ;;  %v5476_v61 = vld [vmem:[#allocation3 + $0x94] sm:$0xf]  ;;  %v5477_v11 = vld [vmem:[#allocation3 + $0x94] sm:$0xf0] }
 0x190   : > { %1445 = vmatpush.bf16.msra.mxu0 %v4785_v33  ;;  %1502 = vmatpush.bf16.msra.mxu3 %v4789_v30  ;;  %847 = vst [vmem:[#allocation3 + $0x88] sm:$0xff] %v843_v62  ;;  %v1200_v62 = vld [vmem:[%s8095_s3 + $0x18] sm:$0xff] }
 0x191   : > { %v975_v32 = vpop.permute.xlu1 %974  ;;  %1218 = vperm.xlu2 %5696, %v1200_v62   ;;  %v1908_v62 = vld [vmem:[#allocation2 + $0x3c] sm:$0xf] }
 0x192   : > { %v979_v51 = vpop.permute.xlu0 %978  ;;  %v990_v45 = vrot.slane %v975_v32, 4 }
 0x193   : > { %1503 = vmatmul.bf16.vlgmr.msra.gmra.mxu3 %v4761_v56  ;;  %1446 = vmatmul.bf16.vlgmr.msra.gmra.mxu0 %v4761_v56  ;;  %v992_v22 = vrot.slane %v979_v51, 4 }
 0x194   : > { %1539 = vmatpush.bf16.msrb.mxu0 %v4925_v54  ;;  %v998_v1 = vsel %vm8233_vm5, %v990_v45, %v991_v21  ;;  %4927 = vmatmul.msk.bf16.gmra.mxu2 %vm8136_vm15, %v6520_v28  ;;  %vm8237_vm5 = vcmask 1039360   ;;  %v897_v45 = vpop.permute.xlu2 %896  ;;  %vm8242_vm15 = vcmask 1039360  }
 0x195   : > { %v999_v43 = vsel %vm8234_vm2, %v975_v32, %v998_v1  ;;  %v4888_v25 = vld [vmem:[#allocation3 + $0xd0] sm:$0xf]  ;;  %v5484_v47 = vld [vmem:[#allocation3 + $0xd4] sm:$0xf]  ;;  %vm8238_vm2 = vmmov %vm8236_vm8 }
 0x196   : > { %1010 = vst [vmem:[#allocation3 + $0xc0] sm:$0xff] %v999_v43  ;;  %v5485_v19 = vld [vmem:[#allocation3 + $0xd4] sm:$0xf0]  ;;  %v4890_v63 = vld [vmem:[#allocation3 + $0xd8] sm:$0xf0] }
 0x197   : > { %v4889_v46 = vor.u32 %v5485_v19, %v4888_v25  ;;  %v4893_v53 = vor.u32 %v5484_v47, %v4890_v63  ;;  %v910_v25 = vrot.slane %v897_v45, 4 }
 0x198   : > { %1540 = vmatpush.bf16.msrb.mxu0 %v4917_v39 }
 0x199   : > { %1459 = vmatpush.bf16.msra.mxu1 %v4889_v46  ;;  %1516 = vmatpush.bf16.msrb.mxu2 %v4893_v53  ;;  %v981_v55 = vpop.permute.xlu1 %980 }
 0x19a   : > { %v903_v34 = vpop.permute.xlu0 %902  ;;  %v993_v57 = vrot.slane %v981_v55, 4  ;;  %1817 = vrot.lane.b32.xlu2 %v6442_v52, %s5844_s23 }
 0x19b   : > { %v913_v60 = vrot.slane %v903_v34, 4 }
 0x19c   : > { %v1000_v3 = vsel %vm8235_vm14, %v992_v22, %v993_v57  ;;  %vm1569_vm14 = vcmp.lt.s32.totalorder %v5714_v50, 14 }
 0x19d   : > { %v920_v13 = vsel %vm8236_vm8, %v912_v58, %v913_v60  ;;  %v1001_v14 = vsel %vm8232_vm0, %v979_v51, %v1000_v3  ;;  %v4880_v33 = vld [vmem:[#allocation3 + $0xc0] sm:$0xf]  ;;  %v5482_v30 = vld [vmem:[#allocation3 + $0xc4] sm:$0xf]  ;;  %vm8239_vm8 = vmmov %vm8237_vm5  ;;  %v1726_v4 = vsel %vm1569_vm14, 1, %v5831_v0  ;;  %vm8240_vm14 = vcmask 1043456  }
 0x19e   : > { %v921_v5 = vsel %vm8237_vm5, %v901_v26, %v920_v13  ;;  %1011 = vst [vmem:[#allocation3 + $0xc8] sm:$0xff] %v1001_v14  ;;  %v1727_v32 = vperm.slane %v1726_v4, 0  ;;  %v1728_v21 = vperm.slane %v1726_v4, 1  ;;  %v2068_v51 = vld [vmem:[#allocation2 + $0x1c] sm:$0xf] }
 0x19f   : > { %930 = vst [vmem:[#allocation3 + $0xb0] sm:$0xff] %v921_v5  ;;  %2087 = vrot.lane.b32.xlu1 %v2068_v51, %s5842_s17  ;;  %v4856_v60 = vld [vmem:[#allocation3 + $0x90] sm:$0xf]  ;;  %v5455_v51 = vld [vmem:[%s8094_s2 + $0x1c] sm:$0xf] }
 0x1a0   : > { %vm1729_vm0 = vcmp.eq.s32.totalorder %v1727_v32, 1  ;;  %vm1730_vm5 = vcmp.eq.s32.totalorder %v1728_v21, 1  ;;  %v1988_v21 = vld [vmem:[#allocation2 + $0x2c] sm:$0xf] }
 0x1a1   : > { %v905_v10 = vpop.permute.xlu1 %904 }
 0x1a2   : > { %v893_v37 = vpop.permute.xlu0 %892  ;;  %v914_v18 = vrot.slane %v905_v10, 4 }
 0x1a3   : > { %1508 = vmatmul.bf16.gmra.mxu3 %v4773_v12  ;;  %1451 = vmatmul.bf16.gmra.mxu0 %v4773_v12  ;;  %v908_v26 = vrot.slane %v893_v37, 4 }
 0x1a4   : > { %v922_v49 = vsel %vm8238_vm2, %v914_v18, %v915_v17  ;;  %vm1731_vm2 = vmpackc.low %vm1730_vm5, %vm1729_vm0  ;;  %vm8244_vm5 = vcmask 261120   ;;  %v4861_v17 = vor.u32 %v5476_v61, %v4858_v15  ;;  %v5475_v18 = vld [vmem:[#allocation3 + $0x84] sm:$0xf0]  ;;  %v1902_v15 = vld [vmem:[#allocation2 + $0xc] sm:$0xf] }
 0x1a5   : > { %v923_v27 = vsel %vm8239_vm8, %v905_v10, %v922_v49  ;;  %v5483_v54 = vld [vmem:[#allocation3 + $0xc4] sm:$0xf0]  ;;  %v4882_v56 = vld [vmem:[#allocation3 + $0xc8] sm:$0xf0]  ;;  %v6547_v19 = vsel %vm1731_vm2, 65537, %v5831_v0  ;;  %vm8241_vm8 = vmmov %vm8240_vm14  ;;  %v4857_v10 = vor.u32 %v5477_v11, %v4856_v60 }
 0x1a6   : > { %931 = vst [vmem:[#allocation3 + $0xb8] sm:$0xff] %v923_v27  ;;  %v4881_v20 = vor.u32 %v5483_v54, %v4880_v33  ;;  %v4885_v16 = vor.u32 %v5482_v30, %v4882_v56  ;;  %v4872_v46 = vld [vmem:[#allocation3 + $0xb0] sm:$0xf]  ;;  %1909 = vrot.lane.b32.xlu0 %v6547_v19, %s5843_s24  ;;  %v5480_v55 = vld [vmem:[#allocation3 + $0xb4] sm:$0xf]  ;;  %vm8243_vm0 = vmmov %vm8242_vm15  ;;  %1733 = vrot.lane.b32.xlu2 %v6547_v19, %s5845_s14 }
 0x1a7   : > { %v5474_v49 = vld [vmem:[#allocation3 + $0x84] sm:$0xf]  ;;  %v4850_v33 = vld [vmem:[#allocation3 + $0x88] sm:$0xf0]  ;;  %v4762_v54 = vld [vmem:[%s8094_s2 + $0xc] sm:$0xf0] }
 0x1a8   : > { %1460 = vmatpush.bf16.msra.mxu1 %v4881_v20  ;;  %1517 = vmatpush.bf16.msrb.mxu2 %v4885_v16  ;;  %v4853_v50 = vor.u32 %v5474_v49, %v4850_v33  ;;  %v5452_v27 = vld [vmem:[%s8094_s2 + $0x4] sm:$0xf] }
 0x1a9   : > { %v895_v39 = vpop.permute.xlu1 %894  ;;  %v4765_v56 = vor.u32 %v5452_v27, %v4762_v54 }
 0x1aa   : > { %v899_v1 = vpop.permute.xlu0 %898  ;;  %v909_v43 = vrot.slane %v895_v39, 4 }
 0x1ab   : > { %v911_v47 = vrot.slane %v899_v1, 4  ;;  %v2072_v1 = vld [vmem:[#allocation2 + $0x3c] sm:$0xf] }
 0x1ac   : > { %v916_v63 = vsel %vm8240_vm14, %v908_v26, %v909_v43  ;;  %v2070_v26 = vld [vmem:[#allocation2 + $0x2c] sm:$0xf]  ;;  %v1990_v43 = vld [vmem:[#allocation2 + $0x3c] sm:$0xf] }
 0x1ad   : > { %v918_v53 = vsel %vm8241_vm8, %v910_v25, %v911_v47  ;;  %v917_v41 = vsel %vm8242_vm15, %v893_v37, %v916_v63  ;;  %v5481_v31 = vld [vmem:[#allocation3 + $0xb4] sm:$0xf0]  ;;  %v4874_v22 = vld [vmem:[#allocation3 + $0xb8] sm:$0xf0]  ;;  %vm8245_vm15 = vmmov %vm8244_vm5 }
 0x1ae   : > { %v919_v34 = vsel %vm8243_vm0, %v897_v45, %v918_v53  ;;  %928 = vst [vmem:[#allocation3 + $0xa0] sm:$0xff] %v917_v41  ;;  %v4873_v57 = vor.u32 %v5481_v31, %v4872_v46  ;;  %v4877_v0 = vor.u32 %v5480_v55, %v4874_v22  ;;  %v4774_v45 = vld [vmem:[%s8094_s2 + $0x24] sm:$0xf0]  ;;  %2091 = vrot.lane.b32.xlu0 %v2070_v26, %s5842_s17  ;;  %v2066_v47 = vld [vmem:[#allocation2 + $0xc] sm:$0xf] }
 0x1af   : > { %929 = vst [vmem:[#allocation3 + $0xa8] sm:$0xff] %v919_v34  ;;  %v4777_v39 = vor.u32 %v5455_v51, %v4774_v45  ;;  %2095 = vrot.lane.b32.xlu2 %v2072_v1, %s5842_s17  ;;  %v1984_v31 = vld [vmem:[#allocation2 + $0xc] sm:$0xf]  ;;  %v1986_v55 = vld [vmem:[#allocation2 + $0x1c] sm:$0xf] }
 0x1b0   : > { %1461 = vmatpush.bf16.msra.mxu1 %v4873_v57  ;;  %1518 = vmatpush.bf16.msrb.mxu2 %v4877_v0 }
 0x1b1   : > { %v6555_v58 = vpop.permute.xlu1 %1213 }
 0x1b3   : > { %4928 = vmatmul.msk.bf16.vlgmr.msrb.gmra.mxu0 %vm8244_vm5, %v6497_v38  ;;  %v4848_v38 = vld [vmem:[#allocation3 + $0x80] sm:$0xf] }
 0x1b4   : > { %v4849_v30 = vor.u32 %v5475_v18, %v4848_v38 }
 0x1b5   : > { %v4864_v3 = vld [vmem:[#allocation3 + $0xa0] sm:$0xf]  ;;  %v5478_v7 = vld [vmem:[#allocation3 + $0xa4] sm:$0xf] }
 0x1b6   : > { %v5479_v13 = vld [vmem:[#allocation3 + $0xa4] sm:$0xf0]  ;;  %v4866_v14 = vld [vmem:[#allocation3 + $0xa8] sm:$0xf0] }
 0x1b7   : > { %v4865_v5 = vor.u32 %v5479_v13, %v4864_v3  ;;  %v4869_v12 = vor.u32 %v5478_v7, %v4866_v14  ;;  %2083 = vrot.lane.b32.xlu2 %v2066_v47, %s5842_s17  ;;  %v1904_v3 = vld [vmem:[#allocation2 + $0x1c] sm:$0xf] }
 0x1b9   : > { %1462 = vmatpush.bf16.msra.mxu1 %v4865_v5  ;;  %1519 = vmatpush.bf16.msrb.mxu2 %v4869_v12  ;;  %v6562_v37 = vpop.permute.xlu1 %1208  ;;  %v1906_v12 = vld [vmem:[#allocation2 + $0x2c] sm:$0xf] }
 0x1bd   : > { %1463 = vmatpush.bf16.msra.mxu1 %v4857_v10  ;;  %1520 = vmatpush.bf16.msrb.mxu2 %v4861_v17 }
 0x1c1   : > { %1464 = vmatpush.bf16.msra.mxu1 %v4849_v30  ;;  %1521 = vmatpush.bf16.msrb.mxu2 %v4853_v50  ;;  %v6572_v4 = vpop.permute.xlu1 %1991 }
 0x1c2   : > { %v6575_v20 = vrot.slane %v6572_v4, 4 }
 0x1c3   : > { %4929 = vmatmul.msk.bf16.gmra.mxu0 %vm8245_vm15, %v6520_v28 }
 0x1c4   : > { %1465 = vmatmul.bf16.vlgmr.msra.gmra.mxu1 %v4765_v56  ;;  %1522 = vmatmul.bf16.vlgmr.msrb.gmra.mxu2 %v4765_v56  ;;  %v2002_v16 = vunpack.c.l.b16 %v6575_v20  ;;  %v2003_v32 = vunpack.c.h.b16 %v6575_v20 }
 0x1c6   : > { %vm2006_vm2 = vcmp.ne.s32.totalorder %v2002_v16, %v6105_v35  ;;  %vm2007_vm14 = vcmp.ne.s32.totalorder %v2003_v32, %v6108_v36 }
 0x1c7   : > { %vm6585_vm8 = vmpackc.low %vm2007_vm14, %vm2006_vm2  ;;  %vm8143_vm2 = vcmask 801792   ;;  %vm8148_vm14 = vcmask 1031168  }
 0x1c8   : > { %v2014_v28 = vsel %vm6585_vm8, %v1988_v21, 0  ;;  %v2016_v25 = vsel %vm6585_vm8, %v1990_v43, 0  ;;  %v2010_v22 = vsel %vm6585_vm8, %v1984_v31, 0  ;;  %v2012_v34 = vsel %vm6585_vm8, %v1986_v55, 0 }
 0x1c9   : > { %2035 = vrot.lane.b32.xlu1 %v2014_v28, %s5845_s14  ;;  %2039 = vrot.lane.b32.xlu0 %v2016_v25, %s5845_s14 }
 0x1d1   : > { %2130 = vrot.lane.b32.xlu1 %v6547_v19, %s5846_s15  ;;  %2031 = vrot.lane.b32.xlu0 %v2012_v34, %s5845_s14 }
 0x1d4   : > { %1470 = vmatmul.bf16.gmra.mxu1 %v4777_v39  ;;  %1527 = vmatmul.bf16.gmra.mxu2 %v4777_v39 }
 0x1d9   : > { %2027 = vrot.lane.b32.xlu1 %v2010_v22, %s5845_s14 }
 0x1eb   : > { %v6623_v14 = vpop.permute.xlu2 %1218 }
 0x1ec   : > { %v1204_v63 = vpop.permute.xlu0 %1203 }
 0x1f4   : > { %v1818_v18 = vpop.permute.xlu2 %1817 }
 0x1f5   : > { %v1819_v1 = vrot.slane %v1818_v18, 4 }
 0x1f7   : > { %v1829_v31 = vunpack.c.l.b16 %v1819_v1 }
 0x200   : > { %v1734_v56 = vpop.permute.xlu2 %1733 }
 0x201   : > { %v6633_v21 = vrot.slane %v1734_v56, 4 }
 0x203   : > { %v1737_v43 = vsel %vm8143_vm2, %v6633_v21, %v1734_v56 }
 0x204   : > { %v1738_v34 = vunpack.c.l.b16 %v1737_v43 }
 0x206   : > { %vm1742_vm2 = vcmp.ne.s32.totalorder %v1738_v34, %v6105_v35  ;;  %v1746_v34 = vunpack.c.h.b16 %v6633_v21 }
 0x207   : > { %v1485_v53 = vpop.f32.mrf.mxu2 }
 0x20f   : > { %v1487_v61 = vpop.f32.mrf.mxu2 }
 0x210   : > { %v1447_v46 = vpop.f32.mrf.mxu0 }
 0x211   : > { %v1448_v50 = vadd.f32 %v1447_v46, %v1204_v63 }
 0x216   : > { %v1504_v49 = vpop.f32.mrf.mxu3 }
 0x217   : > { %v6625_v10 = vpop.f32.mrf.mxu2  ;;  %v1505_v16 = vadd.f32 %v1504_v49, %v1204_v63  ;;  %v1830_v63 = vunpack.c.h.b16 %v1819_v1 }
 0x218   : > { %v6606_v19 = vpop.permute.xlu0 %1909  ;;  %v1449_v60 = vpop.f32.mrf.mxu0 }
 0x219   : > { %v6609_v41 = vrot.slane %v6606_v19, 4  ;;  %v1450_v39 = vadd.f32 %v1449_v60, %v6562_v37 }
 0x21b   : > { %v1920_v57 = vunpack.c.l.b16 %v6609_v41  ;;  %v1921_v0 = vunpack.c.h.b16 %v6609_v41 }
 0x21d   : > { %vm1924_vm0 = vcmp.ne.s32.totalorder %v1920_v57, %v6105_v35  ;;  %vm1925_vm5 = vcmp.ne.s32.totalorder %v1921_v0, %v6108_v36  ;;  %v1739_v57 = vunpack.c.h.b16 %v1737_v43 }
 0x21e   : > { %vm1926_vm15 = vmpackc.low %vm1925_vm5, %vm1924_vm0  ;;  %v1506_v51 = vpop.f32.mrf.mxu3  ;;  %vm8149_vm0 = vcmask 244736   ;;  %vm1833_vm5 = vcmp.ne.s32.totalorder %v1829_v31, %v6105_v35 }
 0x21f   : > { %v1934_v7 = vsel %vm1926_vm15, %v1908_v62, 0  ;;  %v1930_v11 = vsel %vm1926_vm15, %v1904_v3, 0  ;;  %v1928_v5 = vsel %vm1926_vm15, %v1902_v15, 0  ;;  %v1932_v17 = vsel %vm1926_vm15, %v1906_v12, 0  ;;  %v6631_v33 = vpop.f32.mrf.mxu2 }
 0x220   : > { %1957 = vrot.lane.b32.xlu2 %v1934_v7, %s5844_s23  ;;  %1949 = vrot.lane.b32.xlu1 %v1930_v11, %s5844_s23  ;;  %v1452_v13 = vpop.f32.mrf.mxu0  ;;  %v1507_v22 = vadd.f32 %v1506_v51, %v6562_v37  ;;  %vm1834_vm15 = vcmp.ne.s32.totalorder %v1830_v63, %v6108_v36  ;;  %v1821_v37 = vsel %vm8148_vm14, %v1819_v1, %v1818_v18 }
 0x221   : > { %1953 = vrot.lane.b32.xlu0 %v1932_v17, %s5844_s23  ;;  %v1453_v3 = vadd.f32 %v1452_v13, %v6555_v58  ;;  %vm1743_vm8 = vcmp.ne.s32.totalorder %v1739_v57, %v6108_v36  ;;  %v1912_v15 = vsel %vm8248_vm9, %v6609_v41, %v6606_v19  ;;  %v1994_v13 = vsel %vm8149_vm0, %v6575_v20, %v6572_v4  ;;  %vm6656_vm12 = vmpackc.low %vm1834_vm15, %vm1833_vm5 }
 0x222   : > { %v1822_v18 = vunpack.c.l.b16 %v1821_v37  ;;  %vm6660_vm14 = vmpackc.low %vm1743_vm8, %vm1742_vm2  ;;  %v1913_v41 = vunpack.c.l.b16 %v1912_v15  ;;  %v1995_v4 = vunpack.c.l.b16 %v1994_v13  ;;  %v1996_v20 = vunpack.c.h.b16 %v1994_v13 }
 0x224   : > { %vm6679_vm9 = vcmp.ne.s32.totalorder %v1822_v18, %v6105_v35  ;;  %vm1917_vm8 = vcmp.ne.s32.totalorder %v1913_v41, %v6105_v35  ;;  %vm6695_vm15 = vcmp.ne.s32.totalorder %v1995_v4, %v6105_v35  ;;  %vm2000_vm0 = vcmp.ne.s32.totalorder %v1996_v20, %v6108_v36 }
 0x228   : > { %1945 = vrot.lane.b32.xlu2 %v1928_v5, %s5844_s23  ;;  %v6629_v38 = vpop.f32.mrf.mxu0 }
 0x229   : > { %v1455_v1 = vadd.f32 %v6629_v38, %v6623_v14 }
 0x230   : > { %v1542_v27 = vpop.f32.mrf.mxu0 }
 0x238   : > { %v1544_v55 = vpop.f32.mrf.mxu0 }
 0x241   : > { %v1466_v30 = vpop.f32.mrf.mxu1 }
 0x242   : > { %v1467_v54 = vadd.f32 %v1466_v30, %v1448_v50  ;;  %v1823_v30 = vunpack.c.h.b16 %v1821_v37  ;;  %v1547_v50 = vpop.f32.mrf.mxu0 }
 0x244   : > { %v1486_v52 = vadd.f32 %v1485_v53, %v1467_v54  ;;  %v1914_v54 = vunpack.c.h.b16 %v1912_v15  ;;  %vm6684_vm2 = vcmp.ne.s32.totalorder %v1823_v30, %v6108_v36 }
 0x245   : > { %vm6704_vm6 = vmpackc.low %vm6684_vm2, %vm6679_vm9  ;;  %vm1750_vm2 = vcmp.ne.s32.totalorder %v1746_v34, %v6108_v36 }
 0x246   : > { %v1552_v25 = vmax.f32 %v1486_v52, 0.0  ;;  %vm1918_vm5 = vcmp.ne.s32.totalorder %v1914_v54, %v6108_v36  ;;  %vm6722_vm9 = vmpackc.low %vm2000_vm0, %vm6695_vm15 }
 0x247   : > { %v1523_v32 = vpop.f32.mrf.mxu2  ;;  %vm6710_vm13 = vmpackc.low %vm1918_vm5, %vm1917_vm8 }
 0x248   : > { %v1524_v28 = vadd.f32 %v1523_v32, %v1505_v16 }
 0x249   : > { %v1468_v45 = vpop.f32.mrf.mxu1 }
 0x24a   : > { %v1543_v26 = vadd.f32 %v1542_v27, %v1524_v28  ;;  %v1469_v46 = vadd.f32 %v1468_v45, %v1450_v39 }
 0x24c   : > { %v1553_v47 = vmax.f32 %v1543_v26, 0.0  ;;  %v1488_v60 = vadd.f32 %v1487_v61, %v1469_v46  ;;  %v1509_v61 = vpop.f32.mrf.mxu3 }
 0x24d   : > { %v1510_v19 = vadd.f32 %v1509_v61, %v6555_v58 }
 0x24e   : > { %v6639_v53 = vpack.c.bf16 %v1553_v47, %v1552_v25  ;;  %v1554_v5 = vmax.f32 %v1488_v60, 0.0  ;;  %v6803_v47 = vpop.permute.xlu2 %2095 }
 0x24f   : > { %v1525_v0 = vpop.f32.mrf.mxu2 }
 0x250   : > { %1564 = vst [vmem:[#allocation2 + $0x4] sm:$0xff] %v6639_v53  ;;  %v1526_v62 = vadd.f32 %v1525_v0, %v1507_v22  ;;  %2081 = vrot.lane.b32.xlu1 %v6639_v53, %s5842_s17  ;;  %v1745_v22 = vunpack.c.l.b16 %v6633_v21  ;;  %v1927_v61 = vsel %vm6710_vm13, %v6639_v53, 0 }
 0x251   : > { %v1471_v7 = vpop.f32.mrf.mxu1 }
 0x252   : > { %v1545_v11 = vadd.f32 %v1544_v55, %v1526_v62  ;;  %v1472_v17 = vadd.f32 %v1471_v7, %v1453_v3  ;;  %v1549_v7 = vpop.f32.mrf.mxu0  ;;  %vm1749_vm0 = vcmp.ne.s32.totalorder %v1745_v22, %v6105_v35 }
 0x253   : > { %vm6740_vm8 = vmpackc.low %vm1750_vm2, %vm1749_vm0 }
 0x254   : > { %v1555_v12 = vmax.f32 %v1545_v11, 0.0  ;;  %v1491_v28 = vadd.f32 %v6625_v10, %v1472_v17  ;;  %v1511_v46 = vpop.f32.mrf.mxu3 }
 0x255   : > { %v1512_v0 = vadd.f32 %v1511_v46, %v6623_v14  ;;  %v2009_v14 = vsel %vm6722_vm9, %v6639_v53, 0 }
 0x256   : > { %v6665_v56 = vpack.c.bf16 %v1555_v12, %v1554_v5  ;;  %v1556_v31 = vmax.f32 %v1491_v28, 0.0  ;;  %v6817_v22 = vpop.permute.xlu2 %2083 }
 0x257   : > { %v1528_v16 = vpop.f32.mrf.mxu2  ;;  %v6667_v32 = vld [vmem:[#allocation2] sm:$0xff]  ;;  %v1810_v52 = vld [vmem:[#allocation2 + $0x8] sm:$0xf] }
 0x258   : > { %1565 = vst [vmem:[#allocation2 + $0x14] sm:$0xff] %v6665_v56  ;;  %v1529_v51 = vadd.f32 %v1528_v16, %v1510_v19  ;;  %1677 = vrot.lane.b32.xlu2 %v6667_v32, %s5847_s20  ;;  %v1837_v58 = vsel %vm6656_vm12, %v1810_v52, 0  ;;  %v1752_v45 = vsel %vm6660_vm14, %v6667_v32, 0  ;;  %v1893_v25 = vld [vmem:[#allocation2 + $0x4] sm:$0xff]  ;;  %v1836_v3 = vsel %vm6704_vm6, %v6667_v32, 0 }
 0x259   : > { %v1473_v26 = vpop.f32.mrf.mxu1  ;;  %1854 = vrot.lane.b32.xlu0 %v1837_v58, %s5843_s24  ;;  %1768 = vrot.lane.b32.xlu1 %v1752_v45, %s5840_s21  ;;  %1897 = vst [vmem:[#allocation3 + $0x80] sm:$0xff] %v1893_v25  ;;  %v1719_v12 = vld [vmem:[#allocation2 + $0x8] sm:$0xf]  ;;  %v1929_v58 = vsel %vm6710_vm13, %v6665_v56, 0 }
 0x25a   : > { %v1548_v43 = vadd.f32 %v1547_v50, %v1529_v51  ;;  %v1474_v63 = vadd.f32 %v1473_v26, %v1455_v1  ;;  %v1753_v50 = vsel %vm6740_vm8, %v1719_v12, 0  ;;  %v2011_v51 = vsel %vm6722_vm9, %v6665_v56, 0  ;;  %v6849_v12 = vpop.permute.xlu0 %2091  ;;  %v1662_v57 = vld [vmem:[#allocation2 + $0x8] sm:$0xf] }
 0x25c   : > { %v1557_v55 = vmax.f32 %v1548_v43, 0.0  ;;  %v1493_v21 = vadd.f32 %v6631_v33, %v1474_v63  ;;  %v1586_v43 = vpop.permute.xlu1 %1585 }
 0x25e   : > { %v6715_v60 = vpack.c.bf16 %v1557_v55, %v1556_v31  ;;  %v1558_v13 = vmax.f32 %v1493_v21, 0.0  ;;  %v1587_v55 = vrot.slane %v1586_v43, 4 }
 0x25f   : > { %v1530_v62 = vpop.f32.mrf.mxu2  ;;  %v1894_v15 = vld [vmem:[#allocation2 + $0x14] sm:$0xff] }
 0x260   : > { %1566 = vst [vmem:[#allocation2 + $0x24] sm:$0xff] %v6715_v60  ;;  %v1531_v11 = vadd.f32 %v1530_v62, %v1512_v0  ;;  %1852 = vrot.lane.b32.xlu2 %v1836_v3, %s5843_s24  ;;  %v6744_v18 = vld [vmem:[#allocation2 + $0x10] sm:$0xff]  ;;  %v1812_v4 = vld [vmem:[#allocation2 + $0x18] sm:$0xf]  ;;  %v1931_v46 = vsel %vm6710_vm13, %v6715_v60, 0  ;;  %v2013_v31 = vsel %vm6722_vm9, %v6715_v60, 0  ;;  %v1597_v62 = vunpack.c.l.b16 %v1587_v55 }
 0x261   : > { %2025 = vrot.lane.b32.xlu0 %v2009_v14, %s5845_s14  ;;  %1943 = vrot.lane.b32.xlu1 %v1927_v61, %s5844_s23  ;;  %1899 = vst [vmem:[#allocation3 + $0x90] sm:$0xff] %v6715_v60  ;;  %v1838_v19 = vsel %vm6704_vm6, %v6744_v18, 0  ;;  %v1721_v20 = vld [vmem:[#allocation2 + $0x18] sm:$0xf]  ;;  %v1839_v16 = vsel %vm6656_vm12, %v1812_v4, 0  ;;  %v1754_v52 = vsel %vm6660_vm14, %v6744_v18, 0  ;;  %v1598_v3 = vunpack.c.h.b16 %v1587_v55 }
 0x262   : > { %v1550_v33 = vadd.f32 %v1549_v7, %v1531_v11  ;;  %1898 = vst [vmem:[#allocation3 + $0x88] sm:$0xff] %v1894_v15  ;;  %v1755_v28 = vsel %vm6740_vm8, %v1721_v20, 0  ;;  %vm1601_vm5 = vcmp.ne.s32.totalorder %v1597_v62, %v6105_v35  ;;  %v1664_v17 = vld [vmem:[#allocation2 + $0x18] sm:$0xf] }
 0x263   : > { %vm1602_vm15 = vcmp.ne.s32.totalorder %v1598_v3, %v6108_v36 }
 0x264   : > { %v1559_v5 = vmax.f32 %v1550_v33, 0.0  ;;  %v6815_v63 = vpop.permute.xlu1 %2087  ;;  %vm6839_vm0 = vmpackc.low %vm1602_vm15, %vm1601_vm5 }
 0x266   : > { %v6746_v30 = vpack.c.bf16 %v1559_v5, %v1558_v13 }
 0x267   : > { %v1666_v45 = vld [vmem:[#allocation2 + $0x28] sm:$0xf]  ;;  %v6786_v10 = vld [vmem:[#allocation2 + $0x20] sm:$0xff] }
 0x268   : > { %1567 = vst [vmem:[#allocation2 + $0x34] sm:$0xff] %v6746_v30  ;;  %1770 = vrot.lane.b32.xlu2 %v1753_v50, %s5840_s21  ;;  %v2015_v41 = vsel %vm6722_vm9, %v6746_v30, 0  ;;  %v1933_v54 = vsel %vm6710_vm13, %v6746_v30, 0  ;;  %v1814_v39 = vld [vmem:[#allocation2 + $0x28] sm:$0xf]  ;;  %v1756_v1 = vsel %vm6660_vm14, %v6786_v10, 0 }
 0x269   : > { %2085 = vrot.lane.b32.xlu0 %v6665_v56, %s5842_s17  ;;  %1856 = vrot.lane.b32.xlu1 %v1838_v19, %s5843_s24  ;;  %1900 = vst [vmem:[#allocation3 + $0x98] sm:$0xff] %v6746_v30  ;;  %v1841_v26 = vsel %vm6656_vm12, %v1814_v39, 0  ;;  %v1840_v25 = vsel %vm6704_vm6, %v6786_v10, 0  ;;  %v1723_v0 = vld [vmem:[#allocation2 + $0x28] sm:$0xf]  ;;  %vm1645_vm13 = vcmask 277504  }
 0x26a   : > { %v1757_v7 = vsel %vm6740_vm8, %v1723_v0, 0  ;;  %v1575_v14 = vld [vmem:[#allocation2 + $0x28] sm:$0xf]  ;;  %v1573_v39 = vld [vmem:[#allocation2 + $0x18] sm:$0xf] }
 0x26b   : > { %v1609_v13 = vsel %vm6839_vm0, %v1575_v14, 0 }
 0x26c   : > { %v6830_v11 = vpop.permute.xlu1 %2035 }
 0x26f   : > { %v6819_v34 = vld [vmem:[#allocation2 + $0x30] sm:$0xff]  ;;  %v1668_v15 = vld [vmem:[#allocation2 + $0x38] sm:$0xf] }
 0x270   : > { %1858 = vrot.lane.b32.xlu2 %v1839_v16, %s5843_s24  ;;  %v1758_v21 = vsel %vm6660_vm14, %v6819_v34, 0  ;;  %v1842_v33 = vsel %vm6704_vm6, %v6819_v34, 0  ;;  %vm8154_vm14 = vcmask 769024   ;;  %v1816_v38 = vld [vmem:[#allocation2 + $0x38] sm:$0xf] }
 0x271   : > { %1772 = vrot.lane.b32.xlu0 %v1754_v52, %s5840_s21  ;;  %1774 = vrot.lane.b32.xlu1 %v1755_v28, %s5840_s21  ;;  %v1589_v5 = vsel %vm8154_vm14, %v1587_v55, %v1586_v43  ;;  %v1843_v20 = vsel %vm6656_vm12, %v1816_v38, 0  ;;  %v1725_v37 = vld [vmem:[#allocation2 + $0x38] sm:$0xf]  ;;  %v6874_v52 = vpop.permute.xlu0 %2039  ;;  %v1607_v43 = vsel %vm6839_vm0, %v1573_v39, 0  ;;  %vm8285_vm14 = vcmask 1031168  }
 0x272   : > { %v1590_v50 = vunpack.c.l.b16 %v1589_v5  ;;  %v1591_v19 = vunpack.c.h.b16 %v1589_v5  ;;  %v1759_v28 = vsel %vm6740_vm8, %v1725_v37, 0  ;;  %v1577_v55 = vld [vmem:[#allocation2 + $0x38] sm:$0xf]  ;;  %v1571_v5 = vld [vmem:[#allocation2 + $0x8] sm:$0xf] }
 0x274   : > { %v2131_v4 = vpop.permute.xlu1 %2130  ;;  %vm1594_vm6 = vcmp.ne.s32.totalorder %v1590_v50, %v6105_v35  ;;  %vm1595_vm2 = vcmp.ne.s32.totalorder %v1591_v19, %v6108_v36  ;;  %v2248_v50 = vld [vmem:[%s8097_s5] sm:$0xff] }
 0x275   : > { %vm6868_vm9 = vmpackc.low %vm1595_vm2, %vm1594_vm6  ;;  %vm2106_vm2 = vcmask 785408  }
 0x278   : > { %2029 = vrot.lane.b32.xlu2 %v2011_v51, %s5845_s14  ;;  %v2132_v51 = vrot.slane %v2131_v4, 4 }
 0x279   : > { %1947 = vrot.lane.b32.xlu0 %v1929_v58, %s5844_s23  ;;  %1687 = vrot.lane.b32.xlu1 %v1666_v45, %s5847_s20 }
 0x27a   : > { %v6834_v61 = vpop.permute.xlu2 %1957  ;;  %v2133_v45 = vsel %vm1645_vm13, %v2132_v51, %v2131_v4  ;;  %v2141_v0 = vunpack.c.l.b16 %v2132_v51  ;;  %v2142_v62 = vunpack.c.h.b16 %v2132_v51  ;;  %v1605_v4 = vsel %vm6839_vm0, %v1571_v5, 0  ;;  %v2127_v51 = vld [vmem:[#allocation2 + $0x2c] sm:$0xf] }
 0x27c   : > { %v6872_v49 = vpop.permute.xlu1 %2027  ;;  %vm2145_vm15 = vcmp.ne.s32.totalorder %v2141_v0, %v6105_v35  ;;  %vm2146_vm6 = vcmp.ne.s32.totalorder %v2142_v62, %v6108_v36 }
 0x27d   : > { %v2042_v62 = vrot.slane %v6872_v49, 4 }
 0x280   : > { %2089 = vrot.lane.b32.xlu2 %v6715_v60, %s5842_s17 }
 0x281   : > { %1685 = vrot.lane.b32.xlu0 %v6786_v10, %s5847_s20  ;;  %1862 = vrot.lane.b32.xlu1 %v1841_v26, %s5843_s24  ;;  %v2134_v26 = vunpack.c.l.b16 %v2133_v45 }
 0x282   : > { %v6858_v16 = vpop.permute.xlu2 %1945 }
 0x283   : > { %vm2138_vm12 = vcmp.ne.s32.totalorder %v2134_v26, %v6105_v35  ;;  %v1606_v35 = vsel %vm6868_vm9, %v6744_v18, 0 }
 0x288   : > { %1776 = vrot.lane.b32.xlu2 %v1756_v1, %s5840_s21  ;;  %v2135_v1 = vunpack.c.h.b16 %v2133_v45 }
 0x289   : > { %1860 = vrot.lane.b32.xlu0 %v1840_v25, %s5843_s24  ;;  %2093 = vrot.lane.b32.xlu1 %v6746_v30, %s5842_s17  ;;  %s8333_s17 = smov 1  }
 0x28a   : > { %vm2139_vm8 = vcmp.ne.s32.totalorder %v2135_v1, %v6108_v36 }
 0x28b   : > { %vm6904_vm5 = vmpackc.low %vm2139_vm8, %vm2138_vm12  ;;  %vm8273_vm12 = vcmask 1043456  }
 0x28c   : > { %vm6922_vm8 = vmpackc.low %vm2146_vm6, %vm2145_vm15  ;;  %vm8279_vm6 = vcmask 244736  }
 0x28d   : > { %v2153_v1 = vsel %vm6922_vm8, %v2127_v51, 0 }
 0x290   : > { %1951 = vrot.lane.b32.xlu2 %v1931_v46, %s5844_s23  ;;  %v6895_v46 = vpop.permute.xlu0 %2031 }
 0x291   : > { %2033 = vrot.lane.b32.xlu0 %v2013_v31, %s5845_s14  ;;  %1681 = vrot.lane.b32.xlu1 %v6744_v18, %s5847_s20  ;;  %v2250_v18 = vld [vmem:[%s8097_s5 + $0x10] sm:$0xff] }
 0x292   : > { %v6893_v25 = vpop.permute.xlu1 %1949 }
 0x298   : > { %1689 = vrot.lane.b32.xlu2 %v6819_v34, %s5847_s20  ;;  %v6915_v14 = vpop.permute.xlu0 %1953 }
 0x299   : > { %1778 = vrot.lane.b32.xlu0 %v1757_v7, %s5840_s21  ;;  %1780 = vrot.lane.b32.xlu1 %v1758_v21, %s5840_s21  ;;  %v1611_v7 = vsel %vm6839_vm0, %v1577_v55, 0  ;;  %v2154_v21 = vsel %vm6904_vm5, %v6746_v30, 0  ;;  %v2123_v30 = vld [vmem:[#allocation2 + $0xc] sm:$0xf]  ;;  %vm8276_vm0 = vmmov %vm8273_vm12 }
 0x29a   : > { %v2149_v36 = vsel %vm6922_vm8, %v2123_v30, 0  ;;  %vm8277_vm15 = vmmov %vm8276_vm0 }
 0x2a0   : > { %1864 = vrot.lane.b32.xlu2 %v1842_v33, %s5843_s24 }
 0x2a1   : > { %1691 = vrot.lane.b32.xlu0 %v1668_v15, %s5847_s20  ;;  %1630 = vrot.lane.b32.xlu1 %v1609_v13, %s5846_s15  ;;  %v2098_v15 = vrot.slane %v6817_v22, 4 }
 0x2a8   : > { %2037 = vrot.lane.b32.xlu2 %v2015_v41, %s5845_s14  ;;  %s8337_s14 = smov 17  }
 0x2a9   : > { %1866 = vrot.lane.b32.xlu0 %v1843_v20, %s5843_s24  ;;  %1955 = vrot.lane.b32.xlu1 %v1933_v54, %s5844_s23  ;;  %v1604_v54 = vsel %vm6868_vm9, %v6667_v32, 0  ;;  %v1608_v32 = vsel %vm6868_vm9, %v6786_v10, 0  ;;  %v1610_v10 = vsel %vm6868_vm9, %v6819_v34, 0  ;;  %vm8278_vm9 = vcmask 15360   ;;  %s8334_s24 = smov 15  }
 0x2b0   : > { %1782 = vrot.lane.b32.xlu2 %v1759_v28, %s5840_s21 }
 0x2b1   : > { %1679 = vrot.lane.b32.xlu0 %v1662_v57, %s5847_s20  ;;  %1620 = vrot.lane.b32.xlu1 %v1604_v54, %s5846_s15 }
 0x2b2   : > { %v6884_v58 = vpop.permute.xlu2 %1677 }
 0x2b8   : > { %1683 = vrot.lane.b32.xlu2 %v1664_v17, %s5847_s20  ;;  %v2152_v17 = vsel %vm6904_vm5, %v6715_v60, 0  ;;  %v1960_v60 = vrot.slane %v6858_v16, 4 }
 0x2b9   : > { %1628 = vrot.lane.b32.xlu0 %v1608_v32, %s5846_s15  ;;  %1626 = vrot.lane.b32.xlu1 %v1607_v43, %s5846_s15  ;;  %v2044_v43 = vrot.slane %v6895_v46, 4  ;;  %v2249_v46 = vld [vmem:[%s8097_s5 + $0x8] sm:$0xff] }
 0x2ba   : > { %v1853_v31 = vpop.permute.xlu2 %1852 }
 0x2bb   : > { %v1868_v28 = vrot.slane %v1853_v31, 4 }
 0x2c0   : > { %1632 = vrot.lane.b32.xlu2 %v1610_v10, %s5846_s15 }
 0x2c1   : > { %1634 = vrot.lane.b32.xlu0 %v1611_v7, %s5846_s15  ;;  %2176 = vrot.lane.b32.xlu1 %v2154_v21, %s5841_s26  ;;  %v2129_v7 = vld [vmem:[#allocation2 + $0x3c] sm:$0xf] }
 0x2c2   : > { %v1771_v34 = vpop.permute.xlu2 %1770  ;;  %v2082_v33 = vpop.permute.xlu1 %2081  ;;  %v2155_v49 = vsel %vm6922_vm8, %v2129_v7, 0 }
 0x2c3   : > { %v2097_v13 = vrot.slane %v2082_v33, 4  ;;  %v1785_v27 = vrot.slane %v1771_v34, 4 }
 0x2c5   : > { %v2105_v38 = vsel %vm8273_vm12, %v2097_v13, %v2098_v15  ;;  %vm8280_vm12 = vmmov %vm8276_vm0 }
 0x2c6   : > { %v2107_v19 = vsel %vm2106_vm2, %v2082_v33, %v2105_v38  ;;  %v2148_v38 = vsel %vm6904_vm5, %v6639_v53, 0 }
 0x2c7   : > { %2118 = vst [vmem:[#allocation3 + $0xe0] sm:$0xff] %v2107_v19  ;;  %v2102_v19 = vrot.slane %v6849_v12, 4 }
 0x2c8   : > { %1622 = vrot.lane.b32.xlu2 %v1605_v4, %s5846_s15 }
 0x2c9   : > { %1624 = vrot.lane.b32.xlu0 %v1606_v35, %s5846_s15  ;;  %2166 = vrot.lane.b32.xlu1 %v2149_v36, %s5841_s26  ;;  %s8332_s15 = smov 16  }
 0x2ca   : > { %v1859_v22 = vpop.permute.xlu2 %1858 }
 0x2cb   : > { %v1855_v20 = vpop.permute.xlu0 %1854  ;;  %v1769_v37 = vpop.permute.xlu1 %1768 }
 0x2cc   : > { %v1869_v57 = vrot.slane %v1855_v20, 4  ;;  %v1784_v54 = vrot.slane %v1769_v37, 4  ;;  %v2100_v20 = vrot.slane %v6815_v63, 4  ;;  %v2150_v63 = vsel %vm6904_vm5, %v6665_v56, 0  ;;  %v2251_v56 = vld [vmem:[%s8097_s5 + $0x18] sm:$0xff] }
 0x2ce   : > { %v1876_v45 = vsel %vm8276_vm0, %v1868_v28, %v1869_v57  ;;  %v1792_v41 = vsel %vm8277_vm15, %v1784_v54, %v1785_v27  ;;  %vm8281_vm0 = vcmask 801792   ;;  %vm8282_vm15 = vmmov %vm8280_vm12  ;;  %v2125_v54 = vld [vmem:[#allocation2 + $0x1c] sm:$0xf] }
 0x2cf   : > { %v1878_v39 = vsel %vm8278_vm9, %v1853_v31, %v1876_v45  ;;  %v1794_v26 = vsel %vm8279_vm6, %v1769_v37, %v1792_v41  ;;  %vm8283_vm9 = vmmov %vm8280_vm12  ;;  %v1871_v37 = vrot.slane %v1859_v22, 4  ;;  %v3005_v41 = vld [vmem:[#allocation2 + $0x1c] sm:$0xf] }
 0x2d0   : > { %1889 = vst [vmem:[#allocation3 + $0x60] sm:$0xff] %v1878_v39  ;;  %2172 = vrot.lane.b32.xlu2 %v2152_v17, %s5841_s26  ;;  %vm8284_vm6 = vmmov %vm8281_vm0 }
 0x2d1   : > { %2174 = vrot.lane.b32.xlu0 %v2153_v1, %s5841_s26  ;;  %1805 = vst [vmem:[#allocation3 + $0x40] sm:$0xff] %v1794_v26  ;;  %2264 = vperm.xlu1 %5695, %v2250_v18   ;;  %v2151_v18 = vsel %vm6922_vm8, %v2125_v54, 0  ;;  %vm8291_vm8 = vcmask 244736  }
 0x2d2   : > { %v2030_v32 = vpop.permute.xlu2 %2029 }
 0x2d3   : > { %v2043_v31 = vrot.slane %v2030_v32, 4  ;;  %v2026_v55 = vpop.permute.xlu0 %2025  ;;  %v1944_v0 = vpop.permute.xlu1 %1943 }
 0x2d4   : > { %v2041_v10 = vrot.slane %v2026_v55, 4  ;;  %v1959_v21 = vrot.slane %v1944_v0, 4 }
 0x2d5   : > { %v2051_v34 = vsel %vm8280_vm12, %v2043_v31, %v2044_v43  ;;  %vm8287_vm12 = vmmov %vm8283_vm9 }
 0x2d6   : > { %v2052_v33 = vsel %vm8281_vm0, %v2030_v32, %v2051_v34  ;;  %v2049_v15 = vsel %vm8282_vm15, %v2041_v10, %v2042_v62  ;;  %v1967_v13 = vsel %vm8283_vm9, %v1959_v21, %v1960_v60  ;;  %vm8288_vm0 = vmmov %vm8283_vm9  ;;  %vm8289_vm15 = vcmask 15360   ;;  %v2943_v32 = vld [vmem:[#allocation2 + $0x2c] sm:$0xf] }
 0x2d7   : > { %2062 = vst [vmem:[#allocation3 + $0xc8] sm:$0xff] %v2052_v33  ;;  %v2050_v16 = vsel %vm8284_vm6, %v2026_v55, %v2049_v15  ;;  %v1968_v5 = vsel %vm8285_vm14, %v1944_v0, %v1967_v13  ;;  %vm8286_vm14 = vmmov %vm8283_vm9  ;;  %v2951_v55 = vsel %vm6343_vm7, %v2943_v32, 0  ;;  %v1964_v60 = vrot.slane %v6915_v14, 4  ;;  %v3009_v15 = vld [vmem:[#allocation2 + $0x3c] sm:$0xf] }
 0x2d8   : > { %2061 = vst [vmem:[#allocation3 + $0xc0] sm:$0xff] %v2050_v16  ;;  %2178 = vrot.lane.b32.xlu2 %v2155_v49, %s5841_s26  ;;  %vm8290_vm5 = vmmov %vm8288_vm0  ;;  %v1962_v21 = vrot.slane %v6893_v25, 4  ;;  %vm8293_vm6 = vcmask 1031168   ;;  %v3007_v16 = vld [vmem:[#allocation2 + $0x2c] sm:$0xf] }
 0x2d9   : > { %2164 = vrot.lane.b32.xlu0 %v2148_v38, %s5841_s26  ;;  %1979 = vst [vmem:[#allocation3 + $0xa0] sm:$0xff] %v1968_v5  ;;  %2259 = vperm.xlu1 %5695, %v2249_v46   ;;  %vm8292_vm9 = vmmov %vm8288_vm0 }
 0x2da   : > { %v2090_v30 = vpop.permute.xlu2 %2089 }
 0x2db   : > { %v2101_v4 = vrot.slane %v2090_v30, 4  ;;  %v2086_v35 = vpop.permute.xlu0 %2085  ;;  %v1857_v36 = vpop.permute.xlu1 %1856 }
 0x2dc   : > { %v2099_v28 = vrot.slane %v2086_v35, 4  ;;  %v1870_v27 = vrot.slane %v1857_v36, 4 }
 0x2dd   : > { %v2110_v57 = vsel %vm8286_vm14, %v2101_v4, %v2102_v19  ;;  %vm8294_vm14 = vmmov %vm8288_vm0  ;;  %v3003_v19 = vld [vmem:[#allocation2 + $0xc] sm:$0xf]  ;;  %v2945_v4 = vld [vmem:[#allocation2 + $0x3c] sm:$0xf] }
 0x2de   : > { %v2111_v53 = vsel %vm2106_vm2, %v2090_v30, %v2110_v57  ;;  %v2108_v51 = vsel %vm8287_vm12, %v2099_v28, %v2100_v20  ;;  %v1879_v45 = vsel %vm8288_vm0, %v1870_v27, %v1871_v37  ;;  %vm8295_vm12 = vmmov %vm8293_vm6  ;;  %v2953_v20 = vsel %vm6343_vm7, %v2945_v4, 0 }
 0x2df   : > { %2120 = vst [vmem:[#allocation3 + $0xf0] sm:$0xff] %v2111_v53  ;;  %v2109_v12 = vsel %vm2106_vm2, %v2086_v35, %v2108_v51  ;;  %v1880_v22 = vsel %vm8289_vm15, %v1857_v36, %v1879_v45  ;;  %vm8296_vm15 = vcmask 261120   ;;  %v2104_v57 = vrot.slane %v6803_v47, 4  ;;  %v2941_v51 = vld [vmem:[#allocation2 + $0x1c] sm:$0xf] }
 0x2e0   : > { %2119 = vst [vmem:[#allocation3 + $0xe8] sm:$0xff] %v2109_v12  ;;  %2168 = vrot.lane.b32.xlu2 %v2150_v63, %s5841_s26 }
 0x2e1   : > { %2170 = vrot.lane.b32.xlu0 %v2151_v18, %s5841_s26  ;;  %1890 = vst [vmem:[#allocation3 + $0x68] sm:$0xff] %v1880_v22  ;;  %3024 = vrot.lane.b32.xlu1 %v3005_v41, %s8157_s27  ;;  %v2939_v41 = vld [vmem:[#allocation2 + $0xc] sm:$0xf]  ;;  %v2949_v18 = vsel %vm6343_vm7, %v2941_v51, 0  ;;  %s8304_s26 = smov 127  }
 0x2e2   : > { %v6986_v39 = vpop.permute.xlu2 %1776  ;;  %v2947_v47 = vsel %vm6343_vm7, %v2939_v41, 0 }
 0x2e3   : > { %v1773_v17 = vpop.permute.xlu0 %1772  ;;  %v1775_v26 = vpop.permute.xlu1 %1774 }
 0x2e4   : > { %v1786_v1 = vrot.slane %v1773_v17, 4  ;;  %v1787_v3 = vrot.slane %v1775_v26, 4 }
 0x2e6   : > { %v1795_v43 = vsel %vm8290_vm5, %v1786_v1, %v1787_v3  ;;  %vm8297_vm5 = vmmov %vm8288_vm0  ;;  %v2048_v1 = vrot.slane %v6874_v52, 4  ;;  %v5076_v52 = vld [vmem:[#allocation3 + $0xf0] sm:$0xf] }
 0x2e7   : > { %v1796_v31 = vsel %vm8291_vm8, %v1773_v17, %v1795_v43  ;;  %vm8298_vm8 = vmmov %vm8288_vm0 }
 0x2e8   : > { %2269 = vperm.xlu2 %5696, %v2251_v56   ;;  %1806 = vst [vmem:[#allocation3 + $0x48] sm:$0xff] %v1796_v31  ;;  %v2879_v31 = vld [vmem:[#allocation2 + $0x2c] sm:$0xf] }
 0x2e9   : > { %2254 = vperm.xlu0 %5697, %v2248_v50   ;;  %2972 = vrot.lane.b32.xlu1 %v2951_v55, %s8155_s22  ;;  %v2046_v50 = vrot.slane %v6830_v11, 4 }
 0x2ea   : > { %v1952_v0 = vpop.permute.xlu2 %1951 }
 0x2eb   : > { %v1963_v62 = vrot.slane %v1952_v0, 4  ;;  %v1948_v10 = vpop.permute.xlu0 %1947  ;;  %v1688_v7 = vpop.permute.xlu1 %1687 }
 0x2ec   : > { %v1961_v34 = vrot.slane %v1948_v10, 4  ;;  %v1698_v38 = vrot.slane %v1688_v7, 4 }
 0x2ed   : > { %v1971_v33 = vsel %vm8292_vm9, %v1963_v62, %v1964_v60  ;;  %vm8299_vm9 = vcmask 15360  }
 0x2ee   : > { %v1972_v13 = vsel %vm8293_vm6, %v1952_v0, %v1971_v33  ;;  %v1969_v46 = vsel %vm8294_vm14, %v1961_v34, %v1962_v21  ;;  %vm8301_vm6 = vcmask 801792   ;;  %vm8302_vm14 = vmmov %vm8288_vm0  ;;  %v5529_v34 = vld [vmem:[#allocation3 + $0xe4] sm:$0xf0] }
 0x2ef   : > { %1981 = vst [vmem:[#allocation3 + $0xb0] sm:$0xff] %v1972_v13  ;;  %v1970_v49 = vsel %vm8295_vm12, %v1948_v10, %v1969_v46  ;;  %vm8303_vm12 = vmmov %vm8301_vm6  ;;  %v2887_v10 = vsel %vm6383_vm1, %v2879_v31, 0  ;;  %v1788_v46 = vrot.slane %v6986_v39, 4 }
 0x2f0   : > { %1980 = vst [vmem:[#allocation3 + $0xa8] sm:$0xff] %v1970_v49  ;;  %3032 = vrot.lane.b32.xlu2 %v3009_v15, %s8157_s27 }
 0x2f1   : > { %3028 = vrot.lane.b32.xlu0 %v3007_v16, %s8157_s27 }
 0x2f2   : > { %v7007_v14 = vpop.permute.xlu2 %1689 }
 0x2f3   : > { %v1686_v25 = vpop.permute.xlu0 %1685  ;;  %v1863_v5 = vpop.permute.xlu1 %1862  ;;  %v1699_v41 = vrot.slane %v7007_v14, 4 }
 0x2f4   : > { %v1697_v30 = vrot.slane %v1686_v25, 4  ;;  %v1873_v54 = vrot.slane %v1863_v5, 4 }
 0x2f6   : > { %v1706_v35 = vsel %vm8288_vm0, %v1697_v30, %v1698_v38 }
 0x2f7   : > { %v1707_v36 = vsel %vm8296_vm15, %v1686_v25, %v1706_v35  ;;  %v5068_v25 = vld [vmem:[#allocation3 + $0xe0] sm:$0xf]  ;;  %vm8305_vm15 = vmmov %vm8288_vm0 }
 0x2f8   : > { %1716 = vst [vmem:[#allocation3 + $0x30] sm:$0xff] %v1707_v36  ;;  %3020 = vrot.lane.b32.xlu2 %v3003_v19, %s8157_s27  ;;  %v5069_v5 = vor.u32 %v5529_v34, %v5068_v25  ;;  %v5044_v25 = vld [vmem:[#allocation3 + $0xb0] sm:$0xf] }
 0x2f9   : > { %2976 = vrot.lane.b32.xlu0 %v2953_v20, %s8155_s22 }
 0x2fa   : > { %v7015_v37 = vpop.permute.xlu2 %1864 }
 0x2fb   : > { %v1861_v28 = vpop.permute.xlu0 %1860  ;;  %v2094_v27 = vpop.permute.xlu1 %2093 }
 0x2fc   : > { %v1872_v53 = vrot.slane %v1861_v28, 4  ;;  %v2103_v45 = vrot.slane %v2094_v27, 4 }
 0x2fe   : > { %v1881_v12 = vsel %vm8297_vm5, %v1872_v53, %v1873_v54  ;;  %v2112_v63 = vsel %vm8298_vm8, %v2103_v45, %v2104_v57  ;;  %vm8306_vm5 = vcmask 244736   ;;  %v5525_v57 = vld [vmem:[#allocation3 + $0xc4] sm:$0xf0] }
 0x2ff   : > { %v1882_v22 = vsel %vm8299_vm9, %v1861_v28, %v1881_v12  ;;  %v2113_v17 = vsel %vm2106_vm2, %v2094_v27, %v2112_v63  ;;  %vm8300_vm2 = vmmov %vm8288_vm0  ;;  %v5052_v27 = vld [vmem:[#allocation3 + $0xc0] sm:$0xf] }
 0x300   : > { %1891 = vst [vmem:[#allocation3 + $0x70] sm:$0xff] %v1882_v22  ;;  %2968 = vrot.lane.b32.xlu2 %v2949_v18, %s8155_s22  ;;  %vm8307_vm8 = vmmov %vm8306_vm5  ;;  %v5053_v63 = vor.u32 %v5525_v57, %v5052_v27 }
 0x301   : > { %2964 = vrot.lane.b32.xlu0 %v2947_v47, %s8155_s22  ;;  %2121 = vst [vmem:[#allocation3 + $0xf8] sm:$0xff] %v2113_v17  ;;  %vm8308_vm9 = vmmov %vm8288_vm0 }
 0x302   : > { %v2038_v26 = vpop.permute.xlu2 %2037 }
 0x303   : > { %v2047_v3 = vrot.slane %v2038_v26, 4  ;;  %v2034_v56 = vpop.permute.xlu0 %2033  ;;  %v1682_v32 = vpop.permute.xlu1 %1681 }
 0x304   : > { %v2045_v43 = vrot.slane %v2034_v56, 4  ;;  %v1695_v54 = vrot.slane %v1682_v32, 4 }
 0x305   : > { %v2055_v55 = vsel %vm8300_vm2, %v2047_v3, %v2048_v1  ;;  %vm8309_vm2 = vcmask 261120   ;;  %v1966_v3 = vrot.slane %v6834_v61, 4  ;;  %v1693_v61 = vrot.slane %v6884_v58, 4 }
 0x306   : > { %v2056_v0 = vsel %vm8301_vm6, %v2038_v26, %v2055_v55  ;;  %v2053_v60 = vsel %vm8302_vm14, %v2045_v43, %v2046_v50  ;;  %vm8310_vm6 = vmmov %vm8288_vm0 }
 0x307   : > { %2064 = vst [vmem:[#allocation3 + $0xd8] sm:$0xff] %v2056_v0  ;;  %v2054_v62 = vsel %vm8303_vm12, %v2034_v56, %v2053_v60  ;;  %vm8311_vm14 = vmmov %vm8309_vm2  ;;  %v1874_v56 = vrot.slane %v7015_v37, 4 }
 0x308   : > { %2063 = vst [vmem:[#allocation3 + $0xd0] sm:$0xff] %v2054_v62  ;;  %2908 = vrot.lane.b32.xlu2 %v2887_v10, %s8304_s26  ;;  %v5531_v7 = vld [vmem:[#allocation3 + $0xf4] sm:$0xf0]  ;;  %vm8312_vm12 = vmmov %vm8288_vm0 }
 0x309   : > { %v5077_v11 = vor.u32 %v5531_v7, %v5076_v52 }
 0x30a   : > { %v1783_v21 = vpop.permute.xlu2 %1782 }
 0x30b   : > { %v1791_v33 = vrot.slane %v1783_v21, 4  ;;  %v1779_v15 = vpop.permute.xlu0 %1778  ;;  %2507 = vmatpush.bf16.msrb.mxu3 %v5077_v11  ;;  %v1781_v13 = vpop.permute.xlu1 %1780  ;;  %v5012_v21 = vld [vmem:[#allocation3 + $0x70] sm:$0xf] }
 0x30c   : > { %v1789_v16 = vrot.slane %v1779_v15, 4  ;;  %v1790_v49 = vrot.slane %v1781_v13, 4  ;;  %v5514_v15 = vld [vmem:[#allocation3 + $0x74] sm:$0xf] }
 0x30e   : > { %v1797_v38 = vsel %vm8288_vm0, %v1788_v46, %v1789_v16  ;;  %v1799_v30 = vsel %vm8305_vm15, %v1790_v49, %v1791_v33  ;;  %v5527_v19 = vld [vmem:[#allocation3 + $0xd4] sm:$0xf0]  ;;  %vm8313_vm15 = vcmask 15360  }
 0x30f   : > { %v1798_v4 = vsel %vm8306_vm5, %v6986_v39, %v1797_v38  ;;  %v1800_v35 = vsel %vm8307_vm8, %v1781_v13, %v1799_v30  ;;  %2508 = vmatpush.bf16.msrb.mxu3 %v5069_v5  ;;  %v5060_v36 = vld [vmem:[#allocation3 + $0xd0] sm:$0xf]  ;;  %vm8314_vm5 = vcmask 1031168   ;;  %vm8315_vm8 = vmmov %vm8288_vm0  ;;  %v5513_v38 = vld [vmem:[#allocation3 + $0x64] sm:$0xf0] }
 0x310   : > { %1807 = vst [vmem:[#allocation3 + $0x50] sm:$0xff] %v1798_v4  ;;  %v5061_v20 = vor.u32 %v5527_v19, %v5060_v36  ;;  %v5006_v30 = vld [vmem:[#allocation3 + $0x68] sm:$0xf0]  ;;  %v5004_v36 = vld [vmem:[#allocation3 + $0x60] sm:$0xf] }
 0x311   : > { %1808 = vst [vmem:[#allocation3 + $0x58] sm:$0xff] %v1800_v35  ;;  %v5521_v35 = vld [vmem:[#allocation3 + $0xa4] sm:$0xf0] }
 0x312   : > { %v1684_v28 = vpop.permute.xlu2 %1683 }
 0x313   : > { %v1696_v53 = vrot.slane %v1684_v28, 4  ;;  %v1692_v51 = vpop.permute.xlu0 %1691  ;;  %2509 = vmatpush.bf16.msrb.mxu3 %v5061_v20  ;;  %v7043_v45 = vpop.permute.xlu1 %1630  ;;  %v5512_v20 = vld [vmem:[#allocation3 + $0x64] sm:$0xf] }
 0x314   : > { %v1700_v12 = vrot.slane %v1692_v51, 4  ;;  %v1641_v27 = vrot.slane %v7043_v45, 4 }
 0x315   : > { %v1704_v39 = vsel %vm8308_vm9, %v1695_v54, %v1696_v53  ;;  %vm8316_vm9 = vmmov %vm8288_vm0  ;;  %v5005_v54 = vor.u32 %v5513_v38, %v5004_v36  ;;  %v5009_v53 = vor.u32 %v5512_v20, %v5006_v30 }
 0x316   : > { %v1705_v22 = vsel %vm8309_vm2, %v1682_v32, %v1704_v39  ;;  %v1708_v18 = vsel %vm8310_vm6, %v1699_v41, %v1700_v12  ;;  %v5036_v41 = vld [vmem:[#allocation3 + $0xa0] sm:$0xf]  ;;  %vm8317_vm6 = vmmov %vm8288_vm0 }
 0x317   : > { %1715 = vst [vmem:[#allocation3 + $0x28] sm:$0xff] %v1705_v22  ;;  %v1709_v17 = vsel %vm8311_vm14, %v7007_v14, %v1708_v18  ;;  %2510 = vmatpush.bf16.msrb.mxu3 %v5053_v63  ;;  %v4996_v51 = vld [vmem:[#allocation3 + $0x50] sm:$0xf]  ;;  %v5510_v39 = vld [vmem:[#allocation3 + $0x54] sm:$0xf]  ;;  %v5037_v22 = vor.u32 %v5521_v35, %v5036_v41  ;;  %vm8318_vm14 = vmmov %vm8288_vm0 }
 0x318   : > { %1717 = vst [vmem:[#allocation3 + $0x38] sm:$0xff] %v1709_v17  ;;  %v5511_v12 = vld [vmem:[#allocation3 + $0x54] sm:$0xf0]  ;;  %v4998_v63 = vld [vmem:[#allocation3 + $0x58] sm:$0xf0] }
 0x319   : > { %v5519_v17 = vld [vmem:[#allocation3 + $0x94] sm:$0xf0]  ;;  %v5001_v45 = vor.u32 %v5510_v39, %v4998_v63 }
 0x31a   : > { %v7051_v47 = vpop.permute.xlu2 %1632 }
 0x31b   : > { %v1867_v26 = vpop.permute.xlu0 %1866  ;;  %v1956_v1 = vpop.permute.xlu1 %1955 }
 0x31c   : > { %v1875_v50 = vrot.slane %v1867_v26, 4  ;;  %v1965_v43 = vrot.slane %v1956_v1, 4 }
 0x31e   : > { %v1883_v32 = vsel %vm8312_vm12, %v1874_v56, %v1875_v50  ;;  %v1973_v31 = vsel %vm8288_vm0, %v1965_v43, %v1966_v3  ;;  %v5028_v3 = vld [vmem:[#allocation3 + $0x90] sm:$0xf]  ;;  %v5509_v56 = vld [vmem:[#allocation3 + $0x44] sm:$0xf0]  ;;  %v4990_v50 = vld [vmem:[#allocation3 + $0x48] sm:$0xf0] }
 0x31f   : > { %v1884_v55 = vsel %vm8313_vm15, %v7015_v37, %v1883_v32  ;;  %v1974_v14 = vsel %vm8314_vm5, %v1956_v1, %v1973_v31  ;;  %v4997_v1 = vor.u32 %v5511_v12, %v4996_v51  ;;  %v5029_v43 = vor.u32 %v5519_v17, %v5028_v3  ;;  %v5020_v31 = vld [vmem:[#allocation3 + $0x80] sm:$0xf]  ;;  %vm8319_vm12 = vmmov %vm8288_vm0  ;;  %v5497_v3 = vld [vmem:[%s8096_s4 + $0x1c] sm:$0xf] }
 0x320   : > { %1892 = vst [vmem:[#allocation3 + $0x78] sm:$0xff] %v1884_v55  ;;  %v5517_v55 = vld [vmem:[#allocation3 + $0x84] sm:$0xf0]  ;;  %vm8320_vm0 = vcmask 769024   ;;  %vm8321_vm15 = vmmov %vm8317_vm6 }
 0x321   : > { %1982 = vst [vmem:[#allocation3 + $0xb8] sm:$0xff] %v1974_v14  ;;  %v1642_v14 = vrot.slane %v7051_v47, 4  ;;  %vm8323_vm5 = vmmov %vm8320_vm0 }
 0x322   : > { %v1623_v0 = vpop.permute.xlu2 %1622 }
 0x323   : > { %v1637_v60 = vrot.slane %v1623_v0, 4  ;;  %v1680_v62 = vpop.permute.xlu0 %1679  ;;  %v1621_v10 = vpop.permute.xlu1 %1620 }
 0x324   : > { %v1694_v52 = vrot.slane %v1680_v62, 4  ;;  %v1636_v7 = vrot.slane %v1621_v10, 4  ;;  %v4988_v62 = vld [vmem:[#allocation3 + $0x40] sm:$0xf] }
 0x326   : > { %v1701_v11 = vsel %vm8315_vm8, %v1693_v61, %v1694_v52  ;;  %v1644_v34 = vsel %vm8316_vm9, %v1636_v7, %v1637_v60  ;;  %v4989_v7 = vor.u32 %v5509_v56, %v4988_v62  ;;  %v4946_v56 = vld [vmem:[%s8096_s4 + $0x24] sm:$0xf0]  ;;  %vm8324_vm8 = vmmov %vm8317_vm6 }
 0x327   : > { %v1703_v37 = vsel %vm8309_vm2, %v6884_v58, %v1701_v11  ;;  %v5515_v33 = vld [vmem:[#allocation3 + $0x74] sm:$0xf0]  ;;  %v5014_v13 = vld [vmem:[#allocation3 + $0x78] sm:$0xf0]  ;;  %v1646_v46 = vsel %vm1645_vm13, %v1621_v10, %v1644_v34  ;;  %v5508_v10 = vld [vmem:[#allocation3 + $0x44] sm:$0xf] }
 0x328   : > { %1714 = vst [vmem:[#allocation3 + $0x20] sm:$0xff] %v1703_v37  ;;  %v5013_v16 = vor.u32 %v5515_v33, %v5012_v21  ;;  %v5017_v49 = vor.u32 %v5514_v15, %v5014_v13  ;;  %v5523_v5 = vld [vmem:[#allocation3 + $0xb4] sm:$0xf0]  ;;  %v4993_v11 = vor.u32 %v5508_v10, %v4990_v50  ;;  %v5494_v34 = vld [vmem:[%s8096_s4 + $0x4] sm:$0xf]  ;;  %v5021_v13 = vor.u32 %v5517_v55, %v5020_v31  ;;  %vm8325_vm9 = vmmov %vm8320_vm0 }
 0x329   : > { %1657 = vst [vmem:[#allocation3] sm:$0xff] %v1646_v46  ;;  %v5045_v19 = vor.u32 %v5523_v5, %v5044_v25  ;;  %v4934_v37 = vld [vmem:[%s8096_s4 + $0xc] sm:$0xf0]  ;;  %v5507_v33 = vld [vmem:[#allocation3 + $0x34] sm:$0xf0]  ;;  %v7107_v10 = vor.u32 %v5497_v3, %v4946_v56  ;;  %vm8326_vm2 = vmmov %vm8317_vm6 }
 0x32a   : > { %v7066_v4 = vpop.permute.xlu2 %2172  ;;  %2488 = vmatpush.bf16.msrb.mxu1 %v5013_v16  ;;  %2545 = vmatpush.bf16.msra.mxu0 %v5017_v49  ;;  %v4982_v15 = vld [vmem:[#allocation3 + $0x38] sm:$0xf0]  ;;  %v4980_v25 = vld [vmem:[#allocation3 + $0x30] sm:$0xf]  ;;  %v5506_v5 = vld [vmem:[#allocation3 + $0x34] sm:$0xf]  ;;  %v7085_v30 = vor.u32 %v5494_v34, %v4934_v37 }
 0x32b   : > { %v1629_v58 = vpop.permute.xlu0 %1628  ;;  %2511 = vmatpush.bf16.msrb.mxu3 %v5045_v19  ;;  %v7068_v28 = vpop.permute.xlu1 %1626  ;;  %v4981_v19 = vor.u32 %v5507_v33, %v4980_v25  ;;  %v4985_v35 = vor.u32 %v5506_v5, %v4982_v15  ;;  %v5078_v50 = vld [vmem:[#allocation3 + $0xf8] sm:$0xf0]  ;;  %v4932_v31 = vld [vmem:[%s8096_s4] sm:$0xf]  ;;  %v5495_v55 = vld [vmem:[%s8096_s4 + $0x8] sm:$0xf0] }
 0x32c   : > { %v1640_v57 = vrot.slane %v1629_v58, 4  ;;  %v4933_v34 = vor.u32 %v5495_v55, %v4932_v31  ;;  %v5070_v37 = vld [vmem:[#allocation3 + $0xe8] sm:$0xf0]  ;;  %v5526_v25 = vld [vmem:[#allocation3 + $0xd4] sm:$0xf] }
 0x32d   : > { %v5062_v5 = vld [vmem:[#allocation3 + $0xd8] sm:$0xf0]  ;;  %v5520_v3 = vld [vmem:[#allocation3 + $0xa4] sm:$0xf]  ;;  %v5496_v31 = vld [vmem:[%s8096_s4 + $0x10] sm:$0xf0] }
 0x32e   : > { %v1649_v18 = vsel %vm8317_vm6, %v1640_v57, %v1641_v27  ;;  %2489 = vmatpush.bf16.msrb.mxu1 %v5005_v54  ;;  %2546 = vmatpush.bf16.msra.mxu0 %v5009_v53  ;;  %v5505_v27 = vld [vmem:[#allocation3 + $0x24] sm:$0xf0]  ;;  %v4974_v57 = vld [vmem:[#allocation3 + $0x28] sm:$0xf0] }
 0x32f   : > { %v1650_v26 = vsel %vm1645_vm13, %v1629_v58, %v1649_v18  ;;  %2512 = vmatpush.bf16.msrb.mxu3 %v5037_v22  ;;  %v4972_v58 = vld [vmem:[#allocation3 + $0x20] sm:$0xf]  ;;  %v5504_v36 = vld [vmem:[#allocation3 + $0x24] sm:$0xf] }
 0x330   : > { %1659 = vst [vmem:[#allocation3 + $0x10] sm:$0xff] %v1650_v26  ;;  %v4973_v53 = vor.u32 %v5505_v27, %v4972_v58  ;;  %v4977_v51 = vor.u32 %v5504_v36, %v4974_v57  ;;  %v5065_v57 = vor.u32 %v5526_v25, %v5062_v5 }
 0x332   : > { %v2179_v32 = vpop.permute.xlu2 %2178  ;;  %2490 = vmatpush.bf16.msrb.mxu1 %v4997_v1  ;;  %2547 = vmatpush.bf16.msra.mxu0 %v5001_v45 }
 0x333   : > { %v2187_v0 = vrot.slane %v2179_v32, 4  ;;  %v1635_v60 = vpop.permute.xlu0 %1634  ;;  %2513 = vmatpush.bf16.msrb.mxu3 %v5029_v43  ;;  %v2177_v61 = vpop.permute.xlu1 %2176  ;;  %v4956_v32 = vld [vmem:[#allocation3] sm:$0xf] }
 0x334   : > { %v1643_v52 = vrot.slane %v1635_v60, 4  ;;  %v2186_v21 = vrot.slane %v2177_v61, 4  ;;  %v5500_v60 = vld [vmem:[#allocation3 + $0x4] sm:$0xf] }
 0x336   : > { %v1651_v46 = vsel %vm8318_vm14, %v1642_v14, %v1643_v52  ;;  %2491 = vmatpush.bf16.msrb.mxu1 %v4989_v7  ;;  %2548 = vmatpush.bf16.msra.mxu0 %v4993_v11  ;;  %v2194_v16 = vsel %vm8319_vm12, %v2186_v21, %v2187_v0  ;;  %v5530_v7 = vld [vmem:[#allocation3 + $0xf4] sm:$0xf]  ;;  %vm8328_vm14 = vcmask 261120  }
 0x337   : > { %v1652_v49 = vsel %vm1645_vm13, %v7051_v47, %v1651_v46  ;;  %v2195_v38 = vsel %vm8320_vm0, %v2177_v61, %v2194_v16  ;;  %2514 = vmatpush.bf16.msrb.mxu3 %v5021_v13  ;;  %v1639_v47 = vrot.slane %v7068_v28, 4  ;;  %v4964_v12 = vld [vmem:[#allocation3 + $0x10] sm:$0xf]  ;;  %v5502_v22 = vld [vmem:[#allocation3 + $0x14] sm:$0xf]  ;;  %v2184_v28 = vrot.slane %v7066_v4, 4  ;;  %vm8329_vm12 = vmmov %vm8328_vm14 }
 0x338   : > { %1660 = vst [vmem:[#allocation3 + $0x18] sm:$0xff] %v1652_v49  ;;  %v5081_v21 = vor.u32 %v5530_v7, %v5078_v50  ;;  %v5528_v13 = vld [vmem:[#allocation3 + $0xe4] sm:$0xf]  ;;  %v5030_v50 = vld [vmem:[#allocation3 + $0x98] sm:$0xf0] }
 0x339   : > { %2203 = vst [vmem:[#allocation3 + $0x118] sm:$0xff] %v2195_v38  ;;  %v5073_v46 = vor.u32 %v5528_v13, %v5070_v37  ;;  %v4952_v37 = vld [vmem:[%s8096_s4 + $0x20] sm:$0xf] }
 0x33a   : > { %2492 = vmatpush.bf16.msrb.mxu1 %v4981_v19  ;;  %2549 = vmatpush.bf16.msra.mxu0 %v4985_v35  ;;  %v2169_v27 = vpop.permute.xlu2 %2168 }
 0x33b   : > { %v1625_v20 = vpop.permute.xlu0 %1624  ;;  %2515 = vmatmul.bf16.vlgmr.msrb.gmra.mxu3 %v7085_v30  ;;  %v2167_v11 = vpop.permute.xlu1 %2166 }
 0x33c   : > { %v1638_v54 = vrot.slane %v1625_v20, 4 }
 0x33e   : > { %v1647_v41 = vsel %vm8321_vm15, %v1638_v54, %v1639_v47  ;;  %2493 = vmatpush.bf16.msrb.mxu1 %v4973_v53  ;;  %2550 = vmatpush.bf16.msra.mxu0 %v4977_v51  ;;  %v5524_v47 = vld [vmem:[#allocation3 + $0xc4] sm:$0xf]  ;;  %v5054_v54 = vld [vmem:[#allocation3 + $0xc8] sm:$0xf0]  ;;  %v2182_v51 = vrot.slane %v2169_v27, 4 }
 0x33f   : > { %v1648_v39 = vsel %vm1645_vm13, %v1625_v20, %v1647_v41  ;;  %v5503_v63 = vld [vmem:[#allocation3 + $0x14] sm:$0xf0]  ;;  %v4966_v18 = vld [vmem:[#allocation3 + $0x18] sm:$0xf0]  ;;  %vm8322_vm13 = vmmov %vm8317_vm6 }
 0x340   : > { %1658 = vst [vmem:[#allocation3 + $0x8] sm:$0xff] %v1648_v39  ;;  %v4965_v17 = vor.u32 %v5503_v63, %v4964_v12  ;;  %v4969_v26 = vor.u32 %v5502_v22, %v4966_v18  ;;  %v5535_v49 = vld [vmem:[#allocation3 + $0x114] sm:$0xf0]  ;;  %v5094_v58 = vld [vmem:[#allocation3 + $0x118] sm:$0xf0]  ;;  %v5057_v12 = vor.u32 %v5524_v47, %v5054_v54  ;;  %vm8327_vm6 = vmmov %vm8320_vm0 }
 0x341   : > { %v5046_v63 = vld [vmem:[#allocation3 + $0xb8] sm:$0xf0]  ;;  %v4944_v22 = vld [vmem:[%s8096_s4 + $0x18] sm:$0xf]  ;;  %v5498_v18 = vld [vmem:[%s8096_s4 + $0x20] sm:$0xf0] }
 0x342   : > { %2494 = vmatpush.bf16.msrb.mxu1 %v4965_v17  ;;  %2551 = vmatpush.bf16.msra.mxu0 %v4969_v26  ;;  %v5522_v26 = vld [vmem:[#allocation3 + $0xb4] sm:$0xf]  ;;  %vm8330_vm0 = vmmov %vm8329_vm12 }
 0x343   : > { %v2175_v1 = vpop.permute.xlu0 %2174  ;;  %vm8331_vm15 = vmmov %vm8330_vm0 }
 0x344   : > { %v2185_v45 = vrot.slane %v2175_v1, 4  ;;  %v5049_v1 = vor.u32 %v5522_v26, %v5046_v63 }
 0x346   : > { %v2192_v43 = vsel %vm8322_vm13, %v2184_v28, %v2185_v45  ;;  %v4945_v28 = vor.u32 %v5498_v18, %v4944_v22  ;;  %v5038_v45 = vld [vmem:[#allocation3 + $0xa8] sm:$0xf0]  ;;  %vm8335_vm13 = vnez %v8179_v59 }
 0x347   : > { %v2193_v14 = vsel %vm8323_vm5, %v7066_v4, %v2192_v43  ;;  %v5501_v0 = vld [vmem:[#allocation3 + $0x4] sm:$0xf0]  ;;  %v4958_v62 = vld [vmem:[#allocation3 + $0x8] sm:$0xf0]  ;;  %v2181_v4 = vrot.slane %v2167_v11, 4  ;;  %v5041_v56 = vor.u32 %v5520_v3, %v5038_v45  ;;  %vm8336_vm5 = vnez %v8183_v42 }
 0x348   : > { %2202 = vst [vmem:[#allocation3 + $0x110] sm:$0xff] %v2193_v14  ;;  %v4957_v61 = vor.u32 %v5501_v0, %v4956_v32  ;;  %v4961_v52 = vor.u32 %v5500_v60, %v4958_v62  ;;  %v4940_v32 = vld [vmem:[%s8096_s4 + $0x8] sm:$0xf]  ;;  %v5022_v11 = vld [vmem:[#allocation3 + $0x88] sm:$0xf0] }
 0x349   : > { %v4941_v7 = vor.u32 %v5496_v31, %v4940_v32 }
 0x34a   : > { %2495 = vmatpush.bf16.msrb.mxu1 %v4957_v61  ;;  %2552 = vmatpush.bf16.msra.mxu0 %v4961_v52  ;;  %v5518_v61 = vld [vmem:[#allocation3 + $0x94] sm:$0xf] }
 0x34b   : > { %v2165_v33 = vpop.permute.xlu0 %2164  ;;  %2520 = vmatmul.bf16.gmra.mxu3 %v7107_v10  ;;  %v5033_v52 = vor.u32 %v5518_v61, %v5030_v50 }
 0x34c   : > { %v2180_v15 = vrot.slane %v2165_v33, 4 }
 0x34d   : > { %2496 = vmatmul.bf16.vlgmr.msrb.gmra.mxu1 %v4933_v34  ;;  %2553 = vmatmul.bf16.vlgmr.msra.gmra.mxu0 %v4933_v34 }
 0x34e   : > { %2564 = vmatpush.bf16.msra.mxu1 %v5081_v21  ;;  %v2188_v16 = vsel %vm8324_vm8, %v2180_v15, %v2181_v4  ;;  %v5516_v21 = vld [vmem:[#allocation3 + $0x84] sm:$0xf]  ;;  %vm8338_vm8 = vnez %v8197_v6 }
 0x34f   : > { %v2189_v38 = vsel %vm8325_vm9, %v2165_v33, %v2188_v16  ;;  %v5092_v19 = vld [vmem:[#allocation3 + $0x110] sm:$0xf]  ;;  %v5534_v35 = vld [vmem:[#allocation3 + $0x114] sm:$0xf]  ;;  %v5025_v34 = vor.u32 %v5516_v21, %v5022_v11  ;;  %v5499_v33 = vld [vmem:[%s8096_s4 + $0x28] sm:$0xf0]  ;;  %vm8339_vm9 = vnez %v8191_v23 }
 0x350   : > { %2200 = vst [vmem:[#allocation3 + $0x100] sm:$0xff] %v2189_v38  ;;  %v5093_v36 = vor.u32 %v5535_v49, %v5092_v19  ;;  %v5097_v20 = vor.u32 %v5534_v35, %v5094_v58  ;;  %v4953_v4 = vor.u32 %v5499_v33, %v4952_v37  ;;  %v2265_v38 = vpop.permute.xlu1 %2264  ;;  %v2270_v37 = vpop.permute.xlu2 %2269  ;;  %v3989_v23 = vld [vmem:[#allocation2 + $0x2c] sm:$0xf] }
 0x352   : > { %2565 = vmatpush.bf16.msra.mxu1 %v5073_v46  ;;  %2532 = vmatpush.bf16.msra.mxu2 %v5093_v36 }
 0x353   : > { %2589 = vmatpush.bf16.msra.mxu3 %v5097_v20  ;;  %v2171_v53 = vpop.permute.xlu0 %2170 }
 0x354   : > { %v2183_v41 = vrot.slane %v2171_v53, 4 }
 0x356   : > { %2566 = vmatpush.bf16.msra.mxu1 %v5065_v57  ;;  %v2190_v39 = vsel %vm8326_vm2, %v2182_v51, %v2183_v41 }
 0x357   : > { %v2191_v17 = vsel %vm8327_vm6, %v2169_v27, %v2190_v39  ;;  %v5084_v43 = vld [vmem:[#allocation3 + $0x100] sm:$0xf]  ;;  %v5532_v14 = vld [vmem:[#allocation3 + $0x104] sm:$0xf]  ;;  %vm8340_vm6 = vcmask 924672  }
 0x358   : > { %2201 = vst [vmem:[#allocation3 + $0x108] sm:$0xff] %v2191_v17  ;;  %v2260_v51 = vpop.permute.xlu1 %2259 }
 0x35a   : > { %2567 = vmatpush.bf16.msra.mxu1 %v5057_v12 }
 0x35b   : > { %v2255_v35 = vpop.permute.xlu0 %2254 }
 0x35d   : > { %2501 = vmatmul.bf16.gmra.mxu1 %v4945_v28  ;;  %2558 = vmatmul.bf16.gmra.mxu0 %v4945_v28 }
 0x35e   : > { %2568 = vmatpush.bf16.msra.mxu1 %v5049_v1 }
 0x35f   : > { %v5533_v55 = vld [vmem:[#allocation3 + $0x104] sm:$0xf0]  ;;  %v5086_v0 = vld [vmem:[#allocation3 + $0x108] sm:$0xf0] }
 0x360   : > { %v5085_v60 = vor.u32 %v5533_v55, %v5084_v43  ;;  %v5089_v62 = vor.u32 %v5532_v14, %v5086_v0 }
 0x362   : > { %2569 = vmatpush.bf16.msra.mxu1 %v5041_v56  ;;  %2533 = vmatpush.bf16.msra.mxu2 %v5085_v60 }
 0x363   : > { %2590 = vmatpush.bf16.msra.mxu3 %v5089_v62 }
 0x365   : > { %5098 = vmatmul.msk.bf16.vlgmr.msra.gmra.mxu2 %vm8328_vm14, %v4941_v7  ;;  %vm8341_vm14 = vmmov %vm8326_vm2 }
 0x366   : > { %2570 = vmatpush.bf16.msra.mxu1 %v5033_v52  ;;  %5100 = vmatmul.msk.bf16.vlgmr.msra.gmra.mxu3 %vm8329_vm12, %v4941_v7  ;;  %vm8342_vm12 = vcmask 916480  }
 0x36a   : > { %2571 = vmatpush.bf16.msra.mxu1 %v5025_v34 }
 0x36d   : > { %2572 = vmatmul.bf16.vlgmr.msra.gmra.mxu1 %v7085_v30 }
 0x375   : > { %5099 = vmatmul.msk.bf16.gmra.mxu2 %vm8330_vm0, %v4953_v4  ;;  %vm8343_vm0 = vmmov %vm8326_vm2 }
 0x376   : > { %5101 = vmatmul.msk.bf16.gmra.mxu3 %vm8331_vm15, %v4953_v4  ;;  %vm8344_vm15 = vcmask 130048  }
 0x37d   : > { %2577 = vmatmul.bf16.gmra.mxu1 %v7107_v10 }
 0x3be   : > { %v2516_v15 = vpop.f32.mrf.mxu3 }
 0x3c6   : > { %v2518_v46 = vpop.f32.mrf.mxu3 }
 0x3ca   : > { %v2497_v13 = vpop.f32.mrf.mxu1  ;;  %v2554_v25 = vpop.f32.mrf.mxu0 }
 0x3cb   : > { %v2498_v58 = vadd.f32 %v2497_v13, %v2255_v35  ;;  %v2555_v27 = vadd.f32 %v2554_v25, %v2255_v35 }
 0x3cd   : > { %v2517_v57 = vadd.f32 %v2516_v15, %v2498_v58 }
 0x3ce   : > { %v2521_v30 = vpop.f32.mrf.mxu3 }
 0x3d2   : > { %v2499_v16 = vpop.f32.mrf.mxu1  ;;  %v2556_v47 = vpop.f32.mrf.mxu0 }
 0x3d3   : > { %v2500_v41 = vadd.f32 %v2499_v16, %v2260_v51  ;;  %v2557_v17 = vadd.f32 %v2556_v47, %v2260_v51 }
 0x3d5   : > { %v2519_v1 = vadd.f32 %v2518_v46, %v2500_v41 }
 0x3d6   : > { %v2523_v5 = vpop.f32.mrf.mxu3 }
 0x3da   : > { %v2502_v49 = vpop.f32.mrf.mxu1  ;;  %v2559_v56 = vpop.f32.mrf.mxu0 }
 0x3db   : > { %v2503_v50 = vadd.f32 %v2502_v49, %v2265_v38  ;;  %v2560_v0 = vadd.f32 %v2559_v56, %v2265_v38 }
 0x3dd   : > { %v2522_v62 = vadd.f32 %v2521_v30, %v2503_v50 }
 0x3e2   : > { %v2504_v19 = vpop.f32.mrf.mxu1  ;;  %v2561_v13 = vpop.f32.mrf.mxu0 }
 0x3e3   : > { %v2505_v33 = vadd.f32 %v2504_v19, %v2270_v37  ;;  %v2562_v25 = vadd.f32 %v2561_v13, %v2270_v37 }
 0x3e5   : > { %v2524_v35 = vadd.f32 %v2523_v5, %v2505_v33 }
 0x3e8   : > { %v2535_v36 = vpop.f32.mrf.mxu2 }
 0x3e9   : > { %v2592_v20 = vpop.f32.mrf.mxu3  ;;  %v2536_v53 = vadd.f32 %v2535_v36, %v2517_v57 }
 0x3ea   : > { %v2573_v54 = vpop.f32.mrf.mxu1 }
 0x3eb   : > { %v2574_v10 = vadd.f32 %v2573_v54, %v2555_v27  ;;  %v2602_v39 = vmax.f32 %v2536_v53, 0.0 }
 0x3ed   : > { %v2593_v12 = vadd.f32 %v2592_v20, %v2574_v10 }
 0x3ef   : > { %v2603_v63 = vmax.f32 %v2593_v12, 0.0 }
 0x3f0   : > { %v2537_v22 = vpop.f32.mrf.mxu2 }
 0x3f1   : > { %v2594_v18 = vpop.f32.mrf.mxu3  ;;  %v7138_v26 = vpack.c.bf16 %v2603_v63, %v2602_v39  ;;  %v2538_v45 = vadd.f32 %v2537_v22, %v2519_v1 }
 0x3f2   : > { %v2575_v28 = vpop.f32.mrf.mxu1 }
 0x3f3   : > { %2614 = vst [vmem:[#allocation2 + $0x4] sm:$0xff] %v7138_v26  ;;  %v2576_v3 = vadd.f32 %v2575_v28, %v2557_v17  ;;  %3018 = vrot.lane.b32.xlu1 %v7138_v26, %s8157_s27  ;;  %v2604_v32 = vmax.f32 %v2538_v45, 0.0  ;;  %v2946_v36 = vsel %vm6325_vm3, %v7138_v26, 0 }
 0x3f5   : > { %v2595_v43 = vadd.f32 %v2594_v18, %v2576_v3 }
 0x3f7   : > { %v2605_v31 = vmax.f32 %v2595_v43, 0.0 }
 0x3f8   : > { %v2540_v55 = vpop.f32.mrf.mxu2 }
 0x3f9   : > { %v2597_v14 = vpop.f32.mrf.mxu3  ;;  %v7143_v60 = vpack.c.bf16 %v2605_v31, %v2604_v32  ;;  %v2541_v11 = vadd.f32 %v2540_v55, %v2522_v62 }
 0x3fa   : > { %v2578_v61 = vpop.f32.mrf.mxu1  ;;  %v2683_v52 = vld [vmem:[#allocation2 + $0x8] sm:$0xf]  ;;  %v7145_v7 = vld [vmem:[#allocation2] sm:$0xff] }
 0x3fb   : > { %2615 = vst [vmem:[#allocation2 + $0x14] sm:$0xff] %v7143_v60  ;;  %v2579_v21 = vadd.f32 %v2578_v61, %v2560_v0  ;;  %2700 = vrot.lane.b32.xlu2 %v2683_v52, %s8332_s15  ;;  %v2810_v34 = vsel %vm6221_vm11, %v7145_v7, 0  ;;  %2698 = vrot.lane.b32.xlu1 %v7145_v7, %s8332_s15  ;;  %v2866_v15 = vld [vmem:[#allocation2 + $0x4] sm:$0xff]  ;;  %v2606_v46 = vmax.f32 %v2541_v11, 0.0  ;;  %v2746_v47 = vsel %vm6245_vm4, %v7145_v7, 0 }
 0x3fc   : > { %2826 = vrot.lane.b32.xlu0 %v2810_v34, %s8333_s17  ;;  %2870 = vst [vmem:[#allocation3 + $0x80] sm:$0xff] %v2866_v15  ;;  %v2803_v30 = vld [vmem:[#allocation2 + $0x8] sm:$0xf]  ;;  %v2948_v1 = vsel %vm6325_vm3, %v7143_v60, 0 }
 0x3fd   : > { %v2598_v4 = vadd.f32 %v2597_v14, %v2579_v21  ;;  %v2811_v19 = vsel %vm6119_vm10, %v2803_v30, 0  ;;  %v2739_v41 = vld [vmem:[#allocation2 + $0x8] sm:$0xf]  ;;  %v7215_v14 = vpop.permute.xlu2 %3032  ;;  %v2626_v30 = vsel %vm8339_vm9, %v7145_v7, 0 }
 0x3fe   : > { %v2747_v63 = vsel %vm8335_vm13, %v2739_v41, 0 }
 0x3ff   : > { %v2607_v16 = vmax.f32 %v2598_v4, 0.0 }
 0x400   : > { %v2542_v49 = vpop.f32.mrf.mxu2 }
 0x401   : > { %v7155_v38 = vpack.c.bf16 %v2607_v16, %v2606_v46  ;;  %v2599_v20 = vpop.f32.mrf.mxu3  ;;  %v2543_v27 = vadd.f32 %v2542_v49, %v2524_v35  ;;  %v7245_v16 = vpop.permute.xlu0 %3028 }
 0x402   : > { %v2580_v58 = vpop.f32.mrf.mxu1  ;;  %v2867_v54 = vld [vmem:[#allocation2 + $0x14] sm:$0xff] }
 0x403   : > { %2616 = vst [vmem:[#allocation2 + $0x24] sm:$0xff] %v7155_v38  ;;  %v2581_v57 = vadd.f32 %v2580_v58, %v2562_v25  ;;  %2962 = vrot.lane.b32.xlu2 %v2946_v36, %s8155_s22  ;;  %2828 = vrot.lane.b32.xlu1 %v2811_v19, %s8333_s17  ;;  %v2608_v53 = vmax.f32 %v2543_v27, 0.0  ;;  %v7170_v51 = vld [vmem:[#allocation2 + $0x10] sm:$0xff]  ;;  %v2685_v18 = vld [vmem:[#allocation2 + $0x18] sm:$0xf]  ;;  %v2886_v52 = vsel %vm8338_vm8, %v7155_v38, 0 }
 0x404   : > { %2762 = vrot.lane.b32.xlu0 %v2746_v47, %s8334_s24  ;;  %2872 = vst [vmem:[#allocation3 + $0x90] sm:$0xff] %v7155_v38  ;;  %v2812_v39 = vsel %vm6221_vm11, %v7170_v51, 0  ;;  %v2748_v22 = vsel %vm6245_vm4, %v7170_v51, 0  ;;  %v2805_v17 = vld [vmem:[#allocation2 + $0x18] sm:$0xf]  ;;  %v2950_v37 = vsel %vm6325_vm3, %v7155_v38, 0 }
 0x405   : > { %v2600_v5 = vadd.f32 %v2599_v20, %v2581_v57  ;;  %2871 = vst [vmem:[#allocation3 + $0x88] sm:$0xff] %v2867_v54  ;;  %v2813_v28 = vsel %vm6119_vm10, %v2805_v17, 0  ;;  %v2741_v3 = vld [vmem:[#allocation2 + $0x18] sm:$0xf]  ;;  %v7227_v21 = vpop.permute.xlu2 %3020  ;;  %v2619_v20 = vld [vmem:[#allocation2 + $0x8] sm:$0xf]  ;;  %v7265_v57 = vpop.permute.xlu1 %3024 }
 0x406   : > { %v2749_v50 = vsel %vm8335_vm13, %v2741_v3, 0  ;;  %v2621_v58 = vld [vmem:[#allocation2 + $0x18] sm:$0xf]  ;;  %v2627_v47 = vsel %vm8336_vm5, %v2619_v20, 0  ;;  %v2881_v54 = vld [vmem:[#allocation2 + $0x3c] sm:$0xf] }
 0x407   : > { %v2609_v10 = vmax.f32 %v2600_v5, 0.0  ;;  %v2629_v7 = vsel %vm8336_vm5, %v2621_v58, 0 }
 0x409   : > { %v7172_v12 = vpack.c.bf16 %v2609_v10, %v2608_v53  ;;  %v7259_v19 = vpop.permute.xlu0 %2976  ;;  %v2889_v10 = vsel %vm6383_vm1, %v2881_v54, 0 }
 0x40a   : > { %v2686_v45 = vld [vmem:[#allocation2 + $0x20] sm:$0xff]  ;;  %v2623_v43 = vld [vmem:[#allocation2 + $0x28] sm:$0xf] }
 0x40b   : > { %2617 = vst [vmem:[#allocation2 + $0x34] sm:$0xff] %v7172_v12  ;;  %2830 = vrot.lane.b32.xlu2 %v2812_v39, %s8333_s17  ;;  %2764 = vrot.lane.b32.xlu1 %v2747_v63, %s8334_s24  ;;  %v2750_v56 = vsel %vm6245_vm4, %v2686_v45, 0  ;;  %v2814_v32 = vsel %vm6221_vm11, %v2686_v45, 0  ;;  %v2631_v31 = vsel %vm8336_vm5, %v2623_v43, 0  ;;  %v2687_v55 = vld [vmem:[#allocation2 + $0x28] sm:$0xf] }
 0x40c   : > { %3022 = vrot.lane.b32.xlu0 %v7143_v60, %s8157_s27  ;;  %2873 = vst [vmem:[#allocation3 + $0x98] sm:$0xff] %v7172_v12  ;;  %v2743_v0 = vld [vmem:[#allocation2 + $0x28] sm:$0xf]  ;;  %v2630_v46 = vsel %vm8339_vm9, %v2686_v45, 0  ;;  %v2952_v53 = vsel %vm6325_vm3, %v7172_v12, 0  ;;  %v2882_v39 = vsel %vm8338_vm8, %v7138_v26, 0 }
 0x40d   : > { %v2807_v62 = vld [vmem:[#allocation2 + $0x28] sm:$0xf]  ;;  %v2751_v61 = vsel %vm8335_vm13, %v2743_v0, 0  ;;  %v7238_v13 = vpop.permute.xlu2 %2968  ;;  %v7283_v63 = vpop.permute.xlu1 %2972  ;;  %v2875_v0 = vld [vmem:[#allocation2 + $0xc] sm:$0xf] }
 0x40e   : > { %v2815_v11 = vsel %vm6119_vm10, %v2807_v62, 0 }
 0x411   : > { %v2965_v41 = vpop.permute.xlu0 %2964 }
 0x412   : > { %v2689_v34 = vld [vmem:[#allocation2 + $0x38] sm:$0xf]  ;;  %v2688_v15 = vld [vmem:[#allocation2 + $0x30] sm:$0xff] }
 0x413   : > { %2766 = vrot.lane.b32.xlu2 %v2748_v22, %s8334_s24  ;;  %2704 = vrot.lane.b32.xlu1 %v2685_v18, %s8332_s15  ;;  %v2809_v33 = vld [vmem:[#allocation2 + $0x38] sm:$0xf]  ;;  %v2816_v49 = vsel %vm6221_vm11, %v2688_v15, 0  ;;  %v2752_v25 = vsel %vm6245_vm4, %v2688_v15, 0  ;;  %v2979_v18 = vrot.slane %v2965_v41, 4  ;;  %v2632_v3 = vsel %vm8339_vm9, %v2688_v15, 0 }
 0x414   : > { %2702 = vrot.lane.b32.xlu0 %v7170_v51, %s8332_s15  ;;  %v2817_v4 = vsel %vm6119_vm10, %v2809_v33, 0  ;;  %v2745_v36 = vld [vmem:[#allocation2 + $0x38] sm:$0xf] }
 0x415   : > { %v7257_v35 = vpop.permute.xlu2 %2908  ;;  %v2753_v27 = vsel %vm8335_vm13, %v2745_v36, 0 }
 0x41b   : > { %3026 = vrot.lane.b32.xlu2 %v7155_v38, %s8157_s27  ;;  %2966 = vrot.lane.b32.xlu1 %v2948_v1, %s8155_s22 }
 0x41c   : > { %2832 = vrot.lane.b32.xlu0 %v2813_v28, %s8333_s17  ;;  %v2625_v28 = vld [vmem:[#allocation2 + $0x38] sm:$0xf] }
 0x423   : > { %2706 = vrot.lane.b32.xlu2 %v2686_v45, %s8332_s15  ;;  %2770 = vrot.lane.b32.xlu1 %v2750_v56, %s8334_s24  ;;  %v2628_v56 = vsel %vm8339_vm9, %v7170_v51, 0 }
 0x424   : > { %2768 = vrot.lane.b32.xlu0 %v2749_v50, %s8334_s24  ;;  %v2633_v50 = vsel %vm8336_vm5, %v2625_v28, 0 }
 0x42b   : > { %2834 = vrot.lane.b32.xlu2 %v2814_v32, %s8333_s17  ;;  %2652 = vrot.lane.b32.xlu1 %v2631_v31, %s8337_s14  ;;  %v3035_v31 = vrot.slane %v7227_v21, 4 }
 0x42c   : > { %2708 = vrot.lane.b32.xlu0 %v2687_v55, %s8332_s15 }
 0x433   : > { %2772 = vrot.lane.b32.xlu2 %v2751_v61, %s8334_s24  ;;  %2906 = vrot.lane.b32.xlu1 %v2886_v52, %s8304_s26  ;;  %v2884_v61 = vsel %vm8338_vm8, %v7143_v60, 0  ;;  %v2883_v52 = vsel %vm6383_vm1, %v2875_v0, 0 }
 0x434   : > { %2836 = vrot.lane.b32.xlu0 %v2815_v11, %s8333_s17  ;;  %v2888_v11 = vsel %vm8338_vm8, %v7172_v12, 0 }
 0x43b   : > { %2712 = vrot.lane.b32.xlu2 %v2689_v34, %s8332_s15  ;;  %3030 = vrot.lane.b32.xlu1 %v7172_v12, %s8157_s27 }
 0x43c   : > { %2970 = vrot.lane.b32.xlu0 %v2950_v37, %s8155_s22 }
 0x443   : > { %2840 = vrot.lane.b32.xlu2 %v2817_v4, %s8333_s17  ;;  %2710 = vrot.lane.b32.xlu1 %v2688_v15, %s8332_s15  ;;  %v3063_v15 = vld [vmem:[#allocation2 + $0x2c] sm:$0xf] }
 0x444   : > { %2650 = vrot.lane.b32.xlu0 %v2630_v46, %s8337_s14  ;;  %v2877_v46 = vld [vmem:[#allocation2 + $0x1c] sm:$0xf] }
 0x445   : > { %v2885_v36 = vsel %vm6383_vm1, %v2877_v46, 0 }
 0x44b   : > { %2642 = vrot.lane.b32.xlu2 %v2626_v30, %s8337_s14  ;;  %2838 = vrot.lane.b32.xlu1 %v2816_v49, %s8333_s17 }
 0x44c   : > { %2774 = vrot.lane.b32.xlu0 %v2752_v25, %s8334_s24 }
 0x453   : > { %2648 = vrot.lane.b32.xlu2 %v2629_v7, %s8337_s14  ;;  %2776 = vrot.lane.b32.xlu1 %v2753_v27, %s8334_s24  ;;  %v3039_v27 = vrot.slane %v7245_v16, 4 }
 0x454   : > { %2644 = vrot.lane.b32.xlu0 %v2627_v47, %s8337_s14 }
 0x455   : > { %v2701_v5 = vpop.permute.xlu2 %2700 }
 0x456   : > { %v2715_v37 = vrot.slane %v2701_v5, 4 }
 0x45b   : > { %2974 = vrot.lane.b32.xlu2 %v2952_v53, %s8155_s22  ;;  %2912 = vrot.lane.b32.xlu1 %v2889_v10, %s8304_s26  ;;  %v3065_v10 = vld [vmem:[#allocation2 + $0x3c] sm:$0xf] }
 0x45c   : > { %2898 = vrot.lane.b32.xlu0 %v2882_v39, %s8304_s26 }
 0x45d   : > { %v2963_v22 = vpop.permute.xlu2 %2962 }
 0x45e   : > { %v2978_v17 = vrot.slane %v2963_v22, 4 }
 0x460   : > { %v2986_v1 = vsel %vm8326_vm2, %v2978_v17, %v2979_v18  ;;  %vm8345_vm2 = vnez %v8181_v2  ;;  %v4095_v2 = vld [vmem:[%s8101_s9 + $0x18] sm:$0xff] }
 0x461   : > { %v2987_v45 = vsel %vm8340_vm6, %v2963_v22, %v2986_v1  ;;  %v3071_v25 = vsel %vm8345_vm2, %v3063_v15, 0  ;;  %vm8346_vm6 = vnez %v8189_v48  ;;  %v3073_v16 = vsel %vm8345_vm2, %v3065_v10, 0  ;;  %v3168_v15 = vld [vmem:[%s8099_s7 + $0x10] sm:$0xff]  ;;  %v3167_v10 = vld [vmem:[%s8099_s7 + $0x8] sm:$0xff]  ;;  %v3987_v48 = vld [vmem:[#allocation2 + $0x1c] sm:$0xf] }
 0x462   : > { %2998 = vst [vmem:[#allocation3 + $0xc0] sm:$0xff] %v2987_v45  ;;  %v3070_v58 = vsel %vm8346_vm6, %v7155_v38, 0  ;;  %v3066_v18 = vsel %vm8346_vm6, %v7138_v26, 0  ;;  %v3072_v17 = vsel %vm8346_vm6, %v7172_v12, 0 }
 0x463   : > { %2654 = vrot.lane.b32.xlu2 %v2632_v3, %s8337_s14  ;;  %2646 = vrot.lane.b32.xlu1 %v2628_v56, %s8337_s14  ;;  %v3037_v56 = vrot.slane %v7265_v57, 4 }
 0x464   : > { %2656 = vrot.lane.b32.xlu0 %v2633_v50, %s8337_s14 }
 0x465   : > { %v7297_v43 = vpop.permute.xlu2 %2830  ;;  %v3019_v32 = vpop.permute.xlu1 %3018 }
 0x466   : > { %v3034_v55 = vrot.slane %v3019_v32, 4 }
 0x468   : > { %v3042_v62 = vsel %vm8341_vm14, %v3034_v55, %v3035_v31  ;;  %vm8348_vm14 = vmmov %vm8343_vm0  ;;  %v3059_v31 = vld [vmem:[#allocation2 + $0xc] sm:$0xf] }
 0x469   : > { %v3043_v51 = vsel %vm8342_vm12, %v3019_v32, %v3042_v62  ;;  %vm8349_vm12 = vmmov %vm8343_vm0  ;;  %v3061_v32 = vld [vmem:[#allocation2 + $0x1c] sm:$0xf]  ;;  %v3067_v57 = vsel %vm8345_vm2, %v3059_v31, 0 }
 0x46a   : > { %3054 = vst [vmem:[#allocation3 + $0xe0] sm:$0xff] %v3043_v51  ;;  %v3069_v51 = vsel %vm8345_vm2, %v3061_v32, 0 }
 0x46b   : > { %2902 = vrot.lane.b32.xlu2 %v2884_v61, %s8304_s26  ;;  %2900 = vrot.lane.b32.xlu1 %v2883_v52, %s8304_s26  ;;  %v3068_v61 = vsel %vm8346_vm6, %v7143_v60, 0  ;;  %v3166_v60 = vld [vmem:[%s8099_s7] sm:$0xff] }
 0x46c   : > { %2910 = vrot.lane.b32.xlu0 %v2888_v11, %s8304_s26 }
 0x46d   : > { %v7313_v21 = vpop.permute.xlu2 %2766  ;;  %v2699_v34 = vpop.permute.xlu1 %2698 }
 0x46e   : > { %v2827_v33 = vpop.permute.xlu0 %2826  ;;  %v2714_v4 = vrot.slane %v2699_v34, 4 }
 0x46f   : > { %v2842_v47 = vrot.slane %v2827_v33, 4 }
 0x470   : > { %v2722_v30 = vsel %vm8343_vm0, %v2714_v4, %v2715_v37  ;;  %vm8350_vm0 = vcmask 916480   ;;  %v3169_v4 = vld [vmem:[%s8099_s7 + $0x18] sm:$0xff] }
 0x471   : > { %v2723_v49 = vsel %vm8344_vm15, %v2699_v34, %v2722_v30  ;;  %vm8351_vm15 = vcmask 7168  }
 0x472   : > { %2734 = vst [vmem:[#allocation3 + $0x20] sm:$0xff] %v2723_v49 }
 0x473   : > { %3092 = vrot.lane.b32.xlu2 %v3071_v25, %s8347_s29  ;;  %3090 = vrot.lane.b32.xlu1 %v3070_v58, %s8347_s29  ;;  %v2981_v58 = vrot.slane %v7238_v13, 4 }
 0x474   : > { %2904 = vrot.lane.b32.xlu0 %v2885_v36, %s8304_s26 }
 0x475   : > { %v3027_v20 = vpop.permute.xlu2 %3026  ;;  %v2829_v7 = vpop.permute.xlu1 %2828 }
 0x476   : > { %v3038_v5 = vrot.slane %v3027_v20, 4  ;;  %v2763_v54 = vpop.permute.xlu0 %2762  ;;  %v2843_v53 = vrot.slane %v2829_v7, 4  ;;  %v2844_v7 = vrot.slane %v7297_v43, 4 }
 0x477   : > { %v2778_v45 = vrot.slane %v2763_v54, 4 }
 0x478   : > { %v3046_v38 = vsel %vm8348_vm14, %v3038_v5, %v3039_v27  ;;  %v2850_v41 = vsel %vm8349_vm12, %v2842_v47, %v2843_v53  ;;  %vm8352_vm14 = vmmov %vm8349_vm12  ;;  %v3933_v47 = vld [vmem:[#allocation2 + $0x2c] sm:$0xf] }
 0x479   : > { %v3047_v39 = vsel %vm8350_vm0, %v3027_v20, %v3046_v38  ;;  %v2851_v22 = vsel %vm8351_vm15, %v2827_v33, %v2850_v41  ;;  %vm8353_vm0 = vcmask 121856   ;;  %vm8354_vm15 = vcmask 916480  }
 0x47a   : > { %3056 = vst [vmem:[#allocation3 + $0xf0] sm:$0xff] %v3047_v39 }
 0x47b   : > { %3082 = vrot.lane.b32.xlu2 %v3066_v18, %s8347_s29  ;;  %2862 = vst [vmem:[#allocation3 + $0x60] sm:$0xff] %v2851_v22  ;;  %3096 = vrot.lane.b32.xlu1 %v3073_v16, %s8347_s29 }
 0x47c   : > { %3094 = vrot.lane.b32.xlu0 %v3072_v17, %s8347_s29  ;;  %v2780_v17 = vrot.slane %v7313_v21, 4 }
 0x47d   : > { %v7343_v1 = vpop.permute.xlu2 %2706  ;;  %v2765_v28 = vpop.permute.xlu1 %2764 }
 0x47e   : > { %v3023_v3 = vpop.permute.xlu0 %3022  ;;  %v2779_v26 = vrot.slane %v2765_v28, 4 }
 0x47f   : > { %v3036_v50 = vrot.slane %v3023_v3, 4 }
 0x480   : > { %v2786_v55 = vsel %vm8352_vm14, %v2778_v45, %v2779_v26  ;;  %vm8355_vm14 = vmmov %vm8349_vm12  ;;  %v3871_v45 = vld [vmem:[#allocation2 + $0x3c] sm:$0xf] }
 0x481   : > { %v3044_v12 = vsel %vm8349_vm12, %v3036_v50, %v3037_v56  ;;  %v2787_v0 = vsel %vm8353_vm0, %v2763_v54, %v2786_v55  ;;  %vm8356_vm12 = vcmask 130048   ;;  %vm8357_vm0 = vmmov %vm8355_vm14  ;;  %v3935_v54 = vld [vmem:[#allocation2 + $0x3c] sm:$0xf]  ;;  %v3879_v31 = vsel %vm6343_vm7, %v3871_v45, 0 }
 0x482   : > { %v3045_v62 = vsel %vm8354_vm15, %v3023_v3, %v3044_v12  ;;  %2798 = vst [vmem:[#allocation3 + $0x40] sm:$0xff] %v2787_v0  ;;  %vm8358_vm15 = vmmov %vm8357_vm0  ;;  %v3931_v56 = vld [vmem:[#allocation2 + $0x1c] sm:$0xf] }
 0x483   : > { %3055 = vst [vmem:[#allocation3 + $0xe8] sm:$0xff] %v3045_v62  ;;  %3088 = vrot.lane.b32.xlu2 %v3069_v51, %s8347_s29  ;;  %3086 = vrot.lane.b32.xlu1 %v3068_v61, %s8347_s29  ;;  %v2718_v62 = vrot.slane %v7343_v1, 4  ;;  %v3867_v61 = vld [vmem:[#allocation2 + $0x1c] sm:$0xf] }
 0x484   : > { %3084 = vrot.lane.b32.xlu0 %v3067_v57, %s8347_s29  ;;  %v3869_v57 = vld [vmem:[#allocation2 + $0x2c] sm:$0xf] }
 0x485   : > { %v7360_v52 = vpop.permute.xlu2 %2834  ;;  %v2705_v11 = vpop.permute.xlu1 %2704 }
 0x486   : > { %v2703_v34 = vpop.permute.xlu0 %2702  ;;  %v2717_v37 = vrot.slane %v2705_v11, 4 }
 0x487   : > { %v2716_v33 = vrot.slane %v2703_v34, 4 }
 0x489   : > { %v2724_v46 = vsel %vm8355_vm14, %v2716_v33, %v2717_v37  ;;  %vm8359_vm14 = vcmask 924672   ;;  %v3875_v33 = vsel %vm6343_vm7, %v3867_v61, 0 }
 0x48a   : > { %v2725_v30 = vsel %vm8356_vm12, %v2703_v34, %v2724_v46  ;;  %vm8360_vm12 = vcmask 7168  }
 0x48b   : > { %3172 = vperm.xlu2 %5696, %v3166_v60   ;;  %2735 = vst [vmem:[#allocation3 + $0x28] sm:$0xff] %v2725_v30  ;;  %3187 = vperm.xlu1 %5695, %v3169_v4   ;;  %v3877_v60 = vsel %vm6343_vm7, %v3869_v57, 0  ;;  %v5248_v57 = vld [vmem:[#allocation3 + $0xf0] sm:$0xf] }
 0x48c   : > { %3182 = vperm.xlu0 %5697, %v3168_v15  }
 0x48d   : > { %v2773_v49 = vpop.permute.xlu2 %2772  ;;  %v2967_v25 = vpop.permute.xlu1 %2966 }
 0x48e   : > { %v2833_v36 = vpop.permute.xlu0 %2832  ;;  %v2980_v20 = vrot.slane %v2967_v25, 4  ;;  %v2783_v22 = vrot.slane %v2773_v49, 4  ;;  %v2846_v49 = vrot.slane %v7360_v52, 4 }
 0x48f   : > { %v2845_v27 = vrot.slane %v2833_v36, 4  ;;  %v3805_v36 = vld [vmem:[#allocation2 + $0x2c] sm:$0xf] }
 0x490   : > { %v2988_v5 = vsel %vm8357_vm0, %v2980_v20, %v2981_v58  ;;  %v3803_v58 = vld [vmem:[#allocation2 + $0x1c] sm:$0xf] }
 0x491   : > { %v2852_v53 = vsel %vm8358_vm15, %v2844_v7, %v2845_v27  ;;  %v2989_v38 = vsel %vm8359_vm14, %v2967_v25, %v2988_v5  ;;  %vm8361_vm15 = vmmov %vm8357_vm0  ;;  %vm8362_vm14 = vcmask 121856   ;;  %v3807_v20 = vld [vmem:[#allocation2 + $0x3c] sm:$0xf]  ;;  %v3813_v5 = vsel %vm6383_vm1, %v3805_v36, 0 }
 0x492   : > { %v2853_v13 = vsel %vm8360_vm12, %v7297_v43, %v2852_v53  ;;  %2999 = vst [vmem:[#allocation3 + $0xc8] sm:$0xff] %v2989_v38  ;;  %v3929_v43 = vld [vmem:[#allocation2 + $0xc] sm:$0xf]  ;;  %vm8363_vm12 = vmmov %vm8362_vm14 }
 0x493   : > { %2863 = vst [vmem:[#allocation3 + $0x68] sm:$0xff] %v2853_v13  ;;  %3954 = vrot.lane.b32.xlu2 %v3933_v47, %s8157_s27  ;;  %3958 = vrot.lane.b32.xlu1 %v3935_v54, %s8157_s27  ;;  %v3815_v54 = vsel %vm6383_vm1, %v3807_v20, 0 }
 0x494   : > { %3177 = vperm.xlu0 %5697, %v3167_v10   ;;  %v3041_v10 = vrot.slane %v7215_v14, 4 }
 0x495   : > { %v7385_v41 = vpop.permute.xlu2 %2712  ;;  %v2771_v39 = vpop.permute.xlu1 %2770 }
 0x496   : > { %v2769_v18 = vpop.permute.xlu0 %2768  ;;  %v2782_v16 = vrot.slane %v2771_v39, 4 }
 0x497   : > { %v2781_v28 = vrot.slane %v2769_v18, 4  ;;  %v3801_v18 = vld [vmem:[#allocation2 + $0xc] sm:$0xf] }
 0x498   : > { %v2790_v3 = vsel %vm8357_vm0, %v2782_v16, %v2783_v22 }
 0x499   : > { %v2788_v26 = vsel %vm8361_vm15, %v2780_v17, %v2781_v28  ;;  %v2791_v50 = vsel %vm8362_vm14, %v2771_v39, %v2790_v3  ;;  %vm8365_vm15 = vcmask 130048   ;;  %vm8366_vm14 = vmmov %vm8357_vm0  ;;  %v2983_v39 = vrot.slane %v7283_v63, 4  ;;  %v5567_v36 = vld [vmem:[#allocation3 + $0xc4] sm:$0xf0] }
 0x49a   : > { %v2789_v32 = vsel %vm8363_vm12, %v7313_v21, %v2788_v26  ;;  %2800 = vst [vmem:[#allocation3 + $0x50] sm:$0xff] %v2791_v50  ;;  %v3865_v21 = vld [vmem:[#allocation2 + $0xc] sm:$0xf]  ;;  %vm8368_vm12 = vcmask 1039360   ;;  %v3809_v3 = vsel %vm6383_vm1, %v3801_v18, 0  ;;  %v2985_v63 = vrot.slane %v7259_v19, 4 }
 0x49b   : > { %2799 = vst [vmem:[#allocation3 + $0x48] sm:$0xff] %v2789_v32  ;;  %3902 = vrot.lane.b32.xlu2 %v3879_v31, %s8364_s28  ;;  %3946 = vrot.lane.b32.xlu1 %v3929_v43, %s8157_s27  ;;  %v3873_v37 = vsel %vm6343_vm7, %v3865_v21, 0  ;;  %vm8367_vm7 = vmmov %vm8357_vm0  ;;  %v2721_v26 = vrot.slane %v7385_v41, 4 }
 0x49c   : > { %3950 = vrot.lane.b32.xlu0 %v3931_v56, %s8157_s27 }
 0x49d   : > { %v7398_v55 = vpop.permute.xlu2 %2840  ;;  %v7400_v12 = vpop.permute.xlu1 %2652 }
 0x49e   : > { %v2709_v0 = vpop.permute.xlu0 %2708  ;;  %v2663_v31 = vrot.slane %v7400_v12, 4 }
 0x49f   : > { %v2719_v51 = vrot.slane %v2709_v0, 4 }
 0x4a1   : > { %v2726_v11 = vsel %vm8357_vm0, %v2718_v62, %v2719_v51  ;;  %vm8369_vm0 = vcmask 7168  }
 0x4a2   : > { %v2727_v34 = vsel %vm8365_vm15, %v7343_v1, %v2726_v11  ;;  %v2919_v1 = vrot.slane %v7257_v35, 4  ;;  %v3811_v35 = vsel %vm6383_vm1, %v3803_v58, 0  ;;  %vm8370_vm15 = vmmov %vm8367_vm7 }
 0x4a3   : > { %2736 = vst [vmem:[#allocation3 + $0x30] sm:$0xff] %v2727_v34  ;;  %3890 = vrot.lane.b32.xlu2 %v3873_v37, %s8364_s28  ;;  %3894 = vrot.lane.b32.xlu1 %v3875_v33, %s8364_s28  ;;  %v5571_v34 = vld [vmem:[#allocation3 + $0xe4] sm:$0xf0]  ;;  %v5240_v37 = vld [vmem:[#allocation3 + $0xe0] sm:$0xf]  ;;  %v2849_v33 = vrot.slane %v7398_v55, 4 }
 0x4a4   : > { %3898 = vrot.lane.b32.xlu0 %v3877_v60, %s8364_s28 }
 0x4a5   : > { %v7415_v4 = vpop.permute.xlu2 %2642  ;;  %v2907_v15 = vpop.permute.xlu1 %2906 }
 0x4a6   : > { %v2837_v46 = vpop.permute.xlu0 %2836  ;;  %v2918_v30 = vrot.slane %v2907_v15, 4 }
 0x4a7   : > { %v2847_v25 = vrot.slane %v2837_v46, 4 }
 0x4a8   : > { %v2926_v24 = vsel %vm8366_vm14, %v2918_v30, %v2919_v1  ;;  %vm8371_vm14 = vmmov %vm8367_vm7  ;;  %v5241_v1 = vor.u32 %v5571_v34, %v5240_v37 }
 0x4a9   : > { %v2854_v7 = vsel %vm8367_vm7, %v2846_v49, %v2847_v25  ;;  %v2927_v27 = vsel %vm8368_vm12, %v2907_v15, %v2926_v24  ;;  %vm8372_vm7 = vcmask 916480   ;;  %vm8373_vm12 = vcmask 924672   ;;  %v5224_v24 = vld [vmem:[#allocation3 + $0xc0] sm:$0xf] }
 0x4aa   : > { %v2855_v47 = vsel %vm8369_vm0, %v7360_v52, %v2854_v7  ;;  %2936 = vst [vmem:[#allocation3 + $0xb0] sm:$0xff] %v2927_v27  ;;  %vm8374_vm0 = vmmov %vm8371_vm14  ;;  %v5225_v55 = vor.u32 %v5567_v36, %v5224_v24  ;;  %v5548_v36 = vld [vmem:[#allocation3 + $0x34] sm:$0xf] }
 0x4ab   : > { %2864 = vst [vmem:[#allocation3 + $0x70] sm:$0xff] %v2855_v47  ;;  %3830 = vrot.lane.b32.xlu2 %v3811_v35, %s8304_s26  ;;  %3834 = vrot.lane.b32.xlu1 %v3813_v5, %s8304_s26  ;;  %vm8377_vm1 = vmmov %vm8374_vm0  ;;  %v2658_v35 = vrot.slane %v7415_v4, 4 }
 0x4ac   : > { %3838 = vrot.lane.b32.xlu0 %v3815_v54, %s8304_s26 }
 0x4ad   : > { %v7433_v53 = vpop.permute.xlu2 %2648  ;;  %v3031_v52 = vpop.permute.xlu1 %3030 }
 0x4ae   : > { %v2971_v38 = vpop.permute.xlu0 %2970  ;;  %v3040_v13 = vrot.slane %v3031_v52, 4 }
 0x4af   : > { %v2982_v22 = vrot.slane %v2971_v38, 4 }
 0x4b0   : > { %v3048_v16 = vsel %vm8370_vm15, %v3040_v13, %v3041_v10  ;;  %vm8375_vm15 = vmmov %vm8374_vm0 }
 0x4b1   : > { %v2990_v17 = vsel %vm8371_vm14, %v2982_v22, %v2983_v39  ;;  %v3049_v28 = vsel %vm8372_vm7, %v3031_v52, %v3048_v16  ;;  %vm8376_vm14 = vmmov %vm8373_vm12  ;;  %vm8378_vm7 = vcmask 130048  }
 0x4b2   : > { %v2991_v45 = vsel %vm8373_vm12, %v2971_v38, %v2990_v17  ;;  %3057 = vst [vmem:[#allocation3 + $0xf8] sm:$0xff] %v3049_v28  ;;  %vm8379_vm12 = vcmask 138240   ;;  %v5184_v52 = vld [vmem:[#allocation3 + $0x70] sm:$0xf]  ;;  %v5556_v39 = vld [vmem:[#allocation3 + $0x74] sm:$0xf] }
 0x4b3   : > { %3000 = vst [vmem:[#allocation3 + $0xd0] sm:$0xff] %v2991_v45  ;;  %v5555_v45 = vld [vmem:[#allocation3 + $0x64] sm:$0xf0] }
 0x4b4   : > { %3826 = vrot.lane.b32.xlu0 %v3809_v3, %s8304_s26  ;;  %v5178_v3 = vld [vmem:[#allocation3 + $0x68] sm:$0xf0] }
 0x4b5   : > { %v2975_v14 = vpop.permute.xlu2 %2974  ;;  %v2711_v43 = vpop.permute.xlu1 %2710 }
 0x4b6   : > { %v2984_v56 = vrot.slane %v2975_v14, 4  ;;  %v2651_v50 = vpop.permute.xlu0 %2650  ;;  %v2720_v32 = vrot.slane %v2711_v43, 4 }
 0x4b7   : > { %v2662_v0 = vrot.slane %v2651_v50, 4 }
 0x4b8   : > { %v2992_v62 = vsel %vm8374_vm0, %v2984_v56, %v2985_v63  ;;  %v2728_v51 = vsel %vm8375_vm15, %v2720_v32, %v2721_v26  ;;  %vm8380_vm15 = vcmask 7168   ;;  %v5554_v63 = vld [vmem:[#allocation3 + $0x64] sm:$0xf]  ;;  %v5168_v32 = vld [vmem:[#allocation3 + $0x50] sm:$0xf] }
 0x4b9   : > { %v2993_v8 = vsel %vm8376_vm14, %v2975_v14, %v2992_v62  ;;  %v2670_v21 = vsel %vm8377_vm1, %v2662_v0, %v2663_v31  ;;  %v2729_v61 = vsel %vm8378_vm7, %v2711_v43, %v2728_v51  ;;  %v5573_v19 = vld [vmem:[#allocation3 + $0xf4] sm:$0xf0]  ;;  %vm8381_vm14 = vmmov %vm8374_vm0  ;;  %vm8383_vm7 = vcmask 121856   ;;  %v5176_v43 = vld [vmem:[#allocation3 + $0x60] sm:$0xf] }
 0x4ba   : > { %3001 = vst [vmem:[#allocation3 + $0xd8] sm:$0xff] %v2993_v8  ;;  %v2671_v41 = vsel %vm8379_vm12, %v2651_v50, %v2670_v21  ;;  %v5249_v11 = vor.u32 %v5573_v19, %v5248_v57  ;;  %v5232_v49 = vld [vmem:[#allocation3 + $0xd0] sm:$0xf]  ;;  %vm8382_vm1 = vmmov %vm8374_vm0  ;;  %v5177_v56 = vor.u32 %v5555_v45, %v5176_v43  ;;  %v5181_v50 = vor.u32 %v5554_v63, %v5178_v3  ;;  %v5552_v31 = vld [vmem:[#allocation3 + $0x54] sm:$0xf] }
 0x4bb   : > { %2680 = vst [vmem:[#allocation3 + $0x10] sm:$0xff] %v2671_v41  ;;  %v5551_v8 = vld [vmem:[#allocation3 + $0x44] sm:$0xf0]  ;;  %v5162_v21 = vld [vmem:[#allocation3 + $0x48] sm:$0xf0] }
 0x4bc   : > { %2737 = vst [vmem:[#allocation3 + $0x38] sm:$0xff] %v2729_v61  ;;  %3425 = vmatpush.bf16.msrb.mxu0 %v5249_v11  ;;  %v5160_v19 = vld [vmem:[#allocation3 + $0x40] sm:$0xf]  ;;  %v5550_v41 = vld [vmem:[#allocation3 + $0x44] sm:$0xf]  ;;  %v2661_v11 = vrot.slane %v7433_v53, 4 }
 0x4bd   : > { %v2839_v12 = vpop.permute.xlu1 %2838  ;;  %v2655_v28 = vpop.permute.xlu2 %2654  ;;  %v5161_v37 = vor.u32 %v5551_v8, %v5160_v19 }
 0x4be   : > { %v2775_v60 = vpop.permute.xlu0 %2774  ;;  %v2848_v15 = vrot.slane %v2839_v12, 4 }
 0x4bf   : > { %v2784_v7 = vrot.slane %v2775_v60, 4 }
 0x4c0   : > { %v2856_v46 = vsel %vm8374_vm0, %v2848_v15, %v2849_v33  ;;  %3426 = vmatpush.bf16.msrb.mxu0 %v5241_v1  ;;  %v5165_v33 = vor.u32 %v5550_v41, %v5162_v21 }
 0x4c1   : > { %v2857_v30 = vsel %vm8380_vm15, %v2839_v12, %v2856_v46  ;;  %v5569_v25 = vld [vmem:[#allocation3 + $0xd4] sm:$0xf0]  ;;  %vm8384_vm15 = vmmov %vm8374_vm0 }
 0x4c2   : > { %2865 = vst [vmem:[#allocation3 + $0x78] sm:$0xff] %v2857_v30  ;;  %v5233_v58 = vor.u32 %v5569_v25, %v5232_v49  ;;  %v5544_v45 = vld [vmem:[#allocation3 + $0x14] sm:$0xf] }
 0x4c3   : > { %v5549_v1 = vld [vmem:[#allocation3 + $0x34] sm:$0xf0]  ;;  %v5154_v46 = vld [vmem:[#allocation3 + $0x38] sm:$0xf0] }
 0x4c4   : > { %3427 = vmatpush.bf16.msrb.mxu0 %v5233_v58  ;;  %v5152_v58 = vld [vmem:[#allocation3 + $0x30] sm:$0xf]  ;;  %v5157_v24 = vor.u32 %v5548_v36, %v5154_v46 }
 0x4c5   : > { %v2777_v20 = vpop.permute.xlu1 %2776  ;;  %v7464_v61 = vpop.permute.xlu2 %2902 }
 0x4c6   : > { %v2645_v27 = vpop.permute.xlu0 %2644  ;;  %v2785_v47 = vrot.slane %v2777_v20, 4  ;;  %v5153_v20 = vor.u32 %v5549_v1, %v5152_v58  ;;  %v2916_v19 = vrot.slane %v7464_v61, 4 }
 0x4c7   : > { %v2659_v5 = vrot.slane %v2645_v27, 4  ;;  %v5146_v27 = vld [vmem:[#allocation3 + $0x28] sm:$0xf0] }
 0x4c8   : > { %v2792_v54 = vsel %vm8381_vm14, %v2784_v7, %v2785_v47  ;;  %3428 = vmatpush.bf16.msrb.mxu0 %v5225_v55  ;;  %vm8385_vm14 = vmmov %vm8379_vm12  ;;  %v5547_v7 = vld [vmem:[#allocation3 + $0x24] sm:$0xf0]  ;;  %v5144_v55 = vld [vmem:[#allocation3 + $0x20] sm:$0xf] }
 0x4c9   : > { %v2666_v10 = vsel %vm8382_vm1, %v2658_v35, %v2659_v5  ;;  %v2793_v38 = vsel %vm8383_vm7, %v2775_v60, %v2792_v54  ;;  %v5557_v13 = vld [vmem:[#allocation3 + $0x74] sm:$0xf0]  ;;  %v5186_v22 = vld [vmem:[#allocation3 + $0x78] sm:$0xf0]  ;;  %v2664_v60 = vrot.slane %v2655_v28, 4  ;;  %vm8386_vm1 = vmmov %vm8379_vm12 }
 0x4ca   : > { %v2667_v18 = vsel %vm8379_vm12, %v7415_v4, %v2666_v10  ;;  %2801 = vst [vmem:[#allocation3 + $0x58] sm:$0xff] %v2793_v38  ;;  %v5185_v16 = vor.u32 %v5557_v13, %v5184_v52  ;;  %v5189_v17 = vor.u32 %v5556_v39, %v5186_v22  ;;  %v5546_v35 = vld [vmem:[#allocation3 + $0x24] sm:$0xf]  ;;  %v5145_v10 = vor.u32 %v5547_v7, %v5144_v55  ;;  %vm8387_vm7 = vmmov %vm8374_vm0  ;;  %v5234_v7 = vld [vmem:[#allocation3 + $0xd8] sm:$0xf0] }
 0x4cb   : > { %2678 = vst [vmem:[#allocation3] sm:$0xff] %v2667_v18  ;;  %v5149_v38 = vor.u32 %v5546_v35, %v5146_v27  ;;  %vm8388_vm12 = vmmov %vm8374_vm0  ;;  %v5568_v35 = vld [vmem:[#allocation3 + $0xd4] sm:$0xf] }
 0x4cc   : > { %3406 = vmatpush.bf16.msrb.mxu2 %v5185_v16  ;;  %3463 = vmatpush.bf16.msrb.mxu3 %v5189_v17 }
 0x4cd   : > { %v7462_v14 = vpop.permute.xlu1 %2912  ;;  %v3093_v13 = vpop.permute.xlu2 %3092 }
 0x4ce   : > { %v2899_v26 = vpop.permute.xlu0 %2898  ;;  %v2921_v39 = vrot.slane %v7462_v14, 4 }
 0x4cf   : > { %v2914_v5 = vrot.slane %v2899_v26, 4 }
 0x4d0   : > { %3407 = vmatpush.bf16.msrb.mxu2 %v5177_v56  ;;  %3464 = vmatpush.bf16.msrb.mxu3 %v5181_v50 }
 0x4d1   : > { %v5553_v4 = vld [vmem:[#allocation3 + $0x54] sm:$0xf0]  ;;  %v5170_v0 = vld [vmem:[#allocation3 + $0x58] sm:$0xf0] }
 0x4d2   : > { %v5169_v62 = vor.u32 %v5553_v4, %v5168_v32  ;;  %v5173_v51 = vor.u32 %v5552_v31, %v5170_v0  ;;  %v5250_v31 = vld [vmem:[#allocation3 + $0xf8] sm:$0xf0]  ;;  %v5537_v0 = vld [vmem:[%s8098_s6 + $0x8] sm:$0xf0]  ;;  %v5128_v21 = vld [vmem:[#allocation3] sm:$0xf] }
 0x4d4   : > { %3408 = vmatpush.bf16.msrb.mxu2 %v5169_v62  ;;  %3465 = vmatpush.bf16.msrb.mxu3 %v5173_v51  ;;  %v3103_v62 = vrot.slane %v3093_v13, 4 }
 0x4d5   : > { %v2647_v57 = vpop.permute.xlu1 %2646 }
 0x4d6   : > { %v2657_v34 = vpop.permute.xlu0 %2656  ;;  %v2660_v12 = vrot.slane %v2647_v57, 4 }
 0x4d7   : > { %v2665_v15 = vrot.slane %v2657_v34, 4 }
 0x4d8   : > { %v2668_v30 = vsel %vm8374_vm0, %v2660_v12, %v2661_v11  ;;  %3409 = vmatpush.bf16.msrb.mxu2 %v5161_v37  ;;  %3466 = vmatpush.bf16.msrb.mxu3 %v5165_v33  ;;  %vm8389_vm0 = vcmask 1039360   ;;  %v5572_v12 = vld [vmem:[#allocation3 + $0xf4] sm:$0xf] }
 0x4d9   : > { %v2672_v49 = vsel %vm8384_vm15, %v2664_v60, %v2665_v15  ;;  %v2669_v25 = vsel %vm8385_vm14, %v2647_v57, %v2668_v30  ;;  %vm8390_vm15 = vmmov %vm8389_vm0  ;;  %v5542_v57 = vld [vmem:[#allocation3 + $0x4] sm:$0xf]  ;;  %v5253_v33 = vor.u32 %v5572_v12, %v5250_v31  ;;  %v7484_v15 = vpop.permute.xlu2 %3082  ;;  %v5242_v30 = vld [vmem:[#allocation3 + $0xe8] sm:$0xf0] }
 0x4da   : > { %v2673_v53 = vsel %vm8386_vm1, %v2655_v28, %v2672_v49  ;;  %2679 = vst [vmem:[#allocation3 + $0x8] sm:$0xff] %v2669_v25  ;;  %v5136_v28 = vld [vmem:[#allocation3 + $0x10] sm:$0xf]  ;;  %vm8391_vm14 = vmmov %vm8387_vm7  ;;  %v5564_v31 = vld [vmem:[#allocation3 + $0xb4] sm:$0xf] }
 0x4db   : > { %2681 = vst [vmem:[#allocation3 + $0x18] sm:$0xff] %v2673_v53  ;;  %vm8392_vm1 = vmmov %vm8387_vm7  ;;  %v5216_v25 = vld [vmem:[#allocation3 + $0xb0] sm:$0xf]  ;;  %v5570_v53 = vld [vmem:[#allocation3 + $0xe4] sm:$0xf] }
 0x4dc   : > { %3410 = vmatpush.bf16.msrb.mxu2 %v5153_v20  ;;  %3467 = vmatpush.bf16.msrb.mxu3 %v5157_v24  ;;  %v5245_v20 = vor.u32 %v5570_v53, %v5242_v30  ;;  %v5560_v53 = vld [vmem:[#allocation3 + $0x94] sm:$0xf] }
 0x4dd   : > { %v2901_v47 = vpop.permute.xlu1 %2900 }
 0x4de   : > { %v2911_v54 = vpop.permute.xlu0 %2910  ;;  %v2915_v52 = vrot.slane %v2901_v47, 4 }
 0x4df   : > { %v2920_v22 = vrot.slane %v2911_v54, 4 }
 0x4e0   : > { %v2922_v18 = vsel %vm8387_vm7, %v2914_v5, %v2915_v52  ;;  %3411 = vmatpush.bf16.msrb.mxu2 %v5145_v10  ;;  %3468 = vmatpush.bf16.msrb.mxu3 %v5149_v38  ;;  %vm8393_vm7 = vcmask 908288   ;;  %v5237_v5 = vor.u32 %v5568_v35, %v5234_v7 }
 0x4e1   : > { %v2928_v16 = vsel %vm8388_vm12, %v2920_v22, %v2921_v39  ;;  %v2923_v17 = vsel %vm8389_vm0, %v2899_v26, %v2922_v18  ;;  %v5543_v14 = vld [vmem:[#allocation3 + $0x4] sm:$0xf0]  ;;  %v5130_v32 = vld [vmem:[#allocation3 + $0x8] sm:$0xf0]  ;;  %v5104_v26 = vld [vmem:[%s8098_s6] sm:$0xf]  ;;  %v3089_v13 = vpop.permute.xlu2 %3088 }
 0x4e2   : > { %v2929_v3 = vsel %vm8390_vm15, %v2911_v54, %v2928_v16  ;;  %2934 = vst [vmem:[#allocation3 + $0xa0] sm:$0xff] %v2923_v17  ;;  %v5545_v43 = vld [vmem:[#allocation3 + $0x14] sm:$0xf0]  ;;  %v5138_v63 = vld [vmem:[#allocation3 + $0x18] sm:$0xf0]  ;;  %v5129_v11 = vor.u32 %v5543_v14, %v5128_v21  ;;  %v5133_v34 = vor.u32 %v5542_v57, %v5130_v32  ;;  %v5105_v60 = vor.u32 %v5537_v0, %v5104_v26  ;;  %vm8394_vm12 = vmmov %vm8389_vm0 }
 0x4e3   : > { %2937 = vst [vmem:[#allocation3 + $0xb8] sm:$0xff] %v2929_v3  ;;  %v5137_v56 = vor.u32 %v5545_v43, %v5136_v28  ;;  %v5141_v50 = vor.u32 %v5544_v45, %v5138_v63  ;;  %vm8395_vm0 = vmmov %vm8392_vm1  ;;  %v5226_v54 = vld [vmem:[#allocation3 + $0xc8] sm:$0xf0]  ;;  %v5566_v22 = vld [vmem:[#allocation3 + $0xc4] sm:$0xf]  ;;  %v3101_v43 = vrot.slane %v3089_v13, 4 }
 0x4e4   : > { %vm8396_vm15 = vmmov %vm8393_vm7  ;;  %v5561_v18 = vld [vmem:[#allocation3 + $0x94] sm:$0xf0]  ;;  %v5229_v16 = vor.u32 %v5566_v22, %v5226_v54  ;;  %v5540_v3 = vld [vmem:[%s8098_s6 + $0x20] sm:$0xf0]  ;;  %v3098_v14 = vrot.slane %v7484_v15, 4 }
 0x4e5   : > { %3412 = vmatpush.bf16.msrb.mxu2 %v5137_v56  ;;  %3469 = vmatpush.bf16.msrb.mxu3 %v5141_v50  ;;  %v3091_v4 = vpop.permute.xlu1 %3090  ;;  %v5116_v45 = vld [vmem:[%s8098_s6 + $0x18] sm:$0xf]  ;;  %v5200_v56 = vld [vmem:[#allocation3 + $0x90] sm:$0xf]  ;;  %v5192_v26 = vld [vmem:[#allocation3 + $0x80] sm:$0xf] }
 0x4e6   : > { %v2905_v51 = vpop.permute.xlu0 %2904  ;;  %v3102_v8 = vrot.slane %v3091_v4, 4  ;;  %v5559_v0 = vld [vmem:[#allocation3 + $0x84] sm:$0xf0]  ;;  %v5117_v57 = vor.u32 %v5540_v3, %v5116_v45  ;;  %v5558_v54 = vld [vmem:[#allocation3 + $0x84] sm:$0xf] }
 0x4e7   : > { %v2917_v41 = vrot.slane %v2905_v51, 4  ;;  %v5536_v51 = vld [vmem:[%s8098_s6 + $0x4] sm:$0xf]  ;;  %v5118_v13 = vld [vmem:[%s8098_s6 + $0x24] sm:$0xf0] }
 0x4e8   : > { %v3110_v37 = vsel %vm8391_vm14, %v3102_v8, %v3103_v62  ;;  %vm8397_vm14 = vmmov %vm8395_vm0  ;;  %v5106_v8 = vld [vmem:[%s8098_s6 + $0xc] sm:$0xf0]  ;;  %v5124_v22 = vld [vmem:[%s8098_s6 + $0x20] sm:$0xf] }
 0x4e9   : > { %v2924_v1 = vsel %vm8392_vm1, %v2916_v19, %v2917_v41  ;;  %v3111_v46 = vsel %vm8393_vm7, %v3091_v4, %v3110_v37  ;;  %3413 = vmatpush.bf16.msrb.mxu2 %v5129_v11  ;;  %3470 = vmatpush.bf16.msrb.mxu3 %v5133_v34  ;;  %v5208_v52 = vld [vmem:[#allocation3 + $0xa0] sm:$0xf]  ;;  %v5201_v4 = vor.u32 %v5561_v18, %v5200_v56  ;;  %vm8398_vm1 = vmmov %vm8395_vm0  ;;  %v5541_v18 = vld [vmem:[%s8098_s6 + $0x28] sm:$0xf0] }
 0x4ea   : > { %v2925_v49 = vsel %vm8394_vm12, %v7464_v61, %v2924_v1  ;;  %v5565_v58 = vld [vmem:[#allocation3 + $0xb4] sm:$0xf0]  ;;  %3120 = vst [vmem:[#allocation3 + $0x110] sm:$0xff] %v3111_v46  ;;  %v5218_v28 = vld [vmem:[#allocation3 + $0xb8] sm:$0xf0]  ;;  %vm8399_vm12 = vmmov %vm8393_vm7  ;;  %v5193_v1 = vor.u32 %v5559_v0, %v5192_v26 }
 0x4eb   : > { %2935 = vst [vmem:[#allocation3 + $0xa8] sm:$0xff] %v2925_v49  ;;  %v5217_v36 = vor.u32 %v5565_v58, %v5216_v25  ;;  %v5221_v21 = vor.u32 %v5564_v31, %v5218_v28  ;;  %v5562_v49 = vld [vmem:[#allocation3 + $0xa4] sm:$0xf]  ;;  %v5109_v25 = vor.u32 %v5536_v51, %v5106_v8  ;;  %v3173_v31 = vpop.permute.xlu2 %3172 }
 0x4ec   : > { %3414 = vmatmul.bf16.vlgmr.msrb.gmra.mxu2 %v5105_v60  ;;  %3471 = vmatmul.bf16.vlgmr.msrb.gmra.mxu3 %v5105_v60 }
 0x4ed   : > { %3482 = vmatpush.bf16.msra.mxu2 %v5253_v33  ;;  %3429 = vmatpush.bf16.msrb.mxu0 %v5217_v36  ;;  %v3097_v24 = vpop.permute.xlu1 %3096  ;;  %v5202_v36 = vld [vmem:[#allocation3 + $0x98] sm:$0xf0] }
 0x4ee   : > { %v3095_v27 = vpop.permute.xlu0 %3094  ;;  %v3105_v47 = vrot.slane %v3097_v24, 4  ;;  %v5112_v24 = vld [vmem:[%s8098_s6 + $0x8] sm:$0xf] }
 0x4ef   : > { %v3104_v55 = vrot.slane %v3095_v27, 4 }
 0x4f1   : > { %3483 = vmatpush.bf16.msra.mxu2 %v5245_v20  ;;  %v3112_v61 = vsel %vm8395_vm0, %v3104_v55, %v3105_v47  ;;  %v5264_v11 = vld [vmem:[#allocation3 + $0x110] sm:$0xf]  ;;  %v5576_v34 = vld [vmem:[#allocation3 + $0x114] sm:$0xf]  ;;  %v5194_v20 = vld [vmem:[#allocation3 + $0x88] sm:$0xf0] }
 0x4f2   : > { %v5563_v10 = vld [vmem:[#allocation3 + $0xa4] sm:$0xf0]  ;;  %v3113_v38 = vsel %vm8396_vm15, %v3095_v27, %v3112_v61  ;;  %v5210_v12 = vld [vmem:[#allocation3 + $0xa8] sm:$0xf0]  ;;  %v5538_v47 = vld [vmem:[%s8098_s6 + $0x10] sm:$0xf0] }
 0x4f3   : > { %v5209_v39 = vor.u32 %v5563_v10, %v5208_v52  ;;  %3121 = vst [vmem:[#allocation3 + $0x118] sm:$0xff] %v3113_v38  ;;  %v5213_v58 = vor.u32 %v5562_v49, %v5210_v12  ;;  %v5197_v52 = vor.u32 %v5558_v54, %v5194_v20  ;;  %v5113_v10 = vor.u32 %v5538_v47, %v5112_v24  ;;  %v5539_v38 = vld [vmem:[%s8098_s6 + $0x1c] sm:$0xf] }
 0x4f4   : > { %vm8400_vm0 = vcmask 261120  }
 0x4f5   : > { %3484 = vmatpush.bf16.msra.mxu2 %v5237_v5  ;;  %3430 = vmatpush.bf16.msrb.mxu0 %v5209_v39  ;;  %v3087_v17 = vpop.permute.xlu1 %3086  ;;  %v5121_v39 = vor.u32 %v5539_v38, %v5118_v13  ;;  %vm8401_vm15 = vmmov %vm8400_vm0  ;;  %v5718_v13 = vld [vmem:[%s6016_s19 + $0x18] sm:$0xff] }
 0x4f6   : > { %v3085_v63 = vpop.permute.xlu0 %3084  ;;  %v3100_v50 = vrot.slane %v3087_v17, 4 }
 0x4f7   : > { %v3099_v32 = vrot.slane %v3085_v63, 4 }
 0x4f8   : > { %v3108_v62 = vsel %vm8397_vm14, %v3100_v50, %v3101_v43  ;;  %vm8402_vm14 = vmmov %vm8400_vm0 }
 0x4f9   : > { %3485 = vmatpush.bf16.msra.mxu2 %v5229_v16  ;;  %v3106_v19 = vsel %vm8398_vm1, %v3098_v14, %v3099_v32  ;;  %3431 = vmatpush.bf16.msrb.mxu0 %v5201_v4  ;;  %v3109_v41 = vsel %vm8393_vm7, %v3087_v17, %v3108_v62  ;;  %v5125_v16 = vor.u32 %v5541_v18, %v5124_v22  ;;  %vm8403_vm1 = vmmov %vm8400_vm0  ;;  %vm8413_vm7 = vcmask 7168  }
 0x4fa   : > { %v3107_v37 = vsel %vm8399_vm12, %v7484_v15, %v3106_v19  ;;  %3119 = vst [vmem:[#allocation3 + $0x108] sm:$0xff] %v3109_v41  ;;  %v5577_v33 = vld [vmem:[#allocation3 + $0x114] sm:$0xf0]  ;;  %v5266_v60 = vld [vmem:[#allocation3 + $0x118] sm:$0xf0]  ;;  %v5205_v15 = vor.u32 %v5560_v53, %v5202_v36 }
 0x4fb   : > { %3118 = vst [vmem:[#allocation3 + $0x100] sm:$0xff] %v3107_v37  ;;  %v5265_v46 = vor.u32 %v5577_v33, %v5264_v11  ;;  %v5269_v30 = vor.u32 %v5576_v34, %v5266_v60 }
 0x4fc   : > { %3419 = vmatmul.bf16.gmra.mxu2 %v5117_v57  ;;  %3476 = vmatmul.bf16.gmra.mxu3 %v5117_v57 }
 0x4fd   : > { %3486 = vmatpush.bf16.msra.mxu2 %v5221_v21  ;;  %3432 = vmatpush.bf16.msrb.mxu0 %v5193_v1 }
 0x4fe   : > { %3450 = vmatpush.bf16.msrb.mxu1 %v5265_v46  ;;  %v3183_v32 = vpop.permute.xlu0 %3182 }
 0x500   : > { %3433 = vmatmul.bf16.vlgmr.msrb.gmra.mxu0 %v5109_v25 }
 0x501   : > { %3507 = vmatpush.bf16.msra.mxu0 %v5269_v30  ;;  %3487 = vmatpush.bf16.msra.mxu2 %v5213_v58  ;;  %v5575_v7 = vld [vmem:[#allocation3 + $0x104] sm:$0xf0]  ;;  %v5258_v27 = vld [vmem:[#allocation3 + $0x108] sm:$0xf0]  ;;  %v5715_v30 = vld [vmem:[%s6016_s19] sm:$0xff] }
 0x502   : > { %v5256_v55 = vld [vmem:[#allocation3 + $0x100] sm:$0xf]  ;;  %v5574_v35 = vld [vmem:[#allocation3 + $0x104] sm:$0xf]  ;;  %v5716_v58 = vld [vmem:[%s6016_s19 + $0x8] sm:$0xff] }
 0x503   : > { %v5257_v5 = vor.u32 %v5575_v7, %v5256_v55  ;;  %v5261_v61 = vor.u32 %v5574_v35, %v5258_v27 }
 0x505   : > { %3488 = vmatpush.bf16.msra.mxu2 %v5205_v15  ;;  %3451 = vmatpush.bf16.msrb.mxu1 %v5257_v5 }
 0x506   : > { %3508 = vmatpush.bf16.msra.mxu0 %v5261_v61  ;;  %v3178_v19 = vpop.permute.xlu0 %3177 }
 0x508   : > { %5270 = vmatmul.msk.bf16.vlgmr.msrb.gmra.mxu1 %vm8400_vm0, %v5113_v10  ;;  %vm8415_vm0 = vcmask 121856  }
 0x509   : > { %3489 = vmatpush.bf16.msra.mxu2 %v5197_v52  ;;  %v5717_v52 = vld [vmem:[%s6016_s19 + $0x10] sm:$0xff] }
 0x50c   : > { %3490 = vmatmul.bf16.vlgmr.msra.gmra.mxu2 %v5109_v25 }
 0x510   : > { %3438 = vmatmul.bf16.gmra.mxu0 %v5121_v39 }
 0x518   : > { %5271 = vmatmul.msk.bf16.gmra.mxu1 %vm8401_vm15, %v5125_v16 }
 0x51c   : > { %3495 = vmatmul.bf16.gmra.mxu2 %v5121_v39 }
 0x520   : > { %5272 = vmatmul.msk.bf16.vlgmr.msra.gmra.mxu0 %vm8402_vm14, %v5113_v10 }
 0x530   : > { %5273 = vmatmul.msk.bf16.gmra.mxu0 %vm8403_vm1, %v5125_v16  ;;  %v3188_v16 = vpop.permute.xlu1 %3187  ;;  %vm8419_vm1 = vcmask 924672  }
 0x56f   : > { %v3415_v17 = vpop.f32.mrf.mxu2  ;;  %v3472_v50 = vpop.f32.mrf.mxu3 }
 0x570   : > { %v3416_v0 = vadd.f32 %v3415_v17, %v3173_v31  ;;  %v3473_v51 = vadd.f32 %v3472_v50, %v3173_v31 }
 0x577   : > { %v3417_v28 = vpop.f32.mrf.mxu2  ;;  %v3474_v8 = vpop.f32.mrf.mxu3 }
 0x578   : > { %v3418_v12 = vadd.f32 %v3417_v28, %v3178_v19  ;;  %v3475_v46 = vadd.f32 %v3474_v8, %v3178_v19 }
 0x57d   : > { %v3434_v45 = vpop.f32.mrf.mxu0 }
 0x57e   : > { %v3435_v62 = vadd.f32 %v3434_v45, %v3416_v0 }
 0x57f   : > { %v3420_v3 = vpop.f32.mrf.mxu2  ;;  %v3477_v53 = vpop.f32.mrf.mxu3 }
 0x580   : > { %v3421_v27 = vadd.f32 %v3420_v3, %v3183_v32  ;;  %v3478_v54 = vadd.f32 %v3477_v53, %v3183_v32 }
 0x585   : > { %v3436_v43 = vpop.f32.mrf.mxu0  ;;  %v3453_v14 = vpop.f32.mrf.mxu1 }
 0x586   : > { %v3454_v21 = vadd.f32 %v3453_v14, %v3435_v62  ;;  %v3437_v60 = vadd.f32 %v3436_v43, %v3418_v12 }
 0x587   : > { %v3422_v63 = vpop.f32.mrf.mxu2  ;;  %v3479_v32 = vpop.f32.mrf.mxu3 }
 0x588   : > { %v3520_v37 = vmax.f32 %v3454_v21, 0.0  ;;  %v3423_v43 = vadd.f32 %v3422_v63, %v3188_v16  ;;  %v3480_v62 = vadd.f32 %v3479_v32, %v3188_v16 }
 0x58a   : > { %v7533_v49 = vadd.f32 %v5715_v30, %v3520_v37  ;;  %v5721_v30 = vld [vmem:[%s6016_s19 + $0x30] sm:$0xff] }
 0x58d   : > { %v3439_v56 = vpop.f32.mrf.mxu0  ;;  %v3455_v57 = vpop.f32.mrf.mxu1 }
 0x58e   : > { %v3456_v25 = vadd.f32 %v3455_v57, %v3437_v60  ;;  %v3440_v5 = vadd.f32 %v3439_v56, %v3421_v27  ;;  %v5720_v57 = vld [vmem:[%s6016_s19 + $0x28] sm:$0xff] }
 0x58f   : > { %v3491_v4 = vpop.f32.mrf.mxu2 }
 0x590   : > { %v3492_v41 = vadd.f32 %v3491_v4, %v3473_v51  ;;  %v3522_v47 = vmax.f32 %v3456_v25, 0.0  ;;  %v5719_v51 = vld [vmem:[%s6016_s19 + $0x20] sm:$0xff] }
 0x592   : > { %v7547_v10 = vadd.f32 %v5717_v52, %v3522_v47 }
 0x595   : > { %v3441_v26 = vpop.f32.mrf.mxu0  ;;  %v3458_v24 = vpop.f32.mrf.mxu1 }
 0x596   : > { %v3459_v38 = vadd.f32 %v3458_v24, %v3440_v5  ;;  %v3442_v31 = vadd.f32 %v3441_v26, %v3423_v43 }
 0x597   : > { %v3493_v34 = vpop.f32.mrf.mxu2 }
 0x598   : > { %v3494_v20 = vadd.f32 %v3493_v34, %v3475_v46  ;;  %v3524_v56 = vmax.f32 %v3459_v38, 0.0 }
 0x59a   : > { %v7564_v8 = vadd.f32 %v5719_v51, %v3524_v56  ;;  %v7640_v56 = vpop.permute.xlu2 %3954 }
 0x59d   : > { %v3510_v11 = vpop.f32.mrf.mxu0  ;;  %v3460_v4 = vpop.f32.mrf.mxu1 }
 0x59e   : > { %v3511_v33 = vadd.f32 %v3510_v11, %v3492_v41  ;;  %v3461_v21 = vadd.f32 %v3460_v4, %v3442_v31 }
 0x59f   : > { %v3496_v35 = vpop.f32.mrf.mxu2 }
 0x5a0   : > { %v3521_v1 = vmax.f32 %v3511_v33, 0.0  ;;  %v3497_v18 = vadd.f32 %v3496_v35, %v3478_v54  ;;  %v3526_v33 = vmax.f32 %v3461_v21, 0.0 }
 0x5a2   : > { %v7536_v36 = vadd.f32 %v5716_v58, %v3521_v1  ;;  %v7585_v25 = vadd.f32 %v5721_v30, %v3526_v33  ;;  %v5722_v58 = vld [vmem:[%s6016_s19 + $0x38] sm:$0xff]  ;;  %v7648_v32 = vpop.permute.xlu2 %3902 }
 0x5a4   : > { %v7540_v15 = vpack.c.bf16 %v7536_v36, %v7533_v49 }
 0x5a5   : > { %v3512_v7 = vpop.f32.mrf.mxu0 }
 0x5a6   : > { %3540 = vst [vmem:[#allocation2 + $0x4] sm:$0xff] %v7540_v15  ;;  %v3513_v55 = vadd.f32 %v3512_v7, %v3494_v20  ;;  %3944 = vrot.lane.b32.xlu0 %v7540_v15, %s8404_s0  ;;  %v3872_v7 = vsel %vm6325_vm3, %v7540_v15, 0  ;;  %v3808_v47 = vsel %vm8338_vm8, %v7540_v15, 0 }
 0x5a7   : > { %3796 = vst [vmem:[#allocation3 + $0x80] sm:$0xff] %v7540_v15  ;;  %v3498_v63 = vpop.f32.mrf.mxu2 }
 0x5a8   : > { %v3523_v61 = vmax.f32 %v3513_v55, 0.0  ;;  %v3499_v26 = vadd.f32 %v3498_v63, %v3480_v62 }
 0x5aa   : > { %v7550_v39 = vadd.f32 %v5718_v13, %v3523_v61  ;;  %v7668_v21 = vpop.permute.xlu2 %3890 }
 0x5ac   : > { %v7554_v22 = vpack.c.bf16 %v7550_v39, %v7547_v10 }
 0x5ad   : > { %v3515_v17 = vpop.f32.mrf.mxu0  ;;  %v3609_v28 = vld [vmem:[#allocation2 + $0x8] sm:$0xf]  ;;  %v3728_v3 = vld [vmem:[#allocation2] sm:$0xff] }
 0x5ae   : > { %v3729_v45 = vld [vmem:[#allocation2 + $0x8] sm:$0xf]  ;;  %3541 = vst [vmem:[#allocation2 + $0x14] sm:$0xff] %v7554_v22  ;;  %v3516_v50 = vadd.f32 %v3515_v17, %v3497_v18  ;;  %3626 = vrot.lane.b32.xlu1 %v3609_v28, %s8332_s15  ;;  %3624 = vrot.lane.b32.xlu0 %v3728_v3, %s8332_s15  ;;  %v3736_v12 = vsel %vm6221_vm11, %v3728_v3, 0  ;;  %v3672_v1 = vsel %vm6245_vm4, %v3728_v3, 0  ;;  %v3552_v61 = vsel %vm8339_vm9, %v3728_v3, 0 }
 0x5af   : > { %v3737_v14 = vsel %vm6119_vm10, %v3729_v45, 0  ;;  %3797 = vst [vmem:[#allocation3 + $0x88] sm:$0xff] %v7554_v22  ;;  %v3665_v41 = vld [vmem:[#allocation2 + $0x8] sm:$0xf]  ;;  %v3810_v13 = vsel %vm8338_vm8, %v7554_v22, 0  ;;  %v3874_v18 = vsel %vm6325_vm3, %v7554_v22, 0 }
 0x5b0   : > { %3754 = vrot.lane.b32.xlu2 %v3737_v14, %s8333_s17  ;;  %v3525_v0 = vmax.f32 %v3516_v50, 0.0  ;;  %v3673_v37 = vsel %vm8335_vm13, %v3665_v41, 0  ;;  %v3545_v20 = vld [vmem:[#allocation2 + $0x8] sm:$0xf] }
 0x5b1   : > { %v3553_v27 = vsel %vm8336_vm5, %v3545_v20, 0 }
 0x5b2   : > { %v7567_v19 = vadd.f32 %v5720_v57, %v3525_v0  ;;  %v7658_v0 = vpop.permute.xlu0 %3950  ;;  %v7671_v57 = vpop.permute.xlu1 %3958 }
 0x5b3   : > { %v7682_v33 = vpop.permute.xlu2 %3830 }
 0x5b4   : > { %v7571_v11 = vpack.c.bf16 %v7567_v19, %v7564_v8 }
 0x5b5   : > { %v3517_v34 = vpop.f32.mrf.mxu0  ;;  %v3731_v55 = vld [vmem:[#allocation2 + $0x18] sm:$0xf]  ;;  %v3666_v54 = vld [vmem:[#allocation2 + $0x10] sm:$0xff] }
 0x5b6   : > { %3542 = vst [vmem:[#allocation2 + $0x24] sm:$0xff] %v7571_v11  ;;  %v3518_v60 = vadd.f32 %v3517_v34, %v3499_v26  ;;  %3752 = vrot.lane.b32.xlu1 %v3736_v12, %s8333_s17  ;;  %3690 = vrot.lane.b32.xlu0 %v3673_v37, %s8334_s24  ;;  %v3739_v35 = vsel %vm6119_vm10, %v3731_v55, 0  ;;  %v3611_v5 = vld [vmem:[#allocation2 + $0x18] sm:$0xf]  ;;  %v3674_v52 = vsel %vm6245_vm4, %v3666_v54, 0  ;;  %v3738_v38 = vsel %vm6221_vm11, %v3666_v54, 0 }
 0x5b7   : > { %3798 = vst [vmem:[#allocation3 + $0x90] sm:$0xff] %v7571_v11  ;;  %v3667_v17 = vld [vmem:[#allocation2 + $0x18] sm:$0xf]  ;;  %v3554_v28 = vsel %vm8339_vm9, %v3666_v54, 0  ;;  %v3812_v4 = vsel %vm8338_vm8, %v7571_v11, 0  ;;  %v3876_v51 = vsel %vm6325_vm3, %v7571_v11, 0 }
 0x5b8   : > { %3688 = vrot.lane.b32.xlu2 %v3672_v1, %s8334_s24  ;;  %v3527_v46 = vmax.f32 %v3518_v60, 0.0  ;;  %v3675_v3 = vsel %vm8335_vm13, %v3667_v17, 0  ;;  %v3996_v59 = vsel %vm8346_vm6, %v7571_v11, 0  ;;  %v3547_v17 = vld [vmem:[#allocation2 + $0x18] sm:$0xf] }
 0x5ba   : > { %v7588_v53 = vadd.f32 %v5722_v58, %v3527_v46  ;;  %v7673_v26 = vpop.permute.xlu0 %3898  ;;  %v3947_v46 = vpop.permute.xlu1 %3946 }
 0x5bc   : > { %v7592_v24 = vpack.c.bf16 %v7588_v53, %v7585_v25 }
 0x5bd   : > { %v3733_v16 = vld [vmem:[#allocation2 + $0x28] sm:$0xf]  ;;  %v3612_v43 = vld [vmem:[#allocation2 + $0x20] sm:$0xff] }
 0x5be   : > { %3543 = vst [vmem:[#allocation2 + $0x34] sm:$0xff] %v7592_v24  ;;  %3888 = vrot.lane.b32.xlu1 %v3872_v7, %s8364_s28  ;;  %3570 = vrot.lane.b32.xlu0 %v3553_v27, %s8337_s14  ;;  %v3741_v45 = vsel %vm6119_vm10, %v3733_v16, 0  ;;  %v3676_v50 = vsel %vm6245_vm4, %v3612_v43, 0  ;;  %v3613_v14 = vld [vmem:[#allocation2 + $0x28] sm:$0xf]  ;;  %v3740_v31 = vsel %vm6221_vm11, %v3612_v43, 0 }
 0x5bf   : > { %3799 = vst [vmem:[#allocation3 + $0x98] sm:$0xff] %v7592_v24  ;;  %v3669_v63 = vld [vmem:[#allocation2 + $0x28] sm:$0xf]  ;;  %v3556_v34 = vsel %vm8339_vm9, %v3612_v43, 0  ;;  %v3878_v9 = vsel %vm6325_vm3, %v7592_v24, 0  ;;  %v3814_v29 = vsel %vm8338_vm8, %v7592_v24, 0 }
 0x5c0   : > { %3824 = vrot.lane.b32.xlu2 %v3808_v47, %s8304_s26  ;;  %v3677_v62 = vsel %vm8335_vm13, %v3669_v63, 0  ;;  %v3549_v41 = vld [vmem:[#allocation2 + $0x28] sm:$0xf]  ;;  %v3991_v16 = vld [vmem:[#allocation2 + $0x3c] sm:$0xf]  ;;  %vm8410_vm8 = vcmask 130048  }
 0x5c1   : > { %v3557_v37 = vsel %vm8336_vm5, %v3549_v41, 0 }
 0x5c2   : > { %v7686_v20 = vpop.permute.xlu0 %3838  ;;  %v7700_v55 = vpop.permute.xlu1 %3894 }
 0x5c5   : > { %v3614_v12 = vld [vmem:[#allocation2 + $0x30] sm:$0xff]  ;;  %v3671_v60 = vld [vmem:[#allocation2 + $0x38] sm:$0xf] }
 0x5c6   : > { %3758 = vrot.lane.b32.xlu1 %v3739_v35, %s8333_s17  ;;  %3630 = vrot.lane.b32.xlu0 %v3611_v5, %s8332_s15  ;;  %v3735_v1 = vld [vmem:[#allocation2 + $0x38] sm:$0xf]  ;;  %v3679_v58 = vsel %vm8335_vm13, %v3671_v60, 0  ;;  %v3742_v47 = vsel %vm6221_vm11, %v3614_v12, 0  ;;  %v3678_v44 = vsel %vm6245_vm4, %v3614_v12, 0  ;;  %vm8407_vm11 = vcmask 916480  }
 0x5c7   : > { %v3615_v30 = vld [vmem:[#allocation2 + $0x38] sm:$0xf]  ;;  %v3743_v7 = vsel %vm6119_vm10, %v3735_v1, 0  ;;  %vm8405_vm10 = vcmask 1043456   ;;  %vm8408_vm4 = vcmask 1039360   ;;  %v3994_v60 = vsel %vm8346_vm6, %v7554_v22, 0  ;;  %vm8416_vm15 = vmmov %vm8407_vm11 }
 0x5c8   : > { %3568 = vrot.lane.b32.xlu2 %v3552_v61, %s8337_s14  ;;  %vm8406_vm3 = vmmov %vm8405_vm10  ;;  %v3551_v41 = vld [vmem:[#allocation2 + $0x38] sm:$0xf]  ;;  %v3998_v1 = vsel %vm8346_vm6, %v7592_v24, 0 }
 0x5c9   : > { %vm8409_vm13 = vmmov %vm8406_vm3 }
 0x5ca   : > { %v3827_v35 = vpop.permute.xlu0 %3826  ;;  %v7718_v61 = vpop.permute.xlu1 %3834  ;;  %vm8414_vm12 = vmmov %vm8406_vm3 }
 0x5cb   : > { %vm8418_vm14 = vmmov %vm8406_vm3 }
 0x5ce   : > { %3692 = vrot.lane.b32.xlu1 %v3674_v52, %s8334_s24  ;;  %3756 = vrot.lane.b32.xlu0 %v3738_v38, %s8333_s17  ;;  %v3961_v52 = vrot.slane %v3947_v46, 4 }
 0x5d0   : > { %3948 = vrot.lane.b32.xlu2 %v7554_v22, %s8404_s0  ;;  %v3963_v22 = vrot.slane %v7658_v0, 4  ;;  %v3992_v0 = vsel %vm8346_vm6, %v7540_v15, 0  ;;  %vm8417_vm6 = vmmov %vm8406_vm3 }
 0x5d6   : > { %3828 = vrot.lane.b32.xlu1 %v3810_v13, %s8304_s26  ;;  %3892 = vrot.lane.b32.xlu0 %v3874_v18, %s8364_s28  ;;  %v3841_v13 = vrot.slane %v3827_v35, 4 }
 0x5d8   : > { %3628 = vrot.lane.b32.xlu2 %v3666_v54, %s8332_s15 }
 0x5de   : > { %3572 = vrot.lane.b32.xlu1 %v3554_v28, %s8337_s14  ;;  %3762 = vrot.lane.b32.xlu0 %v3741_v45, %s8333_s17 }
 0x5e0   : > { %3694 = vrot.lane.b32.xlu2 %v3675_v3, %s8334_s24 }
 0x5e6   : > { %3952 = vrot.lane.b32.xlu1 %v7571_v11, %s8404_s0  ;;  %3696 = vrot.lane.b32.xlu0 %v3676_v50, %s8334_s24  ;;  %v3558_v11 = vsel %vm8339_vm9, %v3614_v12, 0  ;;  %v3999_v50 = vsel %vm8345_vm2, %v3991_v16, 0  ;;  %vm8412_vm9 = vmmov %vm8406_vm3 }
 0x5e8   : > { %3634 = vrot.lane.b32.xlu2 %v3613_v14, %s8332_s15  ;;  %v3555_v14 = vsel %vm8336_vm5, %v3547_v17, 0 }
 0x5ee   : > { %3632 = vrot.lane.b32.xlu1 %v3612_v43, %s8332_s15  ;;  %3832 = vrot.lane.b32.xlu0 %v3812_v4, %s8304_s26  ;;  %v3997_v43 = vsel %vm8345_vm2, %v3989_v23, 0 }
 0x5f0   : > { %3760 = vrot.lane.b32.xlu2 %v3740_v31, %s8333_s17 }
 0x5f6   : > { %3698 = vrot.lane.b32.xlu1 %v3677_v62, %s8334_s24  ;;  %3956 = vrot.lane.b32.xlu0 %v7592_v24, %s8404_s0 }
 0x5f8   : > { %3896 = vrot.lane.b32.xlu2 %v3876_v51, %s8364_s28 }
 0x5fe   : > { %3576 = vrot.lane.b32.xlu1 %v3556_v34, %s8337_s14  ;;  %3636 = vrot.lane.b32.xlu0 %v3614_v12, %s8332_s15 }
 0x600   : > { %3578 = vrot.lane.b32.xlu2 %v3557_v37, %s8337_s14  ;;  %v3559_v37 = vsel %vm8336_vm5, %v3551_v41, 0  ;;  %vm8411_vm5 = vmmov %vm8406_vm3 }
 0x606   : > { %3638 = vrot.lane.b32.xlu1 %v3615_v30, %s8332_s15  ;;  %3702 = vrot.lane.b32.xlu0 %v3679_v58, %s8334_s24 }
 0x608   : > { %3766 = vrot.lane.b32.xlu2 %v3743_v7, %s8333_s17 }
 0x60a   : > { %v7693_v27 = vpop.permute.xlu2 %3754 }
 0x60b   : > { %v3769_v42 = vrot.slane %v7693_v27, 4 }
 0x60e   : > { %3764 = vrot.lane.b32.xlu1 %v3742_v47, %s8333_s17  ;;  %4016 = vrot.lane.b32.xlu0 %v3996_v59, %s8347_s29 }
 0x610   : > { %3700 = vrot.lane.b32.xlu2 %v3678_v44, %s8334_s24  ;;  %s8471_s24 = sld [smem:[#allocation12_spill]] }
 0x612   : > { %v3689_v5 = vpop.permute.xlu2 %3688 }
 0x613   : > { %v3704_v58 = vrot.slane %v3689_v5, 4 }
 0x616   : > { %3900 = vrot.lane.b32.xlu1 %v3878_v9, %s8364_s28  ;;  %3580 = vrot.lane.b32.xlu0 %v3558_v11, %s8337_s14  ;;  %v3985_v9 = vld [vmem:[#allocation2 + $0xc] sm:$0xf] }
 0x617   : > { %v4093_v11 = vld [vmem:[%s8101_s9 + $0x8] sm:$0xff] }
 0x618   : > { %3836 = vrot.lane.b32.xlu2 %v3814_v29, %s8304_s26  ;;  %v3945_v54 = vpop.permute.xlu0 %3944  ;;  %s8470_s26 = sshll.u32 %s6010_s18, 6 }
 0x619   : > { %v3960_v40 = vrot.slane %v3945_v54, 4  ;;  %s8029_s17 = scalar_lea.vmem [#allocation7], %s8470_s26 }
 0x61a   : > { %v3825_v38 = vpop.permute.xlu2 %3824  ;;  %s4673_s25 = sshll.u32 %s8029_s17, 4  ;;  %s4674_s25 = int_to_ptr.vmem [resolvable:$true] %s4673_s25 }
 0x61b   : > { %v3840_v18 = vrot.slane %v3825_v38, 4  ;;  %v3968_v28 = vsel %vm8405_vm10, %v3960_v40, %v3961_v52  ;;  %vm8420_vm10 = vcmask 138240  }
 0x61c   : > { %v3969_v45 = vsel %vm8407_vm11, %v3945_v54, %v3968_v28  ;;  %vm8422_vm11 = vmmov %vm8406_vm3 }
 0x61d   : > { %v3848_v6 = vsel %vm8406_vm3, %v3840_v18, %v3841_v13  ;;  %3980 = vst [vmem:[#allocation3 + $0xe0] sm:$0xff] %v3969_v45  ;;  %v4092_v45 = vld [vmem:[%s8101_s9] sm:$0xff] }
 0x61e   : > { %v3849_v3 = vsel %vm8408_vm4, %v3825_v38, %v3848_v6  ;;  %4018 = vrot.lane.b32.xlu1 %v3997_v43, %s8347_s29  ;;  %4022 = vrot.lane.b32.xlu0 %v3999_v50, %s8347_s29  ;;  %v3993_v38 = vsel %vm8345_vm2, %v3985_v9, 0  ;;  %vm8423_vm4 = vmmov %vm8406_vm3 }
 0x61f   : > { %3860 = vst [vmem:[#allocation3 + $0xa0] sm:$0xff] %v3849_v3 }
 0x620   : > { %3574 = vrot.lane.b32.xlu2 %v3555_v14, %s8337_s14  ;;  %v3627_v4 = vpop.permute.xlu1 %3626  ;;  %v3625_v31 = vpop.permute.xlu0 %3624 }
 0x621   : > { %v3641_v63 = vrot.slane %v3627_v4, 4  ;;  %v3640_v51 = vrot.slane %v3625_v31, 4 }
 0x622   : > { %v3569_v62 = vpop.permute.xlu2 %3568 }
 0x623   : > { %v3648_v34 = vsel %vm8409_vm13, %v3640_v51, %v3641_v63  ;;  %v3584_v18 = vrot.slane %v3569_v62, 4  ;;  %v4094_v63 = vld [vmem:[%s8101_s9 + $0x10] sm:$0xff]  ;;  %vm8424_vm13 = vmmov %vm8415_vm0 }
 0x624   : > { %v3649_v12 = vsel %vm8410_vm8, %v3625_v31, %v3648_v34 }
 0x625   : > { %3660 = vst [vmem:[#allocation3 + $0x20] sm:$0xff] %v3649_v12 }
 0x626   : > { %3582 = vrot.lane.b32.xlu1 %v3559_v37, %s8337_s14  ;;  %4012 = vrot.lane.b32.xlu0 %v3994_v60, %s8347_s29  ;;  %s5620_s14 = sshll.u32 %s8471_s24, 6 }
 0x628   : > { %4020 = vrot.lane.b32.xlu2 %v3998_v1, %s8347_s29  ;;  %v3753_v46 = vpop.permute.xlu1 %3752  ;;  %v3691_v30 = vpop.permute.xlu0 %3690 }
 0x629   : > { %v3768_v7 = vrot.slane %v3753_v46, 4  ;;  %v3705_v59 = vrot.slane %v3691_v30, 4 }
 0x62a   : > { %v3949_v47 = vpop.permute.xlu2 %3948 }
 0x62b   : > { %v3962_v44 = vrot.slane %v3949_v47, 4  ;;  %v3776_v35 = vsel %vm8411_vm5, %v3768_v7, %v3769_v42  ;;  %v3712_v24 = vsel %vm8412_vm9, %v3704_v58, %v3705_v59  ;;  %vm8426_vm5 = vmmov %vm8406_vm3 }
 0x62c   : > { %v3777_v29 = vsel %vm8413_vm7, %v3753_v46, %v3776_v35  ;;  %v3713_v54 = vsel %vm8415_vm0, %v3689_v5, %v3712_v24  ;;  %v3905_v5 = vrot.slane %v7668_v21, 4  ;;  %v3995_v21 = vsel %vm8345_vm2, %v3987_v48, 0  ;;  %vm8421_vm2 = vmmov %vm8410_vm8 }
 0x62d   : > { %v3970_v27 = vsel %vm8414_vm12, %v3962_v44, %v3963_v22  ;;  %3788 = vst [vmem:[#allocation3 + $0x60] sm:$0xff] %v3777_v29  ;;  %vm8425_vm8 = vmmov %vm8413_vm7  ;;  %v3843_v22 = vrot.slane %v7682_v33, 4  ;;  %v3907_v44 = vrot.slane %v7700_v55, 4  ;;  %vm8428_vm7 = vcmask 1039360  }
 0x62e   : > { %v3971_v52 = vsel %vm8416_vm15, %v3949_v47, %v3970_v27  ;;  %4008 = vrot.lane.b32.xlu1 %v3992_v0, %s8347_s29  ;;  %4103 = vperm.xlu0 %5697, %v4093_v11   ;;  %3724 = vst [vmem:[#allocation3 + $0x40] sm:$0xff] %v3713_v54  ;;  %vm8427_vm9 = vmmov %vm8406_vm3  ;;  %v3909_v55 = vrot.slane %v7673_v26, 4 }
 0x62f   : > { %3981 = vst [vmem:[#allocation3 + $0xe8] sm:$0xff] %v3971_v52  ;;  %vm8429_vm12 = vmmov %vm8419_vm1 }
 0x630   : > { %4010 = vrot.lane.b32.xlu2 %v3993_v38, %s8347_s29  ;;  %v3889_v40 = vpop.permute.xlu1 %3888  ;;  %v3571_v13 = vpop.permute.xlu0 %3570  ;;  %vm8430_vm0 = vmmov %vm8406_vm3 }
 0x631   : > { %v3904_v23 = vrot.slane %v3889_v40, 4  ;;  %v3585_v17 = vrot.slane %v3571_v13, 4  ;;  %vm8431_vm15 = vmmov %vm8430_vm0 }
 0x632   : > { %v3629_v16 = vpop.permute.xlu2 %3628 }
 0x633   : > { %v3912_v15 = vsel %vm8417_vm6, %v3904_v23, %v3905_v5  ;;  %v3592_v28 = vsel %vm8418_vm14, %v3584_v18, %v3585_v17  ;;  %v3642_v14 = vrot.slane %v3629_v16, 4  ;;  %vm8432_vm6 = vmmov %vm8425_vm8 }
 0x634   : > { %v3913_v6 = vsel %vm8419_vm1, %v3889_v40, %v3912_v15  ;;  %v3593_v3 = vsel %vm8420_vm10, %v3569_v62, %v3592_v28  ;;  %vm8433_vm14 = vmmov %vm8419_vm1  ;;  %v3965_v15 = vrot.slane %v7640_v56, 4  ;;  %vm8435_vm10 = vcmask 916480  }
 0x635   : > { %3924 = vst [vmem:[#allocation3 + $0xc0] sm:$0xff] %v3913_v6  ;;  %vm8434_vm1 = vmmov %vm8430_vm0 }
 0x636   : > { %4014 = vrot.lane.b32.xlu1 %v3995_v21, %s8347_s29  ;;  %3604 = vst [vmem:[#allocation3] sm:$0xff] %v3593_v3  ;;  %s8472_s29 = sld [smem:[#allocation19_spill]] }
 0x638   : > { %4098 = vperm.xlu2 %5696, %v4092_v45   ;;  %v3759_v43 = vpop.permute.xlu1 %3758  ;;  %v3631_v50 = vpop.permute.xlu0 %3630 }
 0x639   : > { %v3643_v31 = vrot.slane %v3631_v50, 4  ;;  %v3771_v12 = vrot.slane %v3759_v43, 4  ;;  %v3845_v43 = vrot.slane %v7718_v61, 4 }
 0x63a   : > { %v3695_v4 = vpop.permute.xlu2 %3694 }
 0x63b   : > { %v3650_v51 = vsel %vm8406_vm3, %v3642_v14, %v3643_v31  ;;  %v3707_v37 = vrot.slane %v3695_v4, 4  ;;  %vm8436_vm3 = vmmov %vm8430_vm0 }
 0x63c   : > { %v3651_v62 = vsel %vm8421_vm2, %v3629_v16, %v3650_v51  ;;  %vm8437_vm2 = vmmov %vm8430_vm0  ;;  %s8473_s21 = smov %s8472_s29  ;;  %s4672_s22 = scalar_lea.hbm %s8472_s29, %s5620_s14 }
 0x63d   : > { %3661 = vst [vmem:[#allocation3 + $0x28] sm:$0xff] %v3651_v62  ;;  %s4675_s0 = sshll.u32 %s4672_s22, 4  ;;  %s5781_s28 = scalar_lea.hbm %s8473_s21, 128  ;;  %s4676_s0 = int_to_ptr.hbm [resolvable:$true] %s4675_s0 }
 0x63e   : > { %4108 = vperm.xlu1 %5695, %v4094_v63   ;;  %s5775_s27 = sshra.s32 %s4676_s0, 4  ;;  %s5776_s27 = int_to_ptr.hbm [resolvable:$true] %s5775_s27 }
 0x63f   : > { %s5777_s26 = scalar_lea.hbm %s5776_s27, 64  ;;  %p5782_p0 = scmp.lt.s32.totalorder %s5776_s27, %s8473_s21 }
 0x640   : > { %4113 = vperm.xlu2 %5696, %v4095_v2   ;;  %v3693_v41 = vpop.permute.xlu1 %3692  ;;  %v3757_v34 = vpop.permute.xlu0 %3756  ;;  %p5778_p6 = scmp.ne.s32.totalorder %s5776_s27, %s5777_s26  ;;  %p5783_p1 = scmp.lt.s32.totalorder %s5781_s28, %s5777_s26 }
 0x641   : > { %v3706_v60 = vrot.slane %v3693_v41, 4  ;;  %v3770_v46 = vrot.slane %v3757_v34, 4 }
 0x642   : > { %v3635_v1 = vpop.permute.xlu2 %3634  ;;  %p5779_p9 = pnand %p5778_p6, %p5974_p11  ;;  %p5784_p3 = por %p5783_p1, %p5782_p0 }
 0x643   : > { %v3714_v30 = vsel %vm8422_vm11, %v3706_v60, %v3707_v37  ;;  %v3778_v42 = vsel %vm8423_vm4, %v3770_v46, %v3771_v12  ;;  %v3645_v50 = vrot.slane %v3635_v1, 4  ;;  %vm8438_vm11 = vcmask 130048   ;;  %vm8439_vm4 = vmmov %vm8428_vm7 }
 0x644   : > { %v3715_v58 = vsel %vm8424_vm13, %v3693_v41, %v3714_v30  ;;  %v3779_v7 = vsel %vm8425_vm8, %v3757_v34, %v3778_v42  ;;  %v3967_v34 = vrot.slane %v7671_v57, 4  ;;  %vm8440_vm13 = vmmov %vm8430_vm0  ;;  %v3847_v57 = vrot.slane %v7686_v20, 4  ;;  %p5780_p13 = pneg %p5779_p9 }
 0x645   : > { %3725 = vst [vmem:[#allocation3 + $0x48] sm:$0xff] %v3715_v58  ;;  %vm8441_vm8 = vmmov %vm8430_vm0 }
 0x646   : > { %3789 = vst [vmem:[#allocation3 + $0x68] sm:$0xff] %v3779_v7  ;;  %p5785_p4 = pnand %p5784_p3, %p5780_p13 }
 0x648   : > { %v3829_v47 = vpop.permute.xlu1 %3828  ;;  %v3893_v59 = vpop.permute.xlu0 %3892 }
 0x649   : > { %v3842_v35 = vrot.slane %v3829_v47, 4  ;;  %v3906_v24 = vrot.slane %v3893_v59, 4 }
 0x64a   : > { %v3761_v9 = vpop.permute.xlu2 %3760 }
 0x64b   : > { %v3850_v11 = vsel %vm8426_vm5, %v3842_v35, %v3843_v22  ;;  %v3914_v29 = vsel %vm8427_vm9, %v3906_v24, %v3907_v44  ;;  %v3772_v38 = vrot.slane %v3761_v9, 4  ;;  %vm8442_vm5 = vcmask 121856   ;;  %vm8443_vm9 = vmmov %vm8435_vm10 }
 0x64c   : > { %v3851_v27 = vsel %vm8428_vm7, %v3829_v47, %v3850_v11  ;;  %v3915_v54 = vsel %vm8429_vm12, %v3893_v59, %v3914_v29  ;;  %vm8444_vm7 = vmmov %vm8430_vm0  ;;  %vm8445_vm12 = vcmask 138240  }
 0x64d   : > { %3861 = vst [vmem:[#allocation3 + $0xa8] sm:$0xff] %v3851_v27 }
 0x64e   : > { %3925 = vst [vmem:[#allocation3 + $0xc8] sm:$0xff] %v3915_v54 }
 0x650   : > { %v7793_v52 = vpop.permute.xlu1 %3572  ;;  %v3763_v0 = vpop.permute.xlu0 %3762 }
 0x651   : > { %v3773_v40 = vrot.slane %v3763_v0, 4  ;;  %v5613_v0 = vld [vmem:[#allocation3 + $0xe4] sm:$0xf0] }
 0x652   : > { %v3897_v33 = vpop.permute.xlu2 %3896 }
 0x653   : > { %v3908_v13 = vrot.slane %v3897_v33, 4  ;;  %v3780_v5 = vsel %vm8430_vm0, %v3772_v38, %v3773_v40 }
 0x654   : > { %v3781_v23 = vsel %vm8432_vm6, %v3761_v9, %v3780_v5  ;;  %vm8447_vm6 = vmmov %vm8430_vm0 }
 0x655   : > { %v3916_v18 = vsel %vm8431_vm15, %v3908_v13, %v3909_v55  ;;  %3790 = vst [vmem:[#allocation3 + $0x70] sm:$0xff] %v3781_v23  ;;  %vm8446_vm15 = vmmov %vm8439_vm4  ;;  %v3586_v23 = vrot.slane %v7793_v52, 4 }
 0x656   : > { %v3917_v16 = vsel %vm8433_vm14, %v3897_v33, %v3916_v18  ;;  %v5412_v18 = vld [vmem:[#allocation3 + $0xe0] sm:$0xf]  ;;  %vm8448_vm14 = vmmov %vm8430_vm0 }
 0x657   : > { %3926 = vst [vmem:[#allocation3 + $0xd0] sm:$0xff] %v3917_v16 }
 0x658   : > { %v3953_v17 = vpop.permute.xlu1 %3952  ;;  %v3697_v48 = vpop.permute.xlu0 %3696 }
 0x659   : > { %v3964_v28 = vrot.slane %v3953_v17, 4  ;;  %v3708_v61 = vrot.slane %v3697_v48, 4 }
 0x65a   : > { %v3579_v6 = vpop.permute.xlu2 %3578 }
 0x65b   : > { %v3972_v45 = vsel %vm8434_vm1, %v3964_v28, %v3965_v15  ;;  %v3589_v47 = vrot.slane %v3579_v6, 4  ;;  %vm8449_vm1 = vmmov %vm8438_vm11 }
 0x65c   : > { %v3973_v26 = vsel %vm8435_vm10, %v3953_v17, %v3972_v45  ;;  %v5413_v17 = vor.u32 %v5613_v0, %v5412_v18  ;;  %vm8450_vm10 = vmmov %vm8430_vm0  ;;  %v5334_v18 = vld [vmem:[#allocation3 + $0x48] sm:$0xf0] }
 0x65d   : > { %3982 = vst [vmem:[#allocation3 + $0xf0] sm:$0xff] %v3973_v26 }
 0x660   : > { %v3633_v3 = vpop.permute.xlu1 %3632  ;;  %v3833_v21 = vpop.permute.xlu0 %3832 }
 0x661   : > { %v3644_v14 = vrot.slane %v3633_v3, 4  ;;  %v3844_v31 = vrot.slane %v3833_v21, 4 }
 0x662   : > { %v7804_v4 = vpop.permute.xlu2 %3766 }
 0x663   : > { %v3652_v63 = vsel %vm8436_vm3, %v3644_v14, %v3645_v50  ;;  %v3852_v56 = vsel %vm8437_vm2, %v3844_v31, %v3845_v43  ;;  %vm8451_vm3 = vmmov %vm8442_vm5  ;;  %v3775_v43 = vrot.slane %v7804_v4, 4 }
 0x664   : > { %v3653_v51 = vsel %vm8438_vm11, %v3633_v3, %v3652_v63  ;;  %v3853_v2 = vsel %vm8439_vm4, %v3833_v21, %v3852_v56  ;;  %v5420_v29 = vld [vmem:[#allocation3 + $0xf0] sm:$0xf]  ;;  %vm8452_vm2 = vmmov %vm8445_vm12  ;;  %vm8454_vm4 = vcmask 7168  }
 0x665   : > { %3662 = vst [vmem:[#allocation3 + $0x30] sm:$0xff] %v3653_v51  ;;  %vm8453_vm11 = vmmov %vm8430_vm0  ;;  %v3911_v51 = vrot.slane %v7648_v32, 4  ;;  %v5348_v32 = vld [vmem:[#allocation3 + $0x60] sm:$0xf] }
 0x666   : > { %3862 = vst [vmem:[#allocation3 + $0xb0] sm:$0xff] %v3853_v2 }
 0x668   : > { %v3699_v62 = vpop.permute.xlu1 %3698  ;;  %v3957_v41 = vpop.permute.xlu0 %3956 }
 0x669   : > { %v3709_v12 = vrot.slane %v3699_v62, 4  ;;  %v3966_v60 = vrot.slane %v3957_v41, 4  ;;  %v5356_v62 = vld [vmem:[#allocation3 + $0x70] sm:$0xf] }
 0x66a   : > { %v3701_v37 = vpop.permute.xlu2 %3700 }
 0x66b   : > { %v3716_v1 = vsel %vm8440_vm13, %v3708_v61, %v3709_v12  ;;  %v3974_v46 = vsel %vm8441_vm8, %v3966_v60, %v3967_v34  ;;  %v3710_v40 = vrot.slane %v3701_v37, 4  ;;  %vm8455_vm13 = vmmov %vm8430_vm0  ;;  %vm8456_vm8 = vcmask 924672   ;;  %v5598_v61 = vld [vmem:[#allocation3 + $0x74] sm:$0xf]  ;;  %v5597_v60 = vld [vmem:[#allocation3 + $0x64] sm:$0xf0] }
 0x66c   : > { %v3717_v30 = vsel %vm8442_vm5, %v3697_v48, %v3716_v1  ;;  %v3975_v42 = vsel %vm8443_vm9, %v3957_v41, %v3974_v46  ;;  %v5350_v1 = vld [vmem:[#allocation3 + $0x68] sm:$0xf0]  ;;  %vm8457_vm5 = vmmov %vm8430_vm0 }
 0x66d   : > { %3726 = vst [vmem:[#allocation3 + $0x50] sm:$0xff] %v3717_v30  ;;  %v5596_v30 = vld [vmem:[#allocation3 + $0x64] sm:$0xf]  ;;  %vm8458_vm9 = vmmov %vm8430_vm0 }
 0x66e   : > { %3983 = vst [vmem:[#allocation3 + $0xf8] sm:$0xff] %v3975_v42 }
 0x670   : > { %v3577_v58 = vpop.permute.xlu1 %3576  ;;  %v3637_v7 = vpop.permute.xlu0 %3636 }
 0x671   : > { %v3588_v59 = vrot.slane %v3577_v58, 4  ;;  %v3646_v20 = vrot.slane %v3637_v7, 4 }
 0x672   : > { %v3837_v22 = vpop.permute.xlu2 %3836 }
 0x673   : > { %v3846_v44 = vrot.slane %v3837_v22, 4  ;;  %v3596_v35 = vsel %vm8444_vm7, %v3588_v59, %v3589_v47  ;;  %vm8459_vm7 = vcmask 908288  }
 0x674   : > { %v3597_v9 = vsel %vm8445_vm12, %v3577_v58, %v3596_v35  ;;  %v5349_v58 = vor.u32 %v5597_v60, %v5348_v32  ;;  %vm8460_vm12 = vmmov %vm8459_vm7  ;;  %v5380_v32 = vld [vmem:[#allocation3 + $0xa0] sm:$0xf] }
 0x675   : > { %v3854_v24 = vsel %vm8430_vm0, %v3846_v44, %v3847_v57  ;;  %3606 = vst [vmem:[#allocation3 + $0x10] sm:$0xff] %v3597_v9  ;;  %v5615_v27 = vld [vmem:[#allocation3 + $0xf4] sm:$0xf0] }
 0x676   : > { %v3855_v11 = vsel %vm8446_vm15, %v3837_v22, %v3854_v24  ;;  %v5421_v54 = vor.u32 %v5615_v27, %v5420_v29  ;;  %v5340_v27 = vld [vmem:[#allocation3 + $0x50] sm:$0xf]  ;;  %vm8461_vm15 = vmmov %vm8452_vm2 }
 0x677   : > { %3863 = vst [vmem:[#allocation3 + $0xb8] sm:$0xff] %v3855_v11 }
 0x678   : > { %v3639_v38 = vpop.permute.xlu1 %3638  ;;  %4351 = vmatpush.bf16.msra.mxu3 %v5421_v54  ;;  %v3703_v33 = vpop.permute.xlu0 %3702  ;;  %v5404_v54 = vld [vmem:[#allocation3 + $0xd0] sm:$0xf] }
 0x679   : > { %v3647_v55 = vrot.slane %v3639_v38, 4  ;;  %v3711_v5 = vrot.slane %v3703_v33, 4 }
 0x67a   : > { %v3575_v13 = vpop.permute.xlu2 %3574 }
 0x67b   : > { %v3587_v16 = vrot.slane %v3575_v13, 4  ;;  %v3654_v48 = vsel %vm8447_vm6, %v3646_v20, %v3647_v55  ;;  %v3718_v15 = vsel %vm8448_vm14, %v3710_v40, %v3711_v5  ;;  %v5594_v20 = vld [vmem:[#allocation3 + $0x54] sm:$0xf]  ;;  %v5593_v13 = vld [vmem:[#allocation3 + $0x44] sm:$0xf0]  ;;  %vm8462_vm6 = vmmov %vm8430_vm0 }
 0x67c   : > { %v3655_v28 = vsel %vm8449_vm1, %v3637_v7, %v3654_v48  ;;  %v3719_v45 = vsel %vm8451_vm3, %v3701_v37, %v3718_v15  ;;  %4352 = vmatpush.bf16.msra.mxu3 %v5413_v17  ;;  %v7839_v7 = vor.u32 %v5596_v30, %v5350_v1  ;;  %v5609_v5 = vld [vmem:[#allocation3 + $0xc4] sm:$0xf0]  ;;  %v5396_v17 = vld [vmem:[#allocation3 + $0xc0] sm:$0xf]  ;;  %v5318_v1 = vld [vmem:[#allocation3 + $0x28] sm:$0xf0] }
 0x67d   : > { %v3594_v6 = vsel %vm8450_vm10, %v3586_v23, %v3587_v16  ;;  %3663 = vst [vmem:[#allocation3 + $0x38] sm:$0xff] %v3655_v28  ;;  %v5332_v16 = vld [vmem:[#allocation3 + $0x40] sm:$0xf]  ;;  %vm8463_vm14 = vmmov %vm8459_vm7  ;;  %vm8466_vm3 = vcmask 261120  }
 0x67e   : > { %v3595_v26 = vsel %vm8452_vm2, %v7793_v52, %v3594_v6  ;;  %3727 = vst [vmem:[#allocation3 + $0x58] sm:$0xff] %v3719_v45  ;;  %v5333_v28 = vor.u32 %v5593_v13, %v5332_v16  ;;  %v5397_v6 = vor.u32 %v5609_v5, %v5396_v17  ;;  %v5592_v45 = vld [vmem:[#allocation3 + $0x44] sm:$0xf]  ;;  %v5364_v5 = vld [vmem:[#allocation3 + $0x80] sm:$0xf]  ;;  %vm8464_vm1 = vmmov %vm8430_vm0 }
 0x67f   : > { %3605 = vst [vmem:[#allocation3 + $0x8] sm:$0xff] %v3595_v26  ;;  %v7850_v26 = vor.u32 %v5592_v45, %v5334_v18  ;;  %v5579_v16 = vld [vmem:[%s8100_s8 + $0x8] sm:$0xf0]  ;;  %v5578_v17 = vld [vmem:[%s8100_s8 + $0x4] sm:$0xf]  ;;  %vm8465_vm10 = vmmov %vm8459_vm7 }
 0x680   : > { %v3765_v3 = vpop.permute.xlu1 %3764  ;;  %v4017_v21 = vpop.permute.xlu0 %4016  ;;  %vm8467_vm2 = vmmov %vm8466_vm3 }
 0x681   : > { %v3774_v50 = vrot.slane %v3765_v3, 4  ;;  %v4028_v22 = vrot.slane %v4017_v21, 4 }
 0x682   : > { %v4021_v46 = vpop.permute.xlu2 %4020 }
 0x683   : > { %v3782_v14 = vsel %vm8453_vm11, %v3774_v50, %v3775_v43  ;;  %v4030_v59 = vrot.slane %v4021_v46, 4  ;;  %vm8468_vm11 = vmmov %vm8467_vm2 }
 0x684   : > { %v3783_v31 = vsel %vm8454_vm4, %v3765_v3, %v3782_v14  ;;  %v5591_v3 = vld [vmem:[#allocation3 + $0x34] sm:$0xf0]  ;;  %v5326_v50 = vld [vmem:[#allocation3 + $0x38] sm:$0xf0]  ;;  %vm8469_vm4 = vmmov %vm8467_vm2 }
 0x685   : > { %3791 = vst [vmem:[#allocation3 + $0x78] sm:$0xff] %v3783_v31  ;;  %v5595_v35 = vld [vmem:[#allocation3 + $0x54] sm:$0xf0]  ;;  %v5342_v24 = vld [vmem:[#allocation3 + $0x58] sm:$0xf0] }
 0x686   : > { %v5341_v33 = vor.u32 %v5595_v35, %v5340_v27  ;;  %v7846_v55 = vor.u32 %v5594_v20, %v5342_v24  ;;  %v5324_v31 = vld [vmem:[#allocation3 + $0x30] sm:$0xf]  ;;  %v5585_v13 = vld [vmem:[#allocation3 + $0x4] sm:$0xf0]  ;;  %v5302_v18 = vld [vmem:[#allocation3 + $0x8] sm:$0xf0] }
 0x687   : > { %v5308_v35 = vld [vmem:[#allocation3 + $0x10] sm:$0xf] }
 0x688   : > { %v3901_v63 = vpop.permute.xlu1 %3900  ;;  %v7831_v56 = vpop.permute.xlu0 %3580 }
 0x689   : > { %v3910_v2 = vrot.slane %v3901_v63, 4  ;;  %v3590_v48 = vrot.slane %v7831_v56, 4 }
 0x68b   : > { %v3918_v52 = vsel %vm8455_vm13, %v3910_v2, %v3911_v51  ;;  %v5325_v2 = vor.u32 %v5591_v3, %v5324_v31  ;;  %v5614_v31 = vld [vmem:[#allocation3 + $0xf4] sm:$0xf]  ;;  %vm4494_vm13 = vcmask 64512  }
 0x68c   : > { %v3919_v41 = vsel %vm8456_vm8, %v3901_v63, %v3918_v52  ;;  %v5599_v34 = vld [vmem:[#allocation3 + $0x74] sm:$0xf0]  ;;  %v5358_v4 = vld [vmem:[#allocation3 + $0x78] sm:$0xf0]  ;;  %v5388_v63 = vld [vmem:[#allocation3 + $0xb0] sm:$0xf] }
 0x68d   : > { %3927 = vst [vmem:[#allocation3 + $0xd8] sm:$0xff] %v3919_v41  ;;  %v5357_v12 = vor.u32 %v5599_v34, %v5356_v62  ;;  %v7836_v37 = vor.u32 %v5598_v61, %v5358_v4  ;;  %v5590_v62 = vld [vmem:[#allocation3 + $0x34] sm:$0xf]  ;;  %v4011_v34 = vpop.permute.xlu2 %4010  ;;  %v5589_v4 = vld [vmem:[#allocation3 + $0x24] sm:$0xf0] }
 0x68e   : > { %v7856_v61 = vor.u32 %v5590_v62, %v5326_v50  ;;  %v4025_v30 = vrot.slane %v4011_v34, 4  ;;  %v5414_v34 = vld [vmem:[#allocation3 + $0xe8] sm:$0xf0] }
 0x68f   : > { %4332 = vmatpush.bf16.msra.mxu1 %v5357_v12  ;;  %4389 = vmatpush.bf16.msrb.mxu0 %v7836_v37  ;;  %v5605_v12 = vld [vmem:[#allocation3 + $0xa4] sm:$0xf0] }
 0x690   : > { %v4019_v42 = vpop.permute.xlu1 %4018  ;;  %v4023_v47 = vpop.permute.xlu0 %4022 }
 0x691   : > { %v4029_v57 = vrot.slane %v4019_v42, 4  ;;  %v4031_v44 = vrot.slane %v4023_v47, 4  ;;  %v5381_v47 = vor.u32 %v5605_v12, %v5380_v32  ;;  %v5612_v12 = vld [vmem:[#allocation3 + $0xe4] sm:$0xf]  ;;  %v5398_v32 = vld [vmem:[#allocation3 + $0xc8] sm:$0xf0] }
 0x693   : > { %v4036_v9 = vsel %vm8457_vm5, %v4028_v22, %v4029_v57  ;;  %4333 = vmatpush.bf16.msra.mxu1 %v5349_v58  ;;  %4390 = vmatpush.bf16.msrb.mxu0 %v7839_v7  ;;  %v4038_v11 = vsel %vm8458_vm9, %v4030_v59, %v4031_v44  ;;  %v5588_v59 = vld [vmem:[#allocation3 + $0x24] sm:$0xf]  ;;  %v5603_v57 = vld [vmem:[#allocation3 + $0x94] sm:$0xf0] }
 0x694   : > { %v4037_v29 = vsel %vm8459_vm7, %v4017_v21, %v4036_v9  ;;  %v5611_v0 = vld [vmem:[#allocation3 + $0xd4] sm:$0xf0]  ;;  %v4039_v38 = vsel %vm8460_vm12, %v4021_v46, %v4038_v11  ;;  %v5316_v46 = vld [vmem:[#allocation3 + $0x20] sm:$0xf]  ;;  %v7859_v22 = vor.u32 %v5588_v59, %v5318_v1  ;;  %v5372_v9 = vld [vmem:[#allocation3 + $0x90] sm:$0xf] }
 0x695   : > { %4046 = vst [vmem:[#allocation3 + $0x110] sm:$0xff] %v4037_v29  ;;  %v5405_v40 = vor.u32 %v5611_v0, %v5404_v54  ;;  %v5607_v21 = vld [vmem:[#allocation3 + $0xb4] sm:$0xf0]  ;;  %v5317_v58 = vor.u32 %v5589_v4, %v5316_v46  ;;  %v5586_v29 = vld [vmem:[#allocation3 + $0x14] sm:$0xf]  ;;  %v5373_v0 = vor.u32 %v5603_v57, %v5372_v9 }
 0x696   : > { %4047 = vst [vmem:[#allocation3 + $0x118] sm:$0xff] %v4039_v38  ;;  %v5389_v52 = vor.u32 %v5607_v21, %v5388_v63  ;;  %v5406_v1 = vld [vmem:[#allocation3 + $0xd8] sm:$0xf0]  ;;  %v5608_v9 = vld [vmem:[#allocation3 + $0xc4] sm:$0xf] }
 0x697   : > { %4334 = vmatpush.bf16.msra.mxu1 %v5341_v33  ;;  %4353 = vmatpush.bf16.msra.mxu3 %v5405_v40  ;;  %v5601_v33 = vld [vmem:[#allocation3 + $0x84] sm:$0xf0]  ;;  %v5422_v40 = vld [vmem:[#allocation3 + $0xf8] sm:$0xf0] }
 0x698   : > { %4391 = vmatpush.bf16.msrb.mxu0 %v7846_v55  ;;  %v3583_v23 = vpop.permute.xlu1 %3582  ;;  %v4013_v20 = vpop.permute.xlu0 %4012  ;;  %v5365_v50 = vor.u32 %v5601_v33, %v5364_v5  ;;  %v5290_v33 = vld [vmem:[%s8100_s8 + $0x24] sm:$0xf0] }
 0x699   : > { %v3591_v15 = vrot.slane %v3583_v23, 4  ;;  %v5276_v23 = vld [vmem:[%s8100_s8] sm:$0xf]  ;;  %v4026_v3 = vrot.slane %v4013_v20, 4 }
 0x69b   : > { %v3598_v43 = vsel %vm8430_vm0, %v3590_v48, %v3591_v15  ;;  %4335 = vmatpush.bf16.msra.mxu1 %v5333_v28  ;;  %4354 = vmatpush.bf16.msra.mxu3 %v5397_v6  ;;  %v5278_v48 = vld [vmem:[%s8100_s8 + $0xc] sm:$0xf0]  ;;  %v5300_v28 = vld [vmem:[#allocation3] sm:$0xf] }
 0x69c   : > { %v3599_v14 = vsel %vm8461_vm15, %v7831_v56, %v3598_v43  ;;  %4392 = vmatpush.bf16.msrb.mxu0 %v7850_v26  ;;  %v5436_v51 = vld [vmem:[#allocation3 + $0x110] sm:$0xf]  ;;  %v5618_v6 = vld [vmem:[#allocation3 + $0x114] sm:$0xf]  ;;  %v5301_v43 = vor.u32 %v5585_v13, %v5300_v28  ;;  %v5296_v28 = vld [vmem:[%s8100_s8 + $0x20] sm:$0xf] }
 0x69d   : > { %3607 = vst [vmem:[#allocation3 + $0x18] sm:$0xff] %v3599_v14  ;;  %v5619_v41 = vld [vmem:[#allocation3 + $0x114] sm:$0xf0]  ;;  %v5438_v45 = vld [vmem:[#allocation3 + $0x118] sm:$0xf0] }
 0x69e   : > { %v5437_v60 = vor.u32 %v5619_v41, %v5436_v51  ;;  %v5584_v14 = vld [vmem:[#allocation3 + $0x4] sm:$0xf]  ;;  %v5425_v51 = vor.u32 %v5614_v31, %v5422_v40  ;;  %v5441_v41 = vor.u32 %v5618_v6, %v5438_v45  ;;  %v5606_v40 = vld [vmem:[#allocation3 + $0xb4] sm:$0xf] }
 0x69f   : > { %4336 = vmatpush.bf16.msra.mxu1 %v5325_v2  ;;  %4355 = vmatpush.bf16.msra.mxu3 %v5389_v52  ;;  %v7879_v63 = vor.u32 %v5584_v14, %v5302_v18  ;;  %v5277_v2 = vor.u32 %v5579_v16, %v5276_v23  ;;  %v7881_v52 = vor.u32 %v5578_v17, %v5278_v48  ;;  %v5382_v18 = vld [vmem:[#allocation3 + $0xa8] sm:$0xf0]  ;;  %v5604_v23 = vld [vmem:[#allocation3 + $0xa4] sm:$0xf]  ;;  %v5374_v17 = vld [vmem:[#allocation3 + $0x98] sm:$0xf0] }
 0x6a0   : > { %4393 = vmatpush.bf16.msrb.mxu0 %v7856_v61  ;;  %v4009_v56 = vpop.permute.xlu1 %4008  ;;  %4376 = vmatpush.bf16.msrb.mxu2 %v5437_v60  ;;  %v5417_v60 = vor.u32 %v5612_v12, %v5414_v34  ;;  %v5385_v16 = vor.u32 %v5604_v23, %v5382_v18  ;;  %v5600_v6 = vld [vmem:[#allocation3 + $0x84] sm:$0xf]  ;;  %v4104_v12 = vpop.permute.xlu0 %4103 }
 0x6a1   : > { %v4024_v42 = vrot.slane %v4009_v56, 4 }
 0x6a3   : > { %v4032_v44 = vsel %vm8462_vm6, %v4024_v42, %v4025_v30  ;;  %4337 = vmatpush.bf16.msra.mxu1 %v5317_v58  ;;  %4356 = vmatpush.bf16.msra.mxu3 %v5381_v47  ;;  %v5284_v42 = vld [vmem:[%s8100_s8 + $0x8] sm:$0xf]  ;;  %v5580_v58 = vld [vmem:[%s8100_s8 + $0x10] sm:$0xf0] }
 0x6a4   : > { %v4033_v24 = vsel %vm8463_vm14, %v4009_v56, %v4032_v44  ;;  %4394 = vmatpush.bf16.msrb.mxu0 %v7859_v22  ;;  %v5587_v11 = vld [vmem:[#allocation3 + $0x14] sm:$0xf0]  ;;  %v5310_v27 = vld [vmem:[#allocation3 + $0x18] sm:$0xf0]  ;;  %v5610_v56 = vld [vmem:[#allocation3 + $0xd4] sm:$0xf] }
 0x6a5   : > { %4044 = vst [vmem:[#allocation3 + $0x100] sm:$0xff] %v4033_v24  ;;  %v5309_v54 = vor.u32 %v5587_v11, %v5308_v35  ;;  %v7864_v38 = vor.u32 %v5586_v29, %v5310_v27  ;;  %v5409_v46 = vor.u32 %v5610_v56, %v5406_v1  ;;  %v5401_v24 = vor.u32 %v5608_v9, %v5398_v32  ;;  %v5390_v29 = vld [vmem:[#allocation3 + $0xb8] sm:$0xf0]  ;;  %v5288_v27 = vld [vmem:[%s8100_s8 + $0x18] sm:$0xf] }
 0x6a6   : > { %v5285_v11 = vor.u32 %v5580_v58, %v5284_v42 }
 0x6a7   : > { %4338 = vmatpush.bf16.msra.mxu1 %v5309_v54  ;;  %4357 = vmatpush.bf16.msra.mxu3 %v5373_v0  ;;  %v5582_v54 = vld [vmem:[%s8100_s8 + $0x20] sm:$0xf0]  ;;  %v5581_v0 = vld [vmem:[%s8100_s8 + $0x1c] sm:$0xf] }
 0x6a8   : > { %4395 = vmatpush.bf16.msrb.mxu0 %v7864_v38  ;;  %v4015_v15 = vpop.permute.xlu1 %4014  ;;  %v5289_v13 = vor.u32 %v5582_v54, %v5288_v27  ;;  %v5293_v5 = vor.u32 %v5581_v0, %v5290_v33 }
 0x6a9   : > { %v4027_v21 = vrot.slane %v4015_v15, 4  ;;  %v5366_v15 = vld [vmem:[#allocation3 + $0x88] sm:$0xf0] }
 0x6aa   : > { %v5369_v45 = vor.u32 %v5600_v6, %v5366_v15 }
 0x6ab   : > { %v4034_v62 = vsel %vm8464_vm1, %v4026_v3, %v4027_v21  ;;  %4339 = vmatpush.bf16.msra.mxu1 %v5301_v43  ;;  %4358 = vmatpush.bf16.msra.mxu3 %v5365_v50 }
 0x6ac   : > { %v4035_v4 = vsel %vm8465_vm10, %v4013_v20, %v4034_v62  ;;  %4396 = vmatpush.bf16.msrb.mxu0 %v7879_v63  ;;  %v5428_v30 = vld [vmem:[#allocation3 + $0x100] sm:$0xf]  ;;  %v5616_v59 = vld [vmem:[#allocation3 + $0x104] sm:$0xf]  ;;  %v5393_v20 = vor.u32 %v5606_v40, %v5390_v29 }
 0x6ad   : > { %4045 = vst [vmem:[#allocation3 + $0x108] sm:$0xff] %v4035_v4 }
 0x6ae   : > { %4340 = vmatmul.bf16.vlgmr.msra.gmra.mxu1 %v5277_v2  ;;  %4359 = vmatmul.bf16.vlgmr.msra.gmra.mxu3 %v7881_v52 }
 0x6af   : > { %4408 = vmatpush.bf16.msrb.mxu1 %v5425_v51  ;;  %4433 = vmatpush.bf16.msrb.mxu3 %v5441_v41  ;;  %v4099_v51 = vpop.permute.xlu2 %4098 }
 0x6b0   : > { %4397 = vmatmul.bf16.vlgmr.msrb.gmra.mxu0 %v5277_v2 }
 0x6b3   : > { %4409 = vmatpush.bf16.msrb.mxu1 %v5417_v60 }
 0x6b4   : > { %v5617_v47 = vld [vmem:[#allocation3 + $0x104] sm:$0xf0]  ;;  %v5430_v57 = vld [vmem:[#allocation3 + $0x108] sm:$0xf0] }
 0x6b5   : > { %v5429_v44 = vor.u32 %v5617_v47, %v5428_v30  ;;  %v5433_v35 = vor.u32 %v5616_v59, %v5430_v57 }
 0x6b7   : > { %4410 = vmatpush.bf16.msrb.mxu1 %v5409_v46  ;;  %4377 = vmatpush.bf16.msrb.mxu2 %v5429_v44 }
 0x6b8   : > { %4434 = vmatpush.bf16.msrb.mxu3 %v5433_v35  ;;  %v4109_v35 = vpop.permute.xlu1 %4108 }
 0x6ba   : > { %5442 = vmatmul.msk.bf16.vlgmr.msrb.gmra.mxu2 %vm8466_vm3, %v5285_v11 }
 0x6bb   : > { %5621 = vmatpush.bf16.msra.mxu2 %v7836_v37  ;;  %4411 = vmatpush.bf16.msrb.mxu1 %v5401_v24  ;;  %v5602_v37 = vld [vmem:[#allocation3 + $0x94] sm:$0xf] }
 0x6bc   : > { %v5377_v48 = vor.u32 %v5602_v37, %v5374_v17 }
 0x6be   : > { %4345 = vmatmul.bf16.gmra.mxu1 %v5289_v13  ;;  %4364 = vmatmul.bf16.gmra.mxu3 %v5293_v5 }
 0x6bf   : > { %5622 = vmatpush.bf16.msra.mxu2 %v7839_v7  ;;  %4412 = vmatpush.bf16.msrb.mxu1 %v5393_v20  ;;  %v5583_v7 = vld [vmem:[%s8100_s8 + $0x28] sm:$0xf0] }
 0x6c0   : > { %v5297_v3 = vor.u32 %v5583_v7, %v5296_v28 }
 0x6c3   : > { %5623 = vmatpush.bf16.msra.mxu2 %v7846_v55  ;;  %4413 = vmatpush.bf16.msrb.mxu1 %v5385_v16  ;;  %v4114_v16 = vpop.permute.xlu2 %4113 }
 0x6c7   : > { %5624 = vmatpush.bf16.msra.mxu2 %v7850_v26  ;;  %4414 = vmatpush.bf16.msrb.mxu1 %v5377_v48 }
 0x6ca   : > { %5443 = vmatmul.msk.bf16.gmra.mxu2 %vm8467_vm2, %v5297_v3 }
 0x6cb   : > { %5625 = vmatpush.bf16.msra.mxu2 %v7856_v61  ;;  %4415 = vmatpush.bf16.msrb.mxu1 %v5369_v45 }
 0x6ce   : > { %4416 = vmatmul.bf16.vlgmr.msrb.gmra.mxu1 %v7881_v52  ;;  %5444 = vmatmul.msk.bf16.vlgmr.msrb.gmra.mxu3 %vm8468_vm11, %v5285_v11 }
 0x6cf   : > { %5626 = vmatpush.bf16.msra.mxu2 %v7859_v22 }
 0x6d3   : > { %5627 = vmatpush.bf16.msra.mxu2 %v7864_v38 }
 0x6d7   : > { %5628 = vmatpush.bf16.msra.mxu2 %v7879_v63 }
 0x6da   : > { %4402 = vmatmul.bf16.vlgmr.msra.gmra.mxu2 %v5289_v13 }
 0x6de   : > { %5445 = vmatmul.msk.bf16.gmra.mxu3 %vm8469_vm4, %v5297_v3  ;;  %4421 = vmatmul.bf16.gmra.mxu1 %v5293_v5 }
 0x72b   : > { %v4341_v55 = vpop.f32.mrf.mxu1 }
 0x72c   : > { %v4342_v2 = vadd.f32 %v4341_v55, %v4099_v51 }
 0x72d   : > { %v4398_v52 = vpop.f32.mrf.mxu0 }
 0x72e   : > { %v4399_v4 = vadd.f32 %v4398_v52, %v4099_v51 }
 0x731   : > { %v4360_v26 = vpop.f32.mrf.mxu3 }
 0x732   : > { %v4361_v38 = vadd.f32 %v4360_v26, %v4342_v2 }
 0x733   : > { %v4343_v61 = vpop.f32.mrf.mxu1 }
 0x734   : > { %v4344_v60 = vadd.f32 %v4343_v61, %v4104_v12 }
 0x735   : > { %v4400_v42 = vpop.f32.mrf.mxu0 }
 0x736   : > { %v4401_v9 = vadd.f32 %v4400_v42, %v4104_v12 }
 0x739   : > { %v4362_v21 = vpop.f32.mrf.mxu3 }
 0x73a   : > { %v4363_v32 = vadd.f32 %v4362_v21, %v4344_v60 }
 0x73b   : > { %v4346_v43 = vpop.f32.mrf.mxu1 }
 0x73c   : > { %v4347_v11 = vadd.f32 %v4346_v43, %v4109_v35 }
 0x73d   : > { %v4379_v50 = vpop.f32.mrf.mxu2 }
 0x73e   : > { %v4380_v63 = vadd.f32 %v4379_v50, %v4361_v38 }
 0x740   : > { %v4446_v1 = vmax.f32 %v4380_v63, 0.0 }
 0x741   : > { %v4365_v14 = vpop.f32.mrf.mxu3 }
 0x742   : > { %v7925_v47 = vadd.f32 %v4446_v1, %v7533_v49  ;;  %v4366_v40 = vadd.f32 %v4365_v14, %v4347_v11 }
 0x743   : > { %v4348_v22 = vpop.f32.mrf.mxu1 }
 0x744   : > { %v4462_v29 = vmax.f32 %v7925_v47, 0.0  ;;  %v4349_v48 = vadd.f32 %v4348_v22, %v4114_v16 }
 0x745   : > { %v4381_v31 = vpop.f32.mrf.mxu2 }
 0x746   : > { %v4382_v59 = vadd.f32 %v4381_v31, %v4363_v32  ;;  %v4486_v32 = vld [vmem:[%s8102_s10] sm:$0xff] }
 0x748   : > { %v4448_v27 = vmax.f32 %v4382_v59, 0.0 }
 0x749   : > { %v4367_v62 = vpop.f32.mrf.mxu3 }
 0x74a   : > { %v7937_v13 = vadd.f32 %v4448_v27, %v7547_v10  ;;  %v4368_v10 = vadd.f32 %v4367_v62, %v4349_v48 }
 0x74b   : > { %v4417_v41 = vpop.f32.mrf.mxu1 }
 0x74c   : > { %v4418_v56 = vadd.f32 %v4417_v41, %v4399_v4  ;;  %v4464_v15 = vmax.f32 %v7937_v13, 0.0 }
 0x74d   : > { %v4384_v34 = vpop.f32.mrf.mxu2 }
 0x751   : > { %v4436_v46 = vpop.f32.mrf.mxu3 }
 0x752   : > { %v4437_v30 = vadd.f32 %v4436_v46, %v4418_v56 }
 0x753   : > { %v4419_v58 = vpop.f32.mrf.mxu1 }
 0x754   : > { %v4447_v57 = vmax.f32 %v4437_v30, 0.0  ;;  %v4420_v0 = vadd.f32 %v4419_v58, %v4401_v9  ;;  %v4488_v30 = vld [vmem:[%s8102_s10 + $0x10] sm:$0xff] }
 0x755   : > { %v4386_v44 = vpop.f32.mrf.mxu2 }
 0x756   : > { %v7928_v24 = vadd.f32 %v4447_v57, %v7536_v36  ;;  %v4385_v36 = vadd.f32 %v4384_v34, %v4366_v40 }
 0x758   : > { %v4463_v54 = vmax.f32 %v7928_v24, 0.0  ;;  %v4450_v28 = vmax.f32 %v4385_v36, 0.0 }
 0x759   : > { %v4438_v33 = vpop.f32.mrf.mxu3 }
 0x75a   : > { %v4439_v20 = vadd.f32 %v4438_v33, %v4420_v0  ;;  %v4470_v49 = vadd.f32 %v4463_v54, %v4462_v29  ;;  %v7949_v26 = vadd.f32 %v4450_v28, %v7564_v8 }
 0x75b   : > { %v4422_v23 = vpop.f32.mrf.mxu1 }
 0x75c   : > { %v4449_v5 = vmax.f32 %v4439_v20, 0.0  ;;  %4471 = vadd.xlane.f32.xlu0 %v4470_v49  ;;  %v4466_v22 = vmax.f32 %v7949_v26, 0.0  ;;  %v5727_v26 = vld [vmem:[%s6016_s19] sm:$0xff] }
 0x75d   : > { %v4403_v18 = vpop.f32.mrf.mxu2 }
 0x75e   : > { %v7940_v17 = vadd.f32 %v4449_v5, %v7550_v39  ;;  %v4404_v37 = vadd.f32 %v4403_v18, %v4109_v35  ;;  %v4387_v39 = vadd.f32 %v4386_v44, %v4368_v10  ;;  %v4489_v44 = vld [vmem:[%s8102_s10 + $0x18] sm:$0xff]  ;;  %v4512_v10 = vld [vmem:[%s8104_s12 + $0x8] sm:$0xff] }
 0x760   : > { %v4465_v7 = vmax.f32 %v7940_v17, 0.0  ;;  %v4423_v6 = vadd.f32 %v4422_v23, %v4404_v37  ;;  %v4452_v31 = vmax.f32 %v4387_v39, 0.0  ;;  %v4508_v37 = vld [vmem:[%s8103_s11] sm:$0x1] }
 0x761   : > { %v4441_v45 = vpop.f32.mrf.mxu3 }
 0x762   : > { %v4442_v3 = vadd.f32 %v4441_v45, %v4423_v6  ;;  %v4473_v55 = vadd.f32 %v4465_v7, %v4464_v15  ;;  %v7961_v38 = vadd.f32 %v4452_v31, %v7585_v25  ;;  %v4487_v25 = vld [vmem:[%s8102_s10 + $0x8] sm:$0xff]  ;;  %v4513_v45 = vld [vmem:[%s8104_s12 + $0x10] sm:$0xff] }
 0x763   : > { %v4424_v14 = vpop.f32.mrf.mxu1 }
 0x764   : > { %v4451_v61 = vmax.f32 %v4442_v3, 0.0  ;;  %4474 = vadd.xlane.f32.xlu1 %v4473_v55  ;;  %v4468_v63 = vmax.f32 %v7961_v38, 0.0  ;;  %v4511_v3 = vld [vmem:[%s8104_s12] sm:$0xff] }
 0x765   : > { %v4405_v21 = vpop.f32.mrf.mxu2 }
 0x766   : > { %v7952_v43 = vadd.f32 %v4451_v61, %v7567_v19  ;;  %v4406_v50 = vadd.f32 %v4405_v21, %v4114_v16 }
 0x768   : > { %v4467_v51 = vmax.f32 %v7952_v43, 0.0  ;;  %v4425_v2 = vadd.f32 %v4424_v14, %v4406_v50 }
 0x769   : > { %v4443_v52 = vpop.f32.mrf.mxu3 }
 0x76a   : > { %v4444_v62 = vadd.f32 %v4443_v52, %v4425_v2  ;;  %v4476_v8 = vadd.f32 %v4467_v51, %v4466_v22  ;;  %v4514_v2 = vld [vmem:[%s8104_s12 + $0x18] sm:$0xff] }
 0x76c   : > { %v4453_v19 = vmax.f32 %v4444_v62, 0.0  ;;  %4477 = vadd.xlane.f32.xlu2 %v4476_v8  ;;  %v4534_v8 = vld [vmem:[%s8105_s13 + $0x10] sm:$0xff] }
 0x76e   : > { %v7964_v41 = vadd.f32 %v4453_v19, %v7588_v53  ;;  %v4533_v19 = vld [vmem:[%s8105_s13 + $0x8] sm:$0xff] }
 0x770   : > { %v4469_v34 = vmax.f32 %v7964_v41, 0.0 }
 0x772   : > { %v4479_v4 = vadd.f32 %v4469_v34, %v4468_v63 }
 0x774   : > { %4480 = vadd.xlane.f32.xlu2 %v4479_v4  ;;  %v4532_v4 = vld [vmem:[%s8105_s13] sm:$0xff] }
 0x7cf   : > { %v4472_v60 = vpop.xlane.xlu0 %4471 }
 0x7d0   : > { %v4482_v53 = vmul.f32 0.00390625, %v4472_v60 }
 0x7d2   : > { %v4490_v58 = vmul.f32 %v4486_v32, %v4482_v53 }
 0x7d4   : > { %v4495_v9 = vsel %vm4494_vm13, %v4490_v58, 0.0 }
 0x7d7   : > { %v4475_v12 = vpop.xlane.xlu1 %4474 }
 0x7d8   : > { %v4483_v1 = vmul.f32 0.00390625, %v4475_v12 }
 0x7da   : > { %v4491_v42 = vmul.f32 %v4487_v25, %v4483_v1 }
 0x7dc   : > { %v4496_v57 = vsel %vm4494_vm13, %v4491_v42, 0.0 }
 0x7dd   : > { %v4497_v0 = vadd.f32 %v4496_v57, %v4495_v9  ;;  %v4535_v57 = vld [vmem:[%s8105_s13 + $0x18] sm:$0xff] }
 0x7df   : > { %v4478_v56 = vpop.xlane.xlu2 %4477 }
 0x7e0   : > { %v4484_v46 = vmul.f32 0.00390625, %v4478_v56 }
 0x7e2   : > { %v4492_v59 = vmul.f32 %v4488_v30, %v4484_v46 }
 0x7e4   : > { %v4498_v11 = vsel %vm4494_vm13, %v4492_v59, 0.0 }
 0x7e5   : > { %v4499_v40 = vadd.f32 %v4498_v11, %v4497_v0 }
 0x7e7   : > { %v4481_v35 = vpop.xlane.xlu2 %4480 }
 0x7e8   : > { %v4485_v27 = vmul.f32 0.00390625, %v4481_v35 }
 0x7ea   : > { %v4493_v33 = vmul.f32 %v4489_v44, %v4485_v27 }
 0x7ec   : > { %v4500_v20 = vsel %vm4494_vm13, %v4493_v33, 0.0 }
 0x7ed   : > { %v4501_v49 = vadd.f32 %v4500_v20, %v4499_v40 }
 0x7ef   : > { %v4502_v36 = vrot.slane %v4501_v49, 4 }
 0x7f1   : > { %v4503_v5 = vadd.f32 %v4502_v36, %v4501_v49 }
 0x7f3   : > { %v4504_v18 = vrot.slane %v4503_v5, 2 }
 0x7f5   : > { %v4505_v23 = vadd.f32 %v4504_v18, %v4503_v5 }
 0x7f7   : > { %v4506_v16 = vrot.slane %v4505_v23, 1 }
 0x7f9   : > { %v4507_v48 = vadd.f32 %v4506_v16, %v4505_v23 }
 0x7fb   : > { %v4509_v28 = vadd.f32 %v4508_v37, %v4507_v48 }
 0x7fd   : > { %v4510_v6 = vmax.f32 %v4509_v28, 0.0 }
 0x7ff   : > { %v4515_v55 = vperm.slane %v4510_v6, 0 }
 0x801   : > { %v4518_v39 = vmul.f32 %v4515_v55, %v4513_v45  ;;  %v4517_v61 = vmul.f32 %v4515_v55, %v4512_v10  ;;  %v4516_v21 = vmul.f32 %v4515_v55, %v4511_v3  ;;  %v4519_v52 = vmul.f32 %v4515_v55, %v4514_v2 }
 0x803   : > { %v4526_v50 = vsel %vm4494_vm13, %v4518_v39, 0.0  ;;  %v4523_v14 = vsel %vm4494_vm13, %v4517_v61, 0.0  ;;  %v4520_v31 = vsel %vm4494_vm13, %v4516_v21, 0.0  ;;  %v4529_v62 = vsel %vm4494_vm13, %v4519_v52, 0.0 }
 0x804   : > { %4527 = vadd.xlane.f32.xlu2 %v4526_v50  ;;  %4524 = vadd.xlane.f32.xlu1 %v4523_v14 }
 0x805   : > { %4521 = vadd.xlane.f32.xlu0 %v4520_v31 }
 0x80d   : > { %4530 = vadd.xlane.f32.xlu0 %v4529_v62 }
 0x877   : > { %v4528_v12 = vpop.xlane.xlu2 %4527  ;;  %v4525_v60 = vpop.xlane.xlu1 %4524 }
 0x878   : > { %v4538_v1 = vadd.f32 %v4534_v8, %v4528_v12  ;;  %v4537_v25 = vadd.f32 %v4533_v19, %v4525_v60  ;;  %v4522_v56 = vpop.xlane.xlu0 %4521 }
 0x879   : > { %v4536_v53 = vadd.f32 %v4532_v4, %v4522_v56 }
 0x87a   : > { %v4542_v46 = vsub.f32 0.0, %v4538_v1  ;;  %v4541_v32 = vsub.f32 0.0, %v4537_v25 }
 0x87b   : > { %v4540_v30 = vsub.f32 0.0, %v4536_v53 }
 0x87c   : > { %v4548_v42 = vmul.f32 1.442695, %v4542_v46  ;;  %v4546_v58 = vmul.f32 1.442695, %v4541_v32 }
 0x87d   : > { %v4544_v59 = vmul.f32 1.442695, %v4540_v30 }
 0x87e   : > { %5698 = vpow2.f32 %v4548_v42 }
 0x87f   : > { %5700 = vpow2.f32 %v4546_v58 }
 0x880   : > { %5702 = vpow2.f32 %v4544_v59  ;;  %v4531_v44 = vpop.xlane.xlu0 %4530 }
 0x881   : > { %v4539_v35 = vadd.f32 %v4535_v57, %v4531_v44 }
 0x883   : > { %v4543_v9 = vsub.f32 0.0, %v4539_v35 }
 0x884   : > { %v5699_v11 = vpop.eup %5698 }
 0x885   : > { %v5701_v27 = vpop.eup %5700  ;;  %v4554_v0 = vadd.f32 1.0, %v5699_v11  ;;  %v4550_v20 = vmul.f32 1.442695, %v4543_v9 }
 0x886   : > { %v5703_v33 = vpop.eup %5702  ;;  %v4553_v40 = vadd.f32 1.0, %v5701_v27 }
 0x887   : > { %5704 = vrcp.f32 %v4554_v0  ;;  %v4552_v49 = vadd.f32 1.0, %v5703_v33  ;;  %vm4591_vm8 = vweird.f32 %v4554_v0  ;;  %v4595_v28 = vand.u32 2147483647, %v4554_v0 }
 0x888   : > { %5706 = vrcp.f32 %v4553_v40  ;;  %v4580_v3 = vand.u32 2147483647, %v4553_v40  ;;  %v4597_v55 = vand.u32 2147483648, %v4554_v0  ;;  %v4582_v39 = vand.u32 2147483648, %v4553_v40 }
 0x889   : > { %5708 = vrcp.f32 %v4552_v49  ;;  %v4567_v14 = vand.u32 2147483648, %v4552_v49  ;;  %v4565_v52 = vand.u32 2147483647, %v4552_v49  ;;  %vm4576_vm12 = vweird.f32 %v4553_v40 }
 0x88a   : > { %5710 = vpow2.f32 %v4550_v20  ;;  %vm4596_vm15 = vcmp.eq.f32.partialorder %v4595_v28, 8.507059e+37  ;;  %v4598_v8 = vor.u32 1.1754944e-38, %v4597_v55  ;;  %v4583_v19 = vor.u32 1.1754944e-38, %v4582_v39  ;;  %v5728_v28 = vld [vmem:[%s6016_s19 + $0x8] sm:$0xff] }
 0x88b   : > { %vm4561_vm14 = vweird.f32 %v4552_v49  ;;  %vm4581_vm1 = vcmp.eq.f32.partialorder %v4580_v3, 8.507059e+37  ;;  %v4568_v25 = vor.u32 1.1754944e-38, %v4567_v14  ;;  %vm4566_vm3 = vcmp.eq.f32.partialorder %v4565_v52, 8.507059e+37 }
 0x88d   : > { %v5705_v36 = vpop.eup %5704 }
 0x88e   : > { %v5707_v5 = vpop.eup %5706  ;;  %v4587_v18 = vmul.f32 %v5705_v36, %v4554_v0  ;;  %vm4592_vm5 = vweird.f32 %v5705_v36 }
 0x88f   : > { %v5709_v23 = vpop.eup %5708  ;;  %v4572_v16 = vmul.f32 %v5707_v5, %v4553_v40  ;;  %vm4577_vm9 = vweird.f32 %v5707_v5  ;;  %vm4593_vm0 = vmor %vm4591_vm8, %vm4592_vm5  ;;  %v5723_v40 = vld [vmem:[%s6016_s19 + $0x10] sm:$0xff] }
 0x890   : > { %v5711_v37 = vpop.eup %5710  ;;  %v4588_v48 = vsub.f32 1.0, %v4587_v18  ;;  %v4557_v6 = vmul.f32 %v5709_v23, %v4552_v49  ;;  %vm4562_vm7 = vweird.f32 %v5709_v23  ;;  %vm4578_vm6 = vmor %vm4576_vm12, %vm4577_vm9  ;;  %v5724_v49 = vld [vmem:[%s6016_s19 + $0x18] sm:$0xff] }
 0x891   : > { %v4555_v45 = vadd.f32 1.0, %v5711_v37  ;;  %v4573_v10 = vsub.f32 1.0, %v4572_v16  ;;  %vm4563_vm10 = vmor %vm4561_vm14, %vm4562_vm7  ;;  %v5726_v37 = vld [vmem:[%s6016_s19 + $0x28] sm:$0xff] }
 0x892   : > { %v4589_v61 = vmul.f32 %v5705_v36, %v4588_v48  ;;  %v4558_v21 = vsub.f32 1.0, %v4557_v6  ;;  %v5730_v6 = vld [vmem:[%s6016_s19 + $0x38] sm:$0xff] }
 0x893   : > { %5712 = vrcp.f32 %v4555_v45  ;;  %v4574_v50 = vmul.f32 %v5707_v5, %v4573_v10  ;;  %v4612_v58 = vand.u32 2147483648, %v4555_v45  ;;  %v4610_v57 = vand.u32 2147483647, %v4555_v45 }
 0x894   : > { %v4590_v31 = vadd.f32 %v5705_v36, %v4589_v61  ;;  %v4559_v2 = vmul.f32 %v5709_v23, %v4558_v21  ;;  %vm4606_vm11 = vweird.f32 %v4555_v45 }
 0x895   : > { %v4575_v62 = vadd.f32 %v5707_v5, %v4574_v50  ;;  %v4613_v35 = vor.u32 1.1754944e-38, %v4612_v58  ;;  %vm4611_vm13 = vcmp.eq.f32.partialorder %v4610_v57, 8.507059e+37 }
 0x896   : > { %v4594_v4 = vsel %vm4593_vm0, %v5705_v36, %v4590_v31  ;;  %v4560_v12 = vadd.f32 %v5709_v23, %v4559_v2 }
 0x897   : > { %v4579_v60 = vsel %vm4578_vm6, %v5707_v5, %v4575_v62  ;;  %v4599_v1 = vsel %vm4596_vm15, %v4598_v8, %v4594_v4 }
 0x898   : > { %v4584_v56 = vsel %vm4581_vm1, %v4583_v19, %v4579_v60  ;;  %4628 = vperm.xlu0 %5697, %v4599_v1   ;;  %v4564_v53 = vsel %vm4563_vm10, %v5709_v23, %v4560_v12  ;;  %v5725_v23 = vld [vmem:[%s6016_s19 + $0x20] sm:$0xff] }
 0x899   : > { %v5713_v46 = vpop.eup %5712  ;;  %4623 = vperm.xlu2 %5696, %v4584_v56   ;;  %v4569_v32 = vsel %vm4566_vm3, %v4568_v25, %v4564_v53 }
 0x89a   : > { %4618 = vperm.xlu1 %5695, %v4569_v32   ;;  %v4602_v30 = vmul.f32 %v5713_v46, %v4555_v45  ;;  %vm4607_vm2 = vweird.f32 %v5713_v46 }
 0x89b   : > { %vm4608_vm4 = vmor %vm4606_vm11, %vm4607_vm2 }
 0x89c   : > { %v4603_v42 = vsub.f32 1.0, %v4602_v30 }
 0x89e   : > { %v4604_v59 = vmul.f32 %v5713_v46, %v4603_v42 }
 0x8a0   : > { %v4605_v44 = vadd.f32 %v5713_v46, %v4604_v59 }
 0x8a2   : > { %v4609_v9 = vsel %vm4608_vm4, %v5713_v46, %v4605_v44 }
 0x8a3   : > { %v4614_v11 = vsel %vm4611_vm13, %v4613_v35, %v4609_v9 }
 0x8a4   : > { %4633 = vperm.xlu1 %5695, %v4614_v11  }
 0x8f3   : > { %v4624_v27 = vpop.permute.xlu2 %4623 }
 0x8f4   : > { %v4638_v0 = vmul.f32 %v4624_v27, %v4464_v15  ;;  %v4639_v33 = vmul.f32 %v4624_v27, %v4465_v7 }
 0x8f6   : > { %v4646_v20 = vadd.f32 %v5723_v40, %v4638_v0  ;;  %v4647_v36 = vadd.f32 %v5724_v49, %v4639_v33 }
 0x8f8   : > { %4654 = vst [vmem:[%s8029_s17 + $0x10] sm:$0xff] %v4646_v20 }
 0x8f9   : > { %4655 = vst [vmem:[%s8029_s17 + $0x18] sm:$0xff] %v4647_v36 }
 0x90a   : > { %v4629_v13 = vpop.permute.xlu0 %4628 }
 0x90b   : > { %v4640_v17 = vmul.f32 %v4629_v13, %v4466_v22  ;;  %v4641_v15 = vmul.f32 %v4629_v13, %v4467_v51 }
 0x90c   : > { %v4619_v7 = vpop.permute.xlu1 %4618 }
 0x90d   : > { %v4636_v5 = vmul.f32 %v4619_v7, %v4462_v29  ;;  %v4637_v18 = vmul.f32 %v4619_v7, %v4463_v54  ;;  %v4648_v16 = vadd.f32 %v5725_v23, %v4640_v17  ;;  %v4649_v48 = vadd.f32 %v5726_v37, %v4641_v15  ;;  %v5729_v54 = vld [vmem:[%s6016_s19 + $0x30] sm:$0xff] }
 0x90f   : > { %v4644_v22 = vadd.f32 %v5727_v26, %v4636_v5  ;;  %v4645_v43 = vadd.f32 %v5728_v28, %v4637_v18  ;;  %4656 = vst [vmem:[%s8029_s17 + $0x20] sm:$0xff] %v4648_v16 }
 0x910   : > { %4657 = vst [vmem:[%s8029_s17 + $0x28] sm:$0xff] %v4649_v48 }
 0x911   : > { %4652 = vst [vmem:[%s8029_s17] sm:$0xff] %v4644_v22 }
 0x912   : > { %4653 = vst [vmem:[%s8029_s17 + $0x8] sm:$0xff] %v4645_v43 }
 0x916   : > { %v4634_v47 = vpop.permute.xlu1 %4633 }
 0x917   : > { %v4642_v24 = vmul.f32 %v4634_v47, %v4468_v63  ;;  %v4643_v29 = vmul.f32 %v4634_v47, %v4469_v34 }
 0x919   : > { %v4650_v51 = vadd.f32 %v5729_v54, %v4642_v24  ;;  %v4651_v45 = vadd.f32 %v5730_v6, %v4643_v29 }
 0x91b   : > { %4658 = vst [vmem:[%s8029_s17 + $0x30] sm:$0xff] %v4650_v51 }
 0x91c   : > { %4659 = vst [vmem:[%s8029_s17 + $0x38] sm:$0xff] %v4651_v45 }
 0x91d   : > { %5788 = shalt.err (!%p5785_p4)
}
 0x91e   : > { %s5848_s18 = smov 256  }
 0x91f   : > { %5631 = dma.vmem_to_hbm [thread:$0]  (%p5974_p11), %s4674_s25, 1024, %s4676_s0, %s4661_s1, %s5848_s18, %s5848_s18, %s8332_s15  }
 0x920 PF: > { %s8475_s19 = sld [smem:[#allocation10_spill]]  ;;  %p8477_p7 = scmp.ge.s32.totalorder %s5827_s16, 2 }
 0x922   : > { %p5638_p5 = pnand %p8477_p7, %p5978_p12 }
 0x924   : > { %p5639_p8 = pneg %p5638_p5 }
 0x926   : > { %s4690_s22 = sand.u32 1, %s8475_s19  }
 0x927   : > { %s4691_s24 = scalar_lea.sflag [#allocation6], %s4690_s22 }
 0x928   : > { %5810 = dma.done.wait (%p5639_p8), %s4691_s24, 1024  }
 0x929   : > { %5812 = vsyncadd (%p5639_p8), %s4691_s24, 4294966272  ;;  %s8478_s16 = sld [smem:[#allocation13_spill]]  ;;  %s8481_s29 = smov %s5819_s30 }
 0x92a   : > { %s8479_s27 = sld [smem:[#allocation11_spill]] }
 0x92b   : > { %s8480_s15 = sld [smem:[#allocation14_spill]] }
 0x92f   : > { %p27_p10 = scmp.ge.s32.totalorder %s8478_s16, 4  }
 0x930   : > { %s8482_s30 = smov %s8479_s27 }
 0x931   :  { %29 = sbr.rel (!%p27_p10) target bundleno = 9 (0x9), region = 121 }
 0x936   :  { %4697 = vsyncpa [#allocation5], 1 }
 0x937   :  { %4699 = vsyncpa [#allocation5 + $0x1], 1 }
 0x938   :  { %4700 = vsyncpa [#allocation6], 1 }
 0x939   :  { %4702 = vsyncpa [#allocation6 + $0x1], 1 }

</bundles_post_ra>
